<compile_context>
chip_gen: v5e
topology: v5e:2x2
jax: 0.10.0
libtpu: 0.0.40
codegen_flags: <defaults>
</compile_context>

<pallas_src>
import jax
import jax.numpy as jnp
from jax.experimental import pallas as pl
from jax.experimental.pallas import tpu as pltpu  # noqa: F401  (TPU backend)

# ---------------- model sizes (fixed by the module's forward) -----------------
NUM_TEMPORAL = 8          # num_temporal
NUM_SPATIAL = 8           # num_spatial
NUM_ST = 16               # num_spatial_tempoal
MAP_SIZE = 8              # map_size
INPUT_LEN = 7             # input_len (forward hard-codes a loop over 7 steps)
HIDDEN = NUM_TEMPORAL + NUM_ST     # LSTM hidden size = 24
HIDDEN_PAD = 32                    # lane-aligned hidden (4*32 = 128 gate lanes)
ST_LANES = INPUT_LEN * NUM_ST      # 112 lanes for the 7 spatio-temporal slices
GC_LANES = ST_LANES + NUM_SPATIAL  # 120 lanes total in the fused GCN slab


# ===================== kernel 1: all GCNs + bias + ReLU ========================
def gcn_relu_kernel(xc_ref, adjk_ref, w_ref, b_ref, stv_ref, sv_ref):
    # xc   : (B*M*M, 120)  rows = (b, i, j), lanes = [7 ST slices | spatial]
    # adjk : (B*M*M, B*M*M) = I_{B*M} (x) adj   (adjacency on the j axis)
    # w    : (120, 120) block-diagonal channel-mixing weight (7 x 16x16, 1 x 8x8)
    sup = jnp.dot(xc_ref[...], w_ref[...], preferred_element_type=jnp.float32)
    out = jnp.dot(adjk_ref[...], sup, preferred_element_type=jnp.float32)
    act = jnp.maximum(out + b_ref[...], 0.0)
    stv_ref[...] = act[:, :ST_LANES]      # (128, 112) spatio-temporal activations
    sv_ref[...] = act[:, ST_LANES:]       # (128, 8)   spatial activations


# ============== kernel 2: FC -> LSTM (unrolled) -> FC2/FC3 + ReLU ==============
def head_kernel(stv_ref, sv_ref, tmp_ref,
                fcw_ref, fcb_ref, fc2w_ref, fc2b_ref,
                wia_ref, wib_ref, whh_ref, lb_ref,
                w3h_ref, w3s_ref, b3_ref, o_ref):
    B = stv_ref.shape[0]
    L = tmp_ref.shape[1]
    nst = wia_ref.shape[0]            # 16
    HP = whh_ref.shape[0]             # padded hidden = 32 (4*HP = 128 gate lanes)

    # FC on the flattened spatio-temporal activations: (B, 7168) @ (7168, 112)
    fc_out = (jnp.dot(stv_ref[...], fcw_ref[...],
                      preferred_element_type=jnp.float32) + fcb_ref[...])   # (B, 112)
    # FC2 on the flattened spatial activations: (B, 512) @ (512, 8)
    sv_fc = (jnp.dot(sv_ref[...], fc2w_ref[...],
                     preferred_element_type=jnp.float32) + fc2b_ref[...])   # (B, 8)

    tmp = tmp_ref[...]                                                      # (B, L, 8)
    wia = wia_ref[...]
    wib = wib_ref[...]
    whh = whh_ref[...]
    lb = lb_ref[...]

    # Single-layer LSTM over the 7 merged steps. Hidden is padded 24 -> 32 with
    # zero weight rows/cols/bias, so padded state lanes stay exactly 0 and each
    # gate is a clean 32-lane slab. h/c live in registers; no per-step stores.
    h = jnp.zeros((B, HP), jnp.float32)
    c = jnp.zeros((B, HP), jnp.float32)
    for t in range(L):                               # static unroll, L = 7
        x_s = fc_out[:, t * nst:(t + 1) * nst]       # (B, 16) stv part of the input
        x_t = tmp[:, t, :]                           # (B, 8)  temporal part
        gates = (jnp.dot(x_s, wia, preferred_element_type=jnp.float32)
                 + jnp.dot(x_t, wib, preferred_element_type=jnp.float32)
                 + jnp.dot(h, whh, preferred_element_type=jnp.float32)
                 + lb)                               # (B, 128) = 4 gates x 32 lanes
        i_g = jax.nn.sigmoid(gates[:, 0 * HP:1 * HP])
        f_g = jax.nn.sigmoid(gates[:, 1 * HP:2 * HP])
        g_g = jnp.tanh(gates[:, 2 * HP:3 * HP])
        o_g = jax.nn.sigmoid(gates[:, 3 * HP:4 * HP])
        c = f_g * c + i_g * g_g
        h = o_g * jnp.tanh(c)

    # FC3(concat(h_n, FC2_out)) + ReLU, with the concat removed algebraically:
    #   W3 @ [h; sv] = W3_h @ h + W3_s @ sv
    final = (jnp.dot(h, w3h_ref[...], preferred_element_type=jnp.float32)
             + jnp.dot(sv_fc, w3s_ref[...], preferred_element_type=jnp.float32)
             + b3_ref[...])
    o_ref[...] = jnp.maximum(final, 0.0)


# ------------------------------ full forward ----------------------------------
def neural_net_forward(params, x, adj):
    B, L, M, _, _ = x.shape
    nt, ns, nst = NUM_TEMPORAL, NUM_SPATIAL, NUM_ST
    R = B * M * M

    # Adjacency lifted to the flattened (b, i, j) row index; torch.matmul
    # broadcasting of adj @ support contracts the second spatial axis (j).
    adjk = jnp.kron(jnp.eye(B * M, dtype=jnp.float32), adj.astype(jnp.float32))

    # Wrapper-side layout plumbing (tiny XLA ops): present a single lane-dense
    # GCN input slab (rows = (b,i,j), lanes = [l*16+c for 7 ST slices | spatial]).
    x_st = (x[:, :, :, :, nt + ns:nt + ns + nst]
            .transpose(0, 2, 3, 1, 4).reshape(R, L * nst))          # (128, 112)
    x_sp = x[:, 0, :, :, nt:nt + ns].reshape(R, ns)                 # (128, 8)
    x_comb = jnp.concatenate([x_st, x_sp], axis=1).astype(jnp.float32)
    temporal = x[:, :, 0, 0, 0:nt].astype(jnp.float32)              # (B, L, 8)

    stv_act, sv_act = pl.pallas_call(
        gcn_relu_kernel,
        out_shape=(jax.ShapeDtypeStruct((R, L * nst), jnp.float32),
                   jax.ShapeDtypeStruct((R, ns), jnp.float32)),
    )(x_comb, adjk, params["gc_w"], params["gc_b"])

    # Contiguous (free) reshapes; the FC weight rows were permuted at init so
    # this (i, j, l, c) ordering matches torch's (l, i, j, c) flatten exactly.
    stv_flat = stv_act.reshape(B, M * M * L * nst)    # (B, 7168)
    sv_flat = sv_act.reshape(B, M * M * ns)           # (B, 512)

    return pl.pallas_call(
        head_kernel,
        out_shape=jax.ShapeDtypeStruct((B, 1), jnp.float32),
    )(stv_flat, sv_flat, temporal,
      params["fc_w_t"], params["fc_b"], params["fc2_w_t"], params["fc2_b"],
      params["wih_a"], params["wih_b"], params["whh"], params["lstm_b"],
      params["w3h"], params["w3s"], params["fc3_b"])


# --------------------- deterministic parameter init + packing ------------------
def init_params(key):
    ks = jax.random.split(key, 14)
    s = 0.1

    def rnd(k, shape):
        return jax.random.normal(k, shape, jnp.float32) * s

    nt, ns, nst, M, L = NUM_TEMPORAL, NUM_SPATIAL, NUM_ST, MAP_SIZE, INPUT_LEN
    H, HP = HIDDEN, HIDDEN_PAD

    # GraphConvolution weights (out = adj @ (x @ W) + b), one per time slice
    cnn3d_w = rnd(ks[0], (L, nst, nst))
    cnn3d_b = rnd(ks[1], (L, nst))
    twod_w = rnd(ks[2], (ns, ns))
    twod_b = rnd(ks[3], (ns,))

    # nn.Linear weights in native (out, in) layout
    fc_w = rnd(ks[4], (nst * L, M * M * nst * L))
    fc_b = rnd(ks[5], (1, nst * L))
    fc2_w = rnd(ks[6], (ns, M * M * ns))
    fc2_b = rnd(ks[7], (1, ns))
    fc3_w = rnd(ks[8], (1, nt + ns + nst))    # acts on concat(h_n[24], fc2_out[8])
    fc3_b = rnd(ks[9], (1, 1))

    # nn.LSTM weights, PyTorch layout (4H, in), gate order i, f, g, o
    w_ih = rnd(ks[10], (4 * H, H))
    w_hh = rnd(ks[11], (4 * H, H))
    b_ih = rnd(ks[12], (4 * H,))
    b_hh = rnd(ks[13], (4 * H,))

    # --- fused block-diagonal GCN weight/bias (lanes: 7 ST slices then spatial)
    gc_w = jnp.zeros((GC_LANES, GC_LANES), jnp.float32)
    for l in range(L):
        gc_w = gc_w.at[l * nst:(l + 1) * nst, l * nst:(l + 1) * nst].set(cnn3d_w[l])
    gc_w = gc_w.at[L * nst:, L * nst:].set(twod_w)
    gc_b = jnp.concatenate([cnn3d_b.reshape(-1), twod_b]).reshape(1, GC_LANES)

    # --- FC weight transposed AND row-permuted: torch flatten order (l, i, j, c)
    #     -> kernel-1 activation order (i, j, l, c), done once at init.
    fc_w_t = (fc_w.reshape(nst * L, L, M * M, nst)
              .transpose(2, 1, 3, 0).reshape(M * M * L * nst, nst * L))  # (7168, 112)
    fc2_w_t = fc2_w.T                                                    # (512, 8)

    # --- LSTM packed into a lane-aligned layout: hidden padded 24 -> 32 so each
    # gate occupies a 32-lane slab of the 128-lane gate vector.  All padded
    # rows/cols/bias entries are ZERO, so padded state lanes stay exactly 0.
    def pack_gate_cols(w):       # (4H, K) -> (K, 4*HP), column index = g*HP + h
        w4 = w.reshape(4, H, w.shape[1])
        wp = jnp.zeros((4, HP, w.shape[1]), jnp.float32).at[:, :H, :].set(w4)
        return wp.transpose(2, 0, 1).reshape(w.shape[1], 4 * HP)

    wih_t = pack_gate_cols(w_ih)                    # (24, 128)
    wih_a = wih_t[:nst, :]                          # (16, 128): stv part of the input
    wih_b = wih_t[nst:, :]                          # (8, 128):  temporal part
    whh = jnp.zeros((HP, 4 * HP), jnp.float32).at[:H, :].set(pack_gate_cols(w_hh))
    lstm_b = (jnp.zeros((4, HP), jnp.float32)
              .at[:, :H].set((b_ih + b_hh).reshape(4, H))
              .reshape(1, 4 * HP))

    # FC3 split: columns 0:24 act on h_n (padded to 32), columns 24:32 on FC2 out
    w3h = jnp.zeros((HP, 1), jnp.float32).at[:H, :].set(fc3_w[:, :H].T)
    w3s = fc3_w[:, H:].T                            # (8, 1)

    return {
        "gc_w": gc_w, "gc_b": gc_b,
        "fc_w_t": fc_w_t, "fc_b": fc_b,
        "fc2_w_t": fc2_w_t, "fc2_b": fc2_b,
        "wih_a": wih_a, "wih_b": wih_b, "whh": whh, "lstm_b": lstm_b,
        "w3h": w3h, "w3s": w3s, "fc3_b": fc3_b,
    }


if __name__ == "__main__":
    key = jax.random.PRNGKey(0)
    k_p, k_x, k_a = jax.random.split(key, 3)

    B = 2
    C_total = NUM_TEMPORAL + NUM_SPATIAL + NUM_ST          # 40 channels
    x = jax.random.normal(k_x, (B, INPUT_LEN, MAP_SIZE, MAP_SIZE, C_total),
                          jnp.float32)
    adj = (jax.random.normal(k_a, (MAP_SIZE, MAP_SIZE), jnp.float32) * 0.1
           + jnp.eye(MAP_SIZE, dtype=jnp.float32))

    params = init_params(k_p)
    out = jax.jit(neural_net_forward)(params, x, adj)
    out = jax.block_until_ready(out)
    assert out.shape == (B, 1)
    print("KERNEL_OK")
</pallas_src>

<mosaic_0001>
module attributes {stable_mosaic.version = 11 : i64} {
  func.func @head_kernel(%arg0: memref<2x7168xf32, #tpu.memory_space<vmem>>, %arg1: memref<2x512xf32, #tpu.memory_space<vmem>>, %arg2: memref<2x7x8xf32, #tpu.memory_space<vmem>>, %arg3: memref<7168x112xf32, #tpu.memory_space<vmem>>, %arg4: memref<1x112xf32, #tpu.memory_space<vmem>>, %arg5: memref<512x8xf32, #tpu.memory_space<vmem>>, %arg6: memref<1x8xf32, #tpu.memory_space<vmem>>, %arg7: memref<16x128xf32, #tpu.memory_space<vmem>>, %arg8: memref<8x128xf32, #tpu.memory_space<vmem>>, %arg9: memref<32x128xf32, #tpu.memory_space<vmem>>, %arg10: memref<1x128xf32, #tpu.memory_space<vmem>>, %arg11: memref<32x1xf32, #tpu.memory_space<vmem>>, %arg12: memref<8x1xf32, #tpu.memory_space<vmem>>, %arg13: memref<1x1xf32, #tpu.memory_space<vmem>>, %arg14: memref<2x1xf32, #tpu.memory_space<vmem>>) attributes {dimension_semantics = [], scalar_prefetch = 0 : i64, scratch_operands = 0 : i64, tpu.core_type = #tpu.core_type<tc>} {
    %c0 = arith.constant 0 : index
    %c0_0 = arith.constant 0 : index
    %0 = vector.load %arg0[%c0, %c0_0] : memref<2x7168xf32, #tpu.memory_space<vmem>>, vector<2x7168xf32>
    %c0_1 = arith.constant 0 : index
    %c0_2 = arith.constant 0 : index
    %1 = vector.load %arg3[%c0_1, %c0_2] : memref<7168x112xf32, #tpu.memory_space<vmem>>, vector<7168x112xf32>
    %cst = arith.constant dense<0.000000e+00> : vector<2x112xf32>
    %2 = tpu.matmul %0, %1, %cst {dimension_numbers = #tpu.dot_dimension_numbers<[1], [0], [0], [1], [0, 0, 1, 1], [], []>} : vector<2x7168xf32>, vector<7168x112xf32>, vector<2x112xf32> -> vector<2x112xf32>
    %c0_3 = arith.constant 0 : index
    %c0_4 = arith.constant 0 : index
    %3 = vector.load %arg4[%c0_3, %c0_4] : memref<1x112xf32, #tpu.memory_space<vmem>>, vector<1x112xf32>
    %4 = vector.broadcast %3 : vector<1x112xf32> to vector<2x112xf32>
    %5 = arith.addf %2, %4 : vector<2x112xf32>
    %c0_5 = arith.constant 0 : index
    %c0_6 = arith.constant 0 : index
    %6 = vector.load %arg1[%c0_5, %c0_6] : memref<2x512xf32, #tpu.memory_space<vmem>>, vector<2x512xf32>
    %c0_7 = arith.constant 0 : index
    %c0_8 = arith.constant 0 : index
    %7 = vector.load %arg5[%c0_7, %c0_8] : memref<512x8xf32, #tpu.memory_space<vmem>>, vector<512x8xf32>
    %cst_9 = arith.constant dense<0.000000e+00> : vector<2x8xf32>
    %8 = tpu.matmul %6, %7, %cst_9 {dimension_numbers = #tpu.dot_dimension_numbers<[1], [0], [0], [1], [0, 0, 1, 1], [], []>} : vector<2x512xf32>, vector<512x8xf32>, vector<2x8xf32> -> vector<2x8xf32>
    %c0_10 = arith.constant 0 : index
    %c0_11 = arith.constant 0 : index
    %9 = vector.load %arg6[%c0_10, %c0_11] : memref<1x8xf32, #tpu.memory_space<vmem>>, vector<1x8xf32>
    %10 = vector.broadcast %9 : vector<1x8xf32> to vector<2x8xf32>
    %11 = arith.addf %8, %10 : vector<2x8xf32>
    %c0_12 = arith.constant 0 : index
    %c0_13 = arith.constant 0 : index
    %c0_14 = arith.constant 0 : index
    %12 = vector.load %arg2[%c0_12, %c0_13, %c0_14] : memref<2x7x8xf32, #tpu.memory_space<vmem>>, vector<2x7x8xf32>
    %c0_15 = arith.constant 0 : index
    %c0_16 = arith.constant 0 : index
    %13 = vector.load %arg7[%c0_15, %c0_16] : memref<16x128xf32, #tpu.memory_space<vmem>>, vector<16x128xf32>
    %c0_17 = arith.constant 0 : index
    %c0_18 = arith.constant 0 : index
    %14 = vector.load %arg8[%c0_17, %c0_18] : memref<8x128xf32, #tpu.memory_space<vmem>>, vector<8x128xf32>
    %c0_19 = arith.constant 0 : index
    %c0_20 = arith.constant 0 : index
    %15 = vector.load %arg9[%c0_19, %c0_20] : memref<32x128xf32, #tpu.memory_space<vmem>>, vector<32x128xf32>
    %c0_21 = arith.constant 0 : index
    %c0_22 = arith.constant 0 : index
    %16 = vector.load %arg10[%c0_21, %c0_22] : memref<1x128xf32, #tpu.memory_space<vmem>>, vector<1x128xf32>
    %cst_23 = arith.constant 0.000000e+00 : f32
    %17 = vector.broadcast %cst_23 : f32 to vector<2x32xf32>
    %cst_24 = arith.constant 0.000000e+00 : f32
    %18 = vector.broadcast %cst_24 : f32 to vector<2x32xf32>
    %19 = vector.extract_strided_slice %5 {offsets = [0, 0], sizes = [2, 16], strides = [1, 1]} : vector<2x112xf32> to vector<2x16xf32>
    %20 = vector.extract_strided_slice %12 {offsets = [0, 0, 0], sizes = [2, 1, 8], strides = [1, 1, 1]} : vector<2x7x8xf32> to vector<2x1x8xf32>
    %21 = vector.shape_cast %20 : vector<2x1x8xf32> to vector<2x8xf32>
    %cst_25 = arith.constant dense<0.000000e+00> : vector<2x128xf32>
    %22 = tpu.matmul %19, %13, %cst_25 {dimension_numbers = #tpu.dot_dimension_numbers<[1], [0], [0], [1], [0, 0, 1, 1], [], []>} : vector<2x16xf32>, vector<16x128xf32>, vector<2x128xf32> -> vector<2x128xf32>
    %cst_26 = arith.constant dense<0.000000e+00> : vector<2x128xf32>
    %23 = tpu.matmul %21, %14, %cst_26 {dimension_numbers = #tpu.dot_dimension_numbers<[1], [0], [0], [1], [0, 0, 1, 1], [], []>} : vector<2x8xf32>, vector<8x128xf32>, vector<2x128xf32> -> vector<2x128xf32>
    %24 = arith.addf %22, %23 : vector<2x128xf32>
    %cst_27 = arith.constant dense<0.000000e+00> : vector<2x128xf32>
    %25 = tpu.matmul %17, %15, %cst_27 {dimension_numbers = #tpu.dot_dimension_numbers<[1], [0], [0], [1], [0, 0, 1, 1], [], []>} : vector<2x32xf32>, vector<32x128xf32>, vector<2x128xf32> -> vector<2x128xf32>
    %26 = arith.addf %24, %25 : vector<2x128xf32>
    %27 = vector.broadcast %16 : vector<1x128xf32> to vector<2x128xf32>
    %28 = arith.addf %26, %27 : vector<2x128xf32>
    %29 = vector.extract_strided_slice %28 {offsets = [0, 0], sizes = [2, 32], strides = [1, 1]} : vector<2x128xf32> to vector<2x32xf32>
    %30 = arith.negf %29 : vector<2x32xf32>
    %31 = math.exp %30 : vector<2x32xf32>
    %cst_28 = arith.constant 1.000000e+00 : f32
    %32 = vector.broadcast %cst_28 : f32 to vector<2x32xf32>
    %33 = arith.addf %32, %31 : vector<2x32xf32>
    %34 = arith.divf %32, %33 : vector<2x32xf32>
    %35 = vector.extract_strided_slice %28 {offsets = [0, 32], sizes = [2, 32], strides = [1, 1]} : vector<2x128xf32> to vector<2x32xf32>
    %36 = arith.negf %35 : vector<2x32xf32>
    %37 = math.exp %36 : vector<2x32xf32>
    %cst_29 = arith.constant 1.000000e+00 : f32
    %38 = vector.broadcast %cst_29 : f32 to vector<2x32xf32>
    %39 = arith.addf %38, %37 : vector<2x32xf32>
    %40 = arith.divf %38, %39 : vector<2x32xf32>
    %41 = vector.extract_strided_slice %28 {offsets = [0, 64], sizes = [2, 32], strides = [1, 1]} : vector<2x128xf32> to vector<2x32xf32>
    %42 = math.tanh %41 : vector<2x32xf32>
    %43 = vector.extract_strided_slice %28 {offsets = [0, 96], sizes = [2, 32], strides = [1, 1]} : vector<2x128xf32> to vector<2x32xf32>
    %44 = arith.negf %43 : vector<2x32xf32>
    %45 = math.exp %44 : vector<2x32xf32>
    %cst_30 = arith.constant 1.000000e+00 : f32
    %46 = vector.broadcast %cst_30 : f32 to vector<2x32xf32>
    %47 = arith.addf %46, %45 : vector<2x32xf32>
    %48 = arith.divf %46, %47 : vector<2x32xf32>
    %49 = arith.mulf %40, %18 : vector<2x32xf32>
    %50 = arith.mulf %34, %42 : vector<2x32xf32>
    %51 = arith.addf %49, %50 : vector<2x32xf32>
    %52 = math.tanh %51 : vector<2x32xf32>
    %53 = arith.mulf %48, %52 : vector<2x32xf32>
    %54 = vector.extract_strided_slice %5 {offsets = [0, 16], sizes = [2, 16], strides = [1, 1]} : vector<2x112xf32> to vector<2x16xf32>
    %55 = vector.extract_strided_slice %12 {offsets = [0, 1, 0], sizes = [2, 1, 8], strides = [1, 1, 1]} : vector<2x7x8xf32> to vector<2x1x8xf32>
    %56 = vector.shape_cast %55 : vector<2x1x8xf32> to vector<2x8xf32>
    %cst_31 = arith.constant dense<0.000000e+00> : vector<2x128xf32>
    %57 = tpu.matmul %54, %13, %cst_31 {dimension_numbers = #tpu.dot_dimension_numbers<[1], [0], [0], [1], [0, 0, 1, 1], [], []>} : vector<2x16xf32>, vector<16x128xf32>, vector<2x128xf32> -> vector<2x128xf32>
    %cst_32 = arith.constant dense<0.000000e+00> : vector<2x128xf32>
    %58 = tpu.matmul %56, %14, %cst_32 {dimension_numbers = #tpu.dot_dimension_numbers<[1], [0], [0], [1], [0, 0, 1, 1], [], []>} : vector<2x8xf32>, vector<8x128xf32>, vector<2x128xf32> -> vector<2x128xf32>
    %59 = arith.addf %57, %58 : vector<2x128xf32>
    %cst_33 = arith.constant dense<0.000000e+00> : vector<2x128xf32>
    %60 = tpu.matmul %53, %15, %cst_33 {dimension_numbers = #tpu.dot_dimension_numbers<[1], [0], [0], [1], [0, 0, 1, 1], [], []>} : vector<2x32xf32>, vector<32x128xf32>, vector<2x128xf32> -> vector<2x128xf32>
    %61 = arith.addf %59, %60 : vector<2x128xf32>
    %62 = vector.broadcast %16 : vector<1x128xf32> to vector<2x128xf32>
    %63 = arith.addf %61, %62 : vector<2x128xf32>
    %64 = vector.extract_strided_slice %63 {offsets = [0, 0], sizes = [2, 32], strides = [1, 1]} : vector<2x128xf32> to vector<2x32xf32>
    %65 = arith.negf %64 : vector<2x32xf32>
    %66 = math.exp %65 : vector<2x32xf32>
    %cst_34 = arith.constant 1.000000e+00 : f32
    %67 = vector.broadcast %cst_34 : f32 to vector<2x32xf32>
    %68 = arith.addf %67, %66 : vector<2x32xf32>
    %69 = arith.divf %67, %68 : vector<2x32xf32>
    %70 = vector.extract_strided_slice %63 {offsets = [0, 32], sizes = [2, 32], strides = [1, 1]} : vector<2x128xf32> to vector<2x32xf32>
    %71 = arith.negf %70 : vector<2x32xf32>
    %72 = math.exp %71 : vector<2x32xf32>
    %cst_35 = arith.constant 1.000000e+00 : f32
    %73 = vector.broadcast %cst_35 : f32 to vector<2x32xf32>
    %74 = arith.addf %73, %72 : vector<2x32xf32>
    %75 = arith.divf %73, %74 : vector<2x32xf32>
    %76 = vector.extract_strided_slice %63 {offsets = [0, 64], sizes = [2, 32], strides = [1, 1]} : vector<2x128xf32> to vector<2x32xf32>
    %77 = math.tanh %76 : vector<2x32xf32>
    %78 = vector.extract_strided_slice %63 {offsets = [0, 96], sizes = [2, 32], strides = [1, 1]} : vector<2x128xf32> to vector<2x32xf32>
    %79 = arith.negf %78 : vector<2x32xf32>
    %80 = math.exp %79 : vector<2x32xf32>
    %cst_36 = arith.constant 1.000000e+00 : f32
    %81 = vector.broadcast %cst_36 : f32 to vector<2x32xf32>
    %82 = arith.addf %81, %80 : vector<2x32xf32>
    %83 = arith.divf %81, %82 : vector<2x32xf32>
    %84 = arith.mulf %75, %51 : vector<2x32xf32>
    %85 = arith.mulf %69, %77 : vector<2x32xf32>
    %86 = arith.addf %84, %85 : vector<2x32xf32>
    %87 = math.tanh %86 : vector<2x32xf32>
    %88 = arith.mulf %83, %87 : vector<2x32xf32>
    %89 = vector.extract_strided_slice %5 {offsets = [0, 32], sizes = [2, 16], strides = [1, 1]} : vector<2x112xf32> to vector<2x16xf32>
    %90 = vector.extract_strided_slice %12 {offsets = [0, 2, 0], sizes = [2, 1, 8], strides = [1, 1, 1]} : vector<2x7x8xf32> to vector<2x1x8xf32>
    %91 = vector.shape_cast %90 : vector<2x1x8xf32> to vector<2x8xf32>
    %cst_37 = arith.constant dense<0.000000e+00> : vector<2x128xf32>
    %92 = tpu.matmul %89, %13, %cst_37 {dimension_numbers = #tpu.dot_dimension_numbers<[1], [0], [0], [1], [0, 0, 1, 1], [], []>} : vector<2x16xf32>, vector<16x128xf32>, vector<2x128xf32> -> vector<2x128xf32>
    %cst_38 = arith.constant dense<0.000000e+00> : vector<2x128xf32>
    %93 = tpu.matmul %91, %14, %cst_38 {dimension_numbers = #tpu.dot_dimension_numbers<[1], [0], [0], [1], [0, 0, 1, 1], [], []>} : vector<2x8xf32>, vector<8x128xf32>, vector<2x128xf32> -> vector<2x128xf32>
    %94 = arith.addf %92, %93 : vector<2x128xf32>
    %cst_39 = arith.constant dense<0.000000e+00> : vector<2x128xf32>
    %95 = tpu.matmul %88, %15, %cst_39 {dimension_numbers = #tpu.dot_dimension_numbers<[1], [0], [0], [1], [0, 0, 1, 1], [], []>} : vector<2x32xf32>, vector<32x128xf32>, vector<2x128xf32> -> vector<2x128xf32>
    %96 = arith.addf %94, %95 : vector<2x128xf32>
    %97 = vector.broadcast %16 : vector<1x128xf32> to vector<2x128xf32>
    %98 = arith.addf %96, %97 : vector<2x128xf32>
    %99 = vector.extract_strided_slice %98 {offsets = [0, 0], sizes = [2, 32], strides = [1, 1]} : vector<2x128xf32> to vector<2x32xf32>
    %100 = arith.negf %99 : vector<2x32xf32>
    %101 = math.exp %100 : vector<2x32xf32>
    %cst_40 = arith.constant 1.000000e+00 : f32
    %102 = vector.broadcast %cst_40 : f32 to vector<2x32xf32>
    %103 = arith.addf %102, %101 : vector<2x32xf32>
    %104 = arith.divf %102, %103 : vector<2x32xf32>
    %105 = vector.extract_strided_slice %98 {offsets = [0, 32], sizes = [2, 32], strides = [1, 1]} : vector<2x128xf32> to vector<2x32xf32>
    %106 = arith.negf %105 : vector<2x32xf32>
    %107 = math.exp %106 : vector<2x32xf32>
    %cst_41 = arith.constant 1.000000e+00 : f32
    %108 = vector.broadcast %cst_41 : f32 to vector<2x32xf32>
    %109 = arith.addf %108, %107 : vector<2x32xf32>
    %110 = arith.divf %108, %109 : vector<2x32xf32>
    %111 = vector.extract_strided_slice %98 {offsets = [0, 64], sizes = [2, 32], strides = [1, 1]} : vector<2x128xf32> to vector<2x32xf32>
    %112 = math.tanh %111 : vector<2x32xf32>
    %113 = vector.extract_strided_slice %98 {offsets = [0, 96], sizes = [2, 32], strides = [1, 1]} : vector<2x128xf32> to vector<2x32xf32>
    %114 = arith.negf %113 : vector<2x32xf32>
    %115 = math.exp %114 : vector<2x32xf32>
    %cst_42 = arith.constant 1.000000e+00 : f32
    %116 = vector.broadcast %cst_42 : f32 to vector<2x32xf32>
    %117 = arith.addf %116, %115 : vector<2x32xf32>
    %118 = arith.divf %116, %117 : vector<2x32xf32>
    %119 = arith.mulf %110, %86 : vector<2x32xf32>
    %120 = arith.mulf %104, %112 : vector<2x32xf32>
    %121 = arith.addf %119, %120 : vector<2x32xf32>
    %122 = math.tanh %121 : vector<2x32xf32>
    %123 = arith.mulf %118, %122 : vector<2x32xf32>
    %124 = vector.extract_strided_slice %5 {offsets = [0, 48], sizes = [2, 16], strides = [1, 1]} : vector<2x112xf32> to vector<2x16xf32>
    %125 = vector.extract_strided_slice %12 {offsets = [0, 3, 0], sizes = [2, 1, 8], strides = [1, 1, 1]} : vector<2x7x8xf32> to vector<2x1x8xf32>
    %126 = vector.shape_cast %125 : vector<2x1x8xf32> to vector<2x8xf32>
    %cst_43 = arith.constant dense<0.000000e+00> : vector<2x128xf32>
    %127 = tpu.matmul %124, %13, %cst_43 {dimension_numbers = #tpu.dot_dimension_numbers<[1], [0], [0], [1], [0, 0, 1, 1], [], []>} : vector<2x16xf32>, vector<16x128xf32>, vector<2x128xf32> -> vector<2x128xf32>
    %cst_44 = arith.constant dense<0.000000e+00> : vector<2x128xf32>
    %128 = tpu.matmul %126, %14, %cst_44 {dimension_numbers = #tpu.dot_dimension_numbers<[1], [0], [0], [1], [0, 0, 1, 1], [], []>} : vector<2x8xf32>, vector<8x128xf32>, vector<2x128xf32> -> vector<2x128xf32>
    %129 = arith.addf %127, %128 : vector<2x128xf32>
    %cst_45 = arith.constant dense<0.000000e+00> : vector<2x128xf32>
    %130 = tpu.matmul %123, %15, %cst_45 {dimension_numbers = #tpu.dot_dimension_numbers<[1], [0], [0], [1], [0, 0, 1, 1], [], []>} : vector<2x32xf32>, vector<32x128xf32>, vector<2x128xf32> -> vector<2x128xf32>
    %131 = arith.addf %129, %130 : vector<2x128xf32>
    %132 = vector.broadcast %16 : vector<1x128xf32> to vector<2x128xf32>
    %133 = arith.addf %131, %132 : vector<2x128xf32>
    %134 = vector.extract_strided_slice %133 {offsets = [0, 0], sizes = [2, 32], strides = [1, 1]} : vector<2x128xf32> to vector<2x32xf32>
    %135 = arith.negf %134 : vector<2x32xf32>
    %136 = math.exp %135 : vector<2x32xf32>
    %cst_46 = arith.constant 1.000000e+00 : f32
    %137 = vector.broadcast %cst_46 : f32 to vector<2x32xf32>
    %138 = arith.addf %137, %136 : vector<2x32xf32>
    %139 = arith.divf %137, %138 : vector<2x32xf32>
    %140 = vector.extract_strided_slice %133 {offsets = [0, 32], sizes = [2, 32], strides = [1, 1]} : vector<2x128xf32> to vector<2x32xf32>
    %141 = arith.negf %140 : vector<2x32xf32>
    %142 = math.exp %141 : vector<2x32xf32>
    %cst_47 = arith.constant 1.000000e+00 : f32
    %143 = vector.broadcast %cst_47 : f32 to vector<2x32xf32>
    %144 = arith.addf %143, %142 : vector<2x32xf32>
    %145 = arith.divf %143, %144 : vector<2x32xf32>
    %146 = vector.extract_strided_slice %133 {offsets = [0, 64], sizes = [2, 32], strides = [1, 1]} : vector<2x128xf32> to vector<2x32xf32>
    %147 = math.tanh %146 : vector<2x32xf32>
    %148 = vector.extract_strided_slice %133 {offsets = [0, 96], sizes = [2, 32], strides = [1, 1]} : vector<2x128xf32> to vector<2x32xf32>
    %149 = arith.negf %148 : vector<2x32xf32>
    %150 = math.exp %149 : vector<2x32xf32>
    %cst_48 = arith.constant 1.000000e+00 : f32
    %151 = vector.broadcast %cst_48 : f32 to vector<2x32xf32>
    %152 = arith.addf %151, %150 : vector<2x32xf32>
    %153 = arith.divf %151, %152 : vector<2x32xf32>
    %154 = arith.mulf %145, %121 : vector<2x32xf32>
    %155 = arith.mulf %139, %147 : vector<2x32xf32>
    %156 = arith.addf %154, %155 : vector<2x32xf32>
    %157 = math.tanh %156 : vector<2x32xf32>
    %158 = arith.mulf %153, %157 : vector<2x32xf32>
    %159 = vector.extract_strided_slice %5 {offsets = [0, 64], sizes = [2, 16], strides = [1, 1]} : vector<2x112xf32> to vector<2x16xf32>
    %160 = vector.extract_strided_slice %12 {offsets = [0, 4, 0], sizes = [2, 1, 8], strides = [1, 1, 1]} : vector<2x7x8xf32> to vector<2x1x8xf32>
    %161 = vector.shape_cast %160 : vector<2x1x8xf32> to vector<2x8xf32>
    %cst_49 = arith.constant dense<0.000000e+00> : vector<2x128xf32>
    %162 = tpu.matmul %159, %13, %cst_49 {dimension_numbers = #tpu.dot_dimension_numbers<[1], [0], [0], [1], [0, 0, 1, 1], [], []>} : vector<2x16xf32>, vector<16x128xf32>, vector<2x128xf32> -> vector<2x128xf32>
    %cst_50 = arith.constant dense<0.000000e+00> : vector<2x128xf32>
    %163 = tpu.matmul %161, %14, %cst_50 {dimension_numbers = #tpu.dot_dimension_numbers<[1], [0], [0], [1], [0, 0, 1, 1], [], []>} : vector<2x8xf32>, vector<8x128xf32>, vector<2x128xf32> -> vector<2x128xf32>
    %164 = arith.addf %162, %163 : vector<2x128xf32>
    %cst_51 = arith.constant dense<0.000000e+00> : vector<2x128xf32>
    %165 = tpu.matmul %158, %15, %cst_51 {dimension_numbers = #tpu.dot_dimension_numbers<[1], [0], [0], [1], [0, 0, 1, 1], [], []>} : vector<2x32xf32>, vector<32x128xf32>, vector<2x128xf32> -> vector<2x128xf32>
    %166 = arith.addf %164, %165 : vector<2x128xf32>
    %167 = vector.broadcast %16 : vector<1x128xf32> to vector<2x128xf32>
    %168 = arith.addf %166, %167 : vector<2x128xf32>
    %169 = vector.extract_strided_slice %168 {offsets = [0, 0], sizes = [2, 32], strides = [1, 1]} : vector<2x128xf32> to vector<2x32xf32>
    %170 = arith.negf %169 : vector<2x32xf32>
    %171 = math.exp %170 : vector<2x32xf32>
    %cst_52 = arith.constant 1.000000e+00 : f32
    %172 = vector.broadcast %cst_52 : f32 to vector<2x32xf32>
    %173 = arith.addf %172, %171 : vector<2x32xf32>
    %174 = arith.divf %172, %173 : vector<2x32xf32>
    %175 = vector.extract_strided_slice %168 {offsets = [0, 32], sizes = [2, 32], strides = [1, 1]} : vector<2x128xf32> to vector<2x32xf32>
    %176 = arith.negf %175 : vector<2x32xf32>
    %177 = math.exp %176 : vector<2x32xf32>
    %cst_53 = arith.constant 1.000000e+00 : f32
    %178 = vector.broadcast %cst_53 : f32 to vector<2x32xf32>
    %179 = arith.addf %178, %177 : vector<2x32xf32>
    %180 = arith.divf %178, %179 : vector<2x32xf32>
    %181 = vector.extract_strided_slice %168 {offsets = [0, 64], sizes = [2, 32], strides = [1, 1]} : vector<2x128xf32> to vector<2x32xf32>
    %182 = math.tanh %181 : vector<2x32xf32>
    %183 = vector.extract_strided_slice %168 {offsets = [0, 96], sizes = [2, 32], strides = [1, 1]} : vector<2x128xf32> to vector<2x32xf32>
    %184 = arith.negf %183 : vector<2x32xf32>
    %185 = math.exp %184 : vector<2x32xf32>
    %cst_54 = arith.constant 1.000000e+00 : f32
    %186 = vector.broadcast %cst_54 : f32 to vector<2x32xf32>
    %187 = arith.addf %186, %185 : vector<2x32xf32>
    %188 = arith.divf %186, %187 : vector<2x32xf32>
    %189 = arith.mulf %180, %156 : vector<2x32xf32>
    %190 = arith.mulf %174, %182 : vector<2x32xf32>
    %191 = arith.addf %189, %190 : vector<2x32xf32>
    %192 = math.tanh %191 : vector<2x32xf32>
    %193 = arith.mulf %188, %192 : vector<2x32xf32>
    %194 = vector.extract_strided_slice %5 {offsets = [0, 80], sizes = [2, 16], strides = [1, 1]} : vector<2x112xf32> to vector<2x16xf32>
    %195 = vector.extract_strided_slice %12 {offsets = [0, 5, 0], sizes = [2, 1, 8], strides = [1, 1, 1]} : vector<2x7x8xf32> to vector<2x1x8xf32>
    %196 = vector.shape_cast %195 : vector<2x1x8xf32> to vector<2x8xf32>
    %cst_55 = arith.constant dense<0.000000e+00> : vector<2x128xf32>
    %197 = tpu.matmul %194, %13, %cst_55 {dimension_numbers = #tpu.dot_dimension_numbers<[1], [0], [0], [1], [0, 0, 1, 1], [], []>} : vector<2x16xf32>, vector<16x128xf32>, vector<2x128xf32> -> vector<2x128xf32>
    %cst_56 = arith.constant dense<0.000000e+00> : vector<2x128xf32>
    %198 = tpu.matmul %196, %14, %cst_56 {dimension_numbers = #tpu.dot_dimension_numbers<[1], [0], [0], [1], [0, 0, 1, 1], [], []>} : vector<2x8xf32>, vector<8x128xf32>, vector<2x128xf32> -> vector<2x128xf32>
    %199 = arith.addf %197, %198 : vector<2x128xf32>
    %cst_57 = arith.constant dense<0.000000e+00> : vector<2x128xf32>
    %200 = tpu.matmul %193, %15, %cst_57 {dimension_numbers = #tpu.dot_dimension_numbers<[1], [0], [0], [1], [0, 0, 1, 1], [], []>} : vector<2x32xf32>, vector<32x128xf32>, vector<2x128xf32> -> vector<2x128xf32>
    %201 = arith.addf %199, %200 : vector<2x128xf32>
    %202 = vector.broadcast %16 : vector<1x128xf32> to vector<2x128xf32>
    %203 = arith.addf %201, %202 : vector<2x128xf32>
    %204 = vector.extract_strided_slice %203 {offsets = [0, 0], sizes = [2, 32], strides = [1, 1]} : vector<2x128xf32> to vector<2x32xf32>
    %205 = arith.negf %204 : vector<2x32xf32>
    %206 = math.exp %205 : vector<2x32xf32>
    %cst_58 = arith.constant 1.000000e+00 : f32
    %207 = vector.broadcast %cst_58 : f32 to vector<2x32xf32>
    %208 = arith.addf %207, %206 : vector<2x32xf32>
    %209 = arith.divf %207, %208 : vector<2x32xf32>
    %210 = vector.extract_strided_slice %203 {offsets = [0, 32], sizes = [2, 32], strides = [1, 1]} : vector<2x128xf32> to vector<2x32xf32>
    %211 = arith.negf %210 : vector<2x32xf32>
    %212 = math.exp %211 : vector<2x32xf32>
    %cst_59 = arith.constant 1.000000e+00 : f32
    %213 = vector.broadcast %cst_59 : f32 to vector<2x32xf32>
    %214 = arith.addf %213, %212 : vector<2x32xf32>
    %215 = arith.divf %213, %214 : vector<2x32xf32>
    %216 = vector.extract_strided_slice %203 {offsets = [0, 64], sizes = [2, 32], strides = [1, 1]} : vector<2x128xf32> to vector<2x32xf32>
    %217 = math.tanh %216 : vector<2x32xf32>
    %218 = vector.extract_strided_slice %203 {offsets = [0, 96], sizes = [2, 32], strides = [1, 1]} : vector<2x128xf32> to vector<2x32xf32>
    %219 = arith.negf %218 : vector<2x32xf32>
    %220 = math.exp %219 : vector<2x32xf32>
    %cst_60 = arith.constant 1.000000e+00 : f32
    %221 = vector.broadcast %cst_60 : f32 to vector<2x32xf32>
    %222 = arith.addf %221, %220 : vector<2x32xf32>
    %223 = arith.divf %221, %222 : vector<2x32xf32>
    %224 = arith.mulf %215, %191 : vector<2x32xf32>
    %225 = arith.mulf %209, %217 : vector<2x32xf32>
    %226 = arith.addf %224, %225 : vector<2x32xf32>
    %227 = math.tanh %226 : vector<2x32xf32>
    %228 = arith.mulf %223, %227 : vector<2x32xf32>
    %229 = vector.extract_strided_slice %5 {offsets = [0, 96], sizes = [2, 16], strides = [1, 1]} : vector<2x112xf32> to vector<2x16xf32>
    %230 = vector.extract_strided_slice %12 {offsets = [0, 6, 0], sizes = [2, 1, 8], strides = [1, 1, 1]} : vector<2x7x8xf32> to vector<2x1x8xf32>
    %231 = vector.shape_cast %230 : vector<2x1x8xf32> to vector<2x8xf32>
    %cst_61 = arith.constant dense<0.000000e+00> : vector<2x128xf32>
    %232 = tpu.matmul %229, %13, %cst_61 {dimension_numbers = #tpu.dot_dimension_numbers<[1], [0], [0], [1], [0, 0, 1, 1], [], []>} : vector<2x16xf32>, vector<16x128xf32>, vector<2x128xf32> -> vector<2x128xf32>
    %cst_62 = arith.constant dense<0.000000e+00> : vector<2x128xf32>
    %233 = tpu.matmul %231, %14, %cst_62 {dimension_numbers = #tpu.dot_dimension_numbers<[1], [0], [0], [1], [0, 0, 1, 1], [], []>} : vector<2x8xf32>, vector<8x128xf32>, vector<2x128xf32> -> vector<2x128xf32>
    %234 = arith.addf %232, %233 : vector<2x128xf32>
    %cst_63 = arith.constant dense<0.000000e+00> : vector<2x128xf32>
    %235 = tpu.matmul %228, %15, %cst_63 {dimension_numbers = #tpu.dot_dimension_numbers<[1], [0], [0], [1], [0, 0, 1, 1], [], []>} : vector<2x32xf32>, vector<32x128xf32>, vector<2x128xf32> -> vector<2x128xf32>
    %236 = arith.addf %234, %235 : vector<2x128xf32>
    %237 = vector.broadcast %16 : vector<1x128xf32> to vector<2x128xf32>
    %238 = arith.addf %236, %237 : vector<2x128xf32>
    %239 = vector.extract_strided_slice %238 {offsets = [0, 0], sizes = [2, 32], strides = [1, 1]} : vector<2x128xf32> to vector<2x32xf32>
    %240 = arith.negf %239 : vector<2x32xf32>
    %241 = math.exp %240 : vector<2x32xf32>
    %cst_64 = arith.constant 1.000000e+00 : f32
    %242 = vector.broadcast %cst_64 : f32 to vector<2x32xf32>
    %243 = arith.addf %242, %241 : vector<2x32xf32>
    %244 = arith.divf %242, %243 : vector<2x32xf32>
    %245 = vector.extract_strided_slice %238 {offsets = [0, 32], sizes = [2, 32], strides = [1, 1]} : vector<2x128xf32> to vector<2x32xf32>
    %246 = arith.negf %245 : vector<2x32xf32>
    %247 = math.exp %246 : vector<2x32xf32>
    %cst_65 = arith.constant 1.000000e+00 : f32
    %248 = vector.broadcast %cst_65 : f32 to vector<2x32xf32>
    %249 = arith.addf %248, %247 : vector<2x32xf32>
    %250 = arith.divf %248, %249 : vector<2x32xf32>
    %251 = vector.extract_strided_slice %238 {offsets = [0, 64], sizes = [2, 32], strides = [1, 1]} : vector<2x128xf32> to vector<2x32xf32>
    %252 = math.tanh %251 : vector<2x32xf32>
    %253 = vector.extract_strided_slice %238 {offsets = [0, 96], sizes = [2, 32], strides = [1, 1]} : vector<2x128xf32> to vector<2x32xf32>
    %254 = arith.negf %253 : vector<2x32xf32>
    %255 = math.exp %254 : vector<2x32xf32>
    %cst_66 = arith.constant 1.000000e+00 : f32
    %256 = vector.broadcast %cst_66 : f32 to vector<2x32xf32>
    %257 = arith.addf %256, %255 : vector<2x32xf32>
    %258 = arith.divf %256, %257 : vector<2x32xf32>
    %259 = arith.mulf %250, %226 : vector<2x32xf32>
    %260 = arith.mulf %244, %252 : vector<2x32xf32>
    %261 = arith.addf %259, %260 : vector<2x32xf32>
    %262 = math.tanh %261 : vector<2x32xf32>
    %263 = arith.mulf %258, %262 : vector<2x32xf32>
    %c0_67 = arith.constant 0 : index
    %c0_68 = arith.constant 0 : index
    %264 = vector.load %arg11[%c0_67, %c0_68] : memref<32x1xf32, #tpu.memory_space<vmem>>, vector<32x1xf32>
    %cst_69 = arith.constant dense<0.000000e+00> : vector<2x1xf32>
    %265 = tpu.matmul %263, %264, %cst_69 {dimension_numbers = #tpu.dot_dimension_numbers<[1], [0], [0], [1], [0, 0, 1, 1], [], []>} : vector<2x32xf32>, vector<32x1xf32>, vector<2x1xf32> -> vector<2x1xf32>
    %c0_70 = arith.constant 0 : index
    %c0_71 = arith.constant 0 : index
    %266 = vector.load %arg12[%c0_70, %c0_71] : memref<8x1xf32, #tpu.memory_space<vmem>>, vector<8x1xf32>
    %cst_72 = arith.constant dense<0.000000e+00> : vector<2x1xf32>
    %267 = tpu.matmul %11, %266, %cst_72 {dimension_numbers = #tpu.dot_dimension_numbers<[1], [0], [0], [1], [0, 0, 1, 1], [], []>} : vector<2x8xf32>, vector<8x1xf32>, vector<2x1xf32> -> vector<2x1xf32>
    %268 = arith.addf %265, %267 : vector<2x1xf32>
    %c0_73 = arith.constant 0 : index
    %c0_74 = arith.constant 0 : index
    %269 = vector.load %arg13[%c0_73, %c0_74] : memref<1x1xf32, #tpu.memory_space<vmem>>, vector<1x1xf32>
    %270 = vector.broadcast %269 : vector<1x1xf32> to vector<2x1xf32>
    %271 = arith.addf %268, %270 : vector<2x1xf32>
    %cst_75 = arith.constant 0.000000e+00 : f32
    %272 = vector.broadcast %cst_75 : f32 to vector<2x1xf32>
    %273 = arith.maximumf %271, %272 : vector<2x1xf32>
    %c0_76 = arith.constant 0 : index
    %c0_77 = arith.constant 0 : index
    %274 = vector.load %arg14[%c0_76, %c0_77] : memref<2x1xf32, #tpu.memory_space<vmem>>, vector<2x1xf32>
    tpu.vector_store %arg14[%c0_76, %c0_77], %273 {strides = array<i32>} : memref<2x1xf32, #tpu.memory_space<vmem>>, vector<2x1xf32>,
    return
  }
}

module attributes {stable_mosaic.version = 11 : i64} {
  func.func @gcn_relu_kernel(%arg0: memref<128x120xf32, #tpu.memory_space<vmem>>, %arg1: memref<128x128xf32, #tpu.memory_space<vmem>>, %arg2: memref<120x120xf32, #tpu.memory_space<vmem>>, %arg3: memref<1x120xf32, #tpu.memory_space<vmem>>, %arg4: memref<128x112xf32, #tpu.memory_space<vmem>>, %arg5: memref<128x8xf32, #tpu.memory_space<vmem>>) attributes {dimension_semantics = [], scalar_prefetch = 0 : i64, scratch_operands = 0 : i64, tpu.core_type = #tpu.core_type<tc>} {
    %c0 = arith.constant 0 : index
    %c0_0 = arith.constant 0 : index
    %0 = vector.load %arg0[%c0, %c0_0] : memref<128x120xf32, #tpu.memory_space<vmem>>, vector<128x120xf32>
    %c0_1 = arith.constant 0 : index
    %c0_2 = arith.constant 0 : index
    %1 = vector.load %arg2[%c0_1, %c0_2] : memref<120x120xf32, #tpu.memory_space<vmem>>, vector<120x120xf32>
    %cst = arith.constant dense<0.000000e+00> : vector<128x120xf32>
    %2 = tpu.matmul %0, %1, %cst {dimension_numbers = #tpu.dot_dimension_numbers<[1], [0], [0], [1], [0, 0, 1, 1], [], []>} : vector<128x120xf32>, vector<120x120xf32>, vector<128x120xf32> -> vector<128x120xf32>
    %c0_3 = arith.constant 0 : index
    %c0_4 = arith.constant 0 : index
    %3 = vector.load %arg1[%c0_3, %c0_4] : memref<128x128xf32, #tpu.memory_space<vmem>>, vector<128x128xf32>
    %cst_5 = arith.constant dense<0.000000e+00> : vector<128x120xf32>
    %4 = tpu.matmul %3, %2, %cst_5 {dimension_numbers = #tpu.dot_dimension_numbers<[1], [0], [0], [1], [0, 0, 1, 1], [], []>} : vector<128x128xf32>, vector<128x120xf32>, vector<128x120xf32> -> vector<128x120xf32>
    %c0_6 = arith.constant 0 : index
    %c0_7 = arith.constant 0 : index
    %5 = vector.load %arg3[%c0_6, %c0_7] : memref<1x120xf32, #tpu.memory_space<vmem>>, vector<1x120xf32>
    %6 = vector.broadcast %5 : vector<1x120xf32> to vector<128x120xf32>
    %7 = arith.addf %4, %6 : vector<128x120xf32>
    %cst_8 = arith.constant 0.000000e+00 : f32
    %8 = vector.broadcast %cst_8 : f32 to vector<128x120xf32>
    %9 = arith.maximumf %7, %8 : vector<128x120xf32>
    %10 = vector.extract_strided_slice %9 {offsets = [0, 0], sizes = [128, 112], strides = [1, 1]} : vector<128x120xf32> to vector<128x112xf32>
    %c0_9 = arith.constant 0 : index
    %c0_10 = arith.constant 0 : index
    %11 = vector.load %arg4[%c0_9, %c0_10] : memref<128x112xf32, #tpu.memory_space<vmem>>, vector<128x112xf32>
    tpu.vector_store %arg4[%c0_9, %c0_10], %10 {strides = array<i32>} : memref<128x112xf32, #tpu.memory_space<vmem>>, vector<128x112xf32>,
    %12 = vector.extract_strided_slice %9 {offsets = [0, 112], sizes = [128, 8], strides = [1, 1]} : vector<128x120xf32> to vector<128x8xf32>
    %c0_11 = arith.constant 0 : index
    %c0_12 = arith.constant 0 : index
    %13 = vector.load %arg5[%c0_11, %c0_12] : memref<128x8xf32, #tpu.memory_space<vmem>>, vector<128x8xf32>
    tpu.vector_store %arg5[%c0_11, %c0_12], %12 {strides = array<i32>} : memref<128x8xf32, #tpu.memory_space<vmem>>, vector<128x8xf32>,
    return
  }
}

</mosaic_0001>

<bundles_post_ra>
// kernel: neural_net_forward.2
= control target key start
LH: loop header
LB: loop body
LE: loop exit
PB: predicated region body
PF: predicated region fallthrough
CT: control target
= control target key end

     0   :  { %vm50_vm0 = vcmask 982016   ;;  %vm265_vm1 = vcmask 916480   ;;  %s436_s11 = smov 16   ;;  %vm346_vm2 = vcmask 64512   ;;  %s794_s2 = inlined_call_operand.vmem [shape: f32[120,120], index: 2, kind: input, shape index: {}]   ;;  %s795_s0 = inlined_call_operand.vmem [shape: f32[128,120], index: 0, kind: input, shape index: {}]   ;;  %s796_s3 = inlined_call_operand.vmem [shape: f32[1,120], index: 3, kind: input, shape index: {}]   ;;  %s797_s1 = inlined_call_operand.vmem [shape: f32[128,128], index: 1, kind: input, shape index: {}]   ;;  %s798_s4 = inlined_call_operand.vmem [shape: f32[128,112], index: 4, kind: output, shape index: {0}]   ;;  %s799_s5 = inlined_call_operand.vmem [shape: f32[128,8], index: 5, kind: output, shape index: {1}]  }
   0x1   :  { %v49_v0 = vld [vmem:[%s794_s2 + $0x70] sm:$0xff]  ;;  %v48_v1 = vld [vmem:[%s794_s2 + $0x68] sm:$0xff]  ;;  %v47_v2 = vld [vmem:[%s794_s2 + $0x60] sm:$0xff] }
   0x2   :  { %387 = vmatpush.msra.mxu3 %v49_v0  ;;  %100 = vmatpush.msra.mxu0 %v49_v0  ;;  %v46_v3 = vld [vmem:[%s794_s2 + $0x58] sm:$0xff]  ;;  %v45_v4 = vld [vmem:[%s794_s2 + $0x50] sm:$0xff]  ;;  %v44_v5 = vld [vmem:[%s794_s2 + $0x48] sm:$0xff] }
   0x3   :  { %v43_v6 = vld [vmem:[%s794_s2 + $0x40] sm:$0xff]  ;;  %v42_v7 = vld [vmem:[%s794_s2 + $0x38] sm:$0xff]  ;;  %v41_v8 = vld [vmem:[%s794_s2 + $0x30] sm:$0xff] }
   0x4   :  { %388 = vmatpush.msra.mxu3 %v48_v1  ;;  %101 = vmatpush.msra.mxu0 %v48_v1  ;;  %v40_v9 = vld [vmem:[%s794_s2 + $0x28] sm:$0xff]  ;;  %v39_v10 = vld [vmem:[%s794_s2 + $0x20] sm:$0xff]  ;;  %v38_v11 = vld [vmem:[%s794_s2 + $0x18] sm:$0xff] }
   0x5   :  { %v37_v12 = vld [vmem:[%s794_s2 + $0x10] sm:$0xff]  ;;  %v36_v13 = vld [vmem:[%s794_s2 + $0x8] sm:$0xff]  ;;  %v35_v14 = vld [vmem:[%s794_s2] sm:$0xff] }
   0x6   :  { %389 = vmatpush.msra.mxu3 %v47_v2  ;;  %102 = vmatpush.msra.mxu0 %v47_v2  ;;  %v28_v15 = vld [vmem:[%s795_s0 + $0x48] sm:$0xff]  ;;  %v19_v16 = vld [vmem:[%s795_s0] sm:$0xff]  ;;  %v29_v17 = vld [vmem:[%s795_s0 + $0x50] sm:$0xff] }
   0x7   :  { %v20_v18 = vld [vmem:[%s795_s0 + $0x8] sm:$0xff]  ;;  %v30_v19 = vld [vmem:[%s795_s0 + $0x58] sm:$0xff]  ;;  %v21_v20 = vld [vmem:[%s795_s0 + $0x10] sm:$0xff] }
   0x8   :  { %390 = vmatpush.msra.mxu3 %v46_v3  ;;  %103 = vmatpush.msra.mxu0 %v46_v3  ;;  %v31_v21 = vld [vmem:[%s795_s0 + $0x60] sm:$0xff]  ;;  %v22_v22 = vld [vmem:[%s795_s0 + $0x18] sm:$0xff]  ;;  %v32_v23 = vld [vmem:[%s795_s0 + $0x68] sm:$0xff] }
   0x9   :  { %v23_v24 = vld [vmem:[%s795_s0 + $0x20] sm:$0xff]  ;;  %v33_v25 = vld [vmem:[%s795_s0 + $0x70] sm:$0xff]  ;;  %v24_v26 = vld [vmem:[%s795_s0 + $0x28] sm:$0xff] }
   0xa   :  { %391 = vmatpush.msra.mxu3 %v45_v4  ;;  %104 = vmatpush.msra.mxu0 %v45_v4  ;;  %v34_v27 = vld [vmem:[%s795_s0 + $0x78] sm:$0xff]  ;;  %v25_v28 = vld [vmem:[%s795_s0 + $0x30] sm:$0xff]  ;;  %v27_v30 = vld [vmem:[%s795_s0 + $0x40] sm:$0xff] }
   0xb   :  { %v26_v29 = vld [vmem:[%s795_s0 + $0x38] sm:$0xff]  ;;  %v164_v47 = vld [vmem:[%s797_s1] sm:$0xff]  ;;  %v165_v49 = vld [vmem:[%s797_s1 + $0x8] sm:$0xff] }
   0xc   :  { %392 = vmatpush.msra.mxu3 %v44_v5  ;;  %105 = vmatpush.msra.mxu0 %v44_v5  ;;  %v171_v48 = vld [vmem:[%s797_s1 + $0x38] sm:$0xff]  ;;  %v172_v50 = vld [vmem:[%s797_s1 + $0x40] sm:$0xff]  ;;  %v166_v51 = vld [vmem:[%s797_s1 + $0x10] sm:$0xff] }
   0xd   :  { %v173_v52 = vld [vmem:[%s797_s1 + $0x48] sm:$0xff]  ;;  %v179_v53 = vld [vmem:[%s797_s1 + $0x78] sm:$0xff]  ;;  %v174_v55 = vld [vmem:[%s797_s1 + $0x50] sm:$0xff] }
   0xe   :  { %393 = vmatpush.msra.mxu3 %v43_v6  ;;  %106 = vmatpush.msra.mxu0 %v43_v6  ;;  %v167_v54 = vld [vmem:[%s797_s1 + $0x18] sm:$0xff]  ;;  %v168_v56 = vld [vmem:[%s797_s1 + $0x20] sm:$0xff]  ;;  %v169_v58 = vld [vmem:[%s797_s1 + $0x28] sm:$0xff] }
   0xf   :  { %v175_v57 = vld [vmem:[%s797_s1 + $0x58] sm:$0xff]  ;;  %v176_v59 = vld [vmem:[%s797_s1 + $0x60] sm:$0xff]  ;;  %v170_v60 = vld [vmem:[%s797_s1 + $0x30] sm:$0xff] }
  0x10   :  { %394 = vmatpush.msra.mxu3 %v42_v7  ;;  %107 = vmatpush.msra.mxu0 %v42_v7  ;;  %v177_v61 = vld [vmem:[%s797_s1 + $0x68] sm:$0xff]  ;;  %v178_v62 = vld [vmem:[%s797_s1 + $0x70] sm:$0xff]  ;;  %v632_v63 = vld [vmem:[%s796_s3] ss:$0 sm:$0xff] }
  0x12   :  { %395 = vmatpush.msra.mxu3 %v41_v8  ;;  %108 = vmatpush.msra.mxu0 %v41_v8 }
  0x14   :  { %396 = vmatpush.msra.mxu3 %v40_v9  ;;  %109 = vmatpush.msra.mxu0 %v40_v9 }
  0x16   :  { %397 = vmatpush.msra.mxu3 %v39_v10  ;;  %110 = vmatpush.msra.mxu0 %v39_v10 }
  0x18   :  { %398 = vmatpush.msra.mxu3 %v38_v11  ;;  %111 = vmatpush.msra.mxu0 %v38_v11 }
  0x1a   :  { %399 = vmatpush.msra.mxu3 %v37_v12  ;;  %112 = vmatpush.msra.mxu0 %v37_v12 }
  0x1c   :  { %400 = vmatpush.msra.mxu3 %v36_v13  ;;  %113 = vmatpush.msra.mxu0 %v36_v13 }
  0x1e   :  { %401 = vmatpush.msra.mxu3 %v35_v14  ;;  %114 = vmatpush.msra.mxu0 %v35_v14 }
  0x1f   :  { %380 = vmatmul.msk.f32.vlgmr.msra.gmra.mxu3 %vm50_vm0, %v28_v15  ;;  %371 = vmatmul.msk.f32.vlgmr.msra.gmra.mxu0 %vm50_vm0, %v19_v16 }
  0x27   :  { %381 = vmatmul.msk.f32.gmra.mxu3 %vm50_vm0, %v29_v17  ;;  %372 = vmatmul.msk.f32.gmra.mxu0 %vm50_vm0, %v20_v18 }
  0x2f   :  { %382 = vmatmul.msk.f32.gmra.mxu3 %vm50_vm0, %v30_v19  ;;  %373 = vmatmul.msk.f32.gmra.mxu0 %vm50_vm0, %v21_v20 }
  0x37   :  { %383 = vmatmul.msk.f32.gmra.mxu3 %vm50_vm0, %v31_v21  ;;  %374 = vmatmul.msk.f32.gmra.mxu0 %vm50_vm0, %v22_v22 }
  0x3f   :  { %384 = vmatmul.msk.f32.gmra.mxu3 %vm50_vm0, %v32_v23  ;;  %375 = vmatmul.msk.f32.gmra.mxu0 %vm50_vm0, %v23_v24 }
  0x47   :  { %385 = vmatmul.msk.f32.gmra.mxu3 %vm50_vm0, %v33_v25  ;;  %376 = vmatmul.msk.f32.gmra.mxu0 %vm50_vm0, %v24_v26 }
  0x4f   :  { %386 = vmatmul.msk.f32.gmra.mxu3 %vm50_vm0, %v34_v27  ;;  %377 = vmatmul.msk.f32.gmra.mxu0 %vm50_vm0, %v25_v28 }
  0x57   :  { %378 = vmatmul.msk.f32.gmra.mxu0 %vm50_vm0, %v26_v29 }
  0x5f   :  { %379 = vmatmul.msk.f32.gmra.mxu0 %vm50_vm0, %v27_v30 }
  0x9c   :  { %v576_v31 = vpop.f32.mrf.mxu0 }
  0xa2   :  { %v143_v32 = vpop.f32.mrf.mxu3 }
  0xa4   :  { %v119_v33 = vpop.f32.mrf.mxu0 }
  0xaa   :  { %v146_v34 = vpop.f32.mrf.mxu3 }
  0xac   :  { %v122_v35 = vpop.f32.mrf.mxu0 }
  0xb2   :  { %v149_v36 = vpop.f32.mrf.mxu3 }
  0xb4   :  { %v125_v37 = vpop.f32.mrf.mxu0 }
  0xba   :  { %v152_v38 = vpop.f32.mrf.mxu3 }
  0xbc   :  { %v128_v39 = vpop.f32.mrf.mxu0 }
  0xc2   :  { %v155_v40 = vpop.f32.mrf.mxu3 }
  0xc4   :  { %v131_v41 = vpop.f32.mrf.mxu0 }
  0xca   :  { %v158_v42 = vpop.f32.mrf.mxu3 }
  0xcc   :  { %v134_v43 = vpop.f32.mrf.mxu0 }
  0xd2   :  { %v161_v44 = vpop.f32.mrf.mxu3 }
  0xd3   :  { %184 = vmatpush.msra.mxu1 %v161_v44  ;;  %402 = vmatpush.msra.mxu2 %v161_v44 }
  0xd4   :  { %403 = vmatpush.msrb.mxu3 %v161_v44  ;;  %v137_v45 = vpop.f32.mrf.mxu0 }
  0xd5   :  { %185 = vmatpush.msra.mxu1 %v158_v42  ;;  %404 = vmatpush.msra.mxu2 %v158_v42 }
  0xd6   :  { %405 = vmatpush.msrb.mxu3 %v158_v42 }
  0xd7   :  { %186 = vmatpush.msra.mxu1 %v155_v40  ;;  %406 = vmatpush.msra.mxu2 %v155_v40 }
  0xd8   :  { %407 = vmatpush.msrb.mxu3 %v155_v40 }
  0xd9   :  { %187 = vmatpush.msra.mxu1 %v152_v38  ;;  %408 = vmatpush.msra.mxu2 %v152_v38 }
  0xda   :  { %409 = vmatpush.msrb.mxu3 %v152_v38 }
  0xdb   :  { %188 = vmatpush.msra.mxu1 %v149_v36  ;;  %410 = vmatpush.msra.mxu2 %v149_v36 }
  0xdc   :  { %411 = vmatpush.msrb.mxu3 %v149_v36  ;;  %v140_v46 = vpop.f32.mrf.mxu0 }
  0xdd   :  { %189 = vmatpush.msra.mxu1 %v146_v34  ;;  %412 = vmatpush.msra.mxu2 %v146_v34 }
  0xde   :  { %413 = vmatpush.msrb.mxu3 %v146_v34 }
  0xdf   :  { %190 = vmatpush.msra.mxu1 %v143_v32  ;;  %414 = vmatpush.msra.mxu2 %v143_v32 }
  0xe0   :  { %415 = vmatpush.msrb.mxu3 %v143_v32 }
  0xe1   :  { %191 = vmatpush.msra.mxu1 %v140_v46  ;;  %416 = vmatpush.msra.mxu2 %v140_v46 }
  0xe2   :  { %417 = vmatpush.msrb.mxu3 %v140_v46 }
  0xe3   :  { %192 = vmatpush.msra.mxu1 %v137_v45  ;;  %418 = vmatpush.msra.mxu2 %v137_v45 }
  0xe4   :  { %419 = vmatpush.msrb.mxu3 %v137_v45 }
  0xe5   :  { %193 = vmatpush.msra.mxu1 %v134_v43  ;;  %420 = vmatpush.msra.mxu2 %v134_v43 }
  0xe6   :  { %421 = vmatpush.msrb.mxu3 %v134_v43 }
  0xe7   :  { %194 = vmatpush.msra.mxu1 %v131_v41  ;;  %422 = vmatpush.msra.mxu2 %v131_v41 }
  0xe8   :  { %423 = vmatpush.msrb.mxu3 %v131_v41 }
  0xe9   :  { %195 = vmatpush.msra.mxu1 %v128_v39  ;;  %424 = vmatpush.msra.mxu2 %v128_v39 }
  0xea   :  { %425 = vmatpush.msrb.mxu3 %v128_v39 }
  0xeb   :  { %196 = vmatpush.msra.mxu1 %v125_v37  ;;  %426 = vmatpush.msra.mxu2 %v125_v37 }
  0xec   :  { %427 = vmatpush.msrb.mxu3 %v125_v37 }
  0xed   :  { %197 = vmatpush.msra.mxu1 %v122_v35  ;;  %428 = vmatpush.msra.mxu2 %v122_v35 }
  0xee   :  { %429 = vmatpush.msrb.mxu3 %v122_v35 }
  0xef   :  { %198 = vmatpush.msra.mxu1 %v119_v33  ;;  %430 = vmatpush.msra.mxu2 %v119_v33 }
  0xf0   :  { %431 = vmatpush.msrb.mxu3 %v119_v33 }
  0xf1   :  { %199 = vmatpush.msra.mxu1 %v576_v31  ;;  %432 = vmatpush.msra.mxu2 %v576_v31 }
  0xf2   :  { %433 = vmatpush.msrb.mxu3 %v576_v31  ;;  %200 = vmatmul.f32.vlgmr.msra.gmra.mxu1 %v164_v47 }
  0xf3   :  { %221 = vmatmul.f32.vlgmr.msra.gmra.mxu2 %v171_v48  ;;  %245 = vmatmul.f32.vlgmr.msrb.gmra.mxu3 %v179_v53 }
  0xfa   :  { %203 = vmatmul.f32.gmra.mxu1 %v165_v49 }
  0xfb   :  { %224 = vmatmul.f32.gmra.mxu2 %v172_v50 }
 0x102   :  { %206 = vmatmul.f32.gmra.mxu1 %v166_v51 }
 0x103   :  { %227 = vmatmul.f32.gmra.mxu2 %v173_v52 }
 0x10a   :  { %209 = vmatmul.f32.gmra.mxu1 %v167_v54 }
 0x10b   :  { %230 = vmatmul.f32.gmra.mxu2 %v174_v55 }
 0x112   :  { %212 = vmatmul.f32.gmra.mxu1 %v168_v56 }
 0x113   :  { %233 = vmatmul.f32.gmra.mxu2 %v175_v57 }
 0x11a   :  { %215 = vmatmul.f32.gmra.mxu1 %v169_v58 }
 0x11b   :  { %236 = vmatmul.f32.gmra.mxu2 %v176_v59 }
 0x122   :  { %218 = vmatmul.f32.gmra.mxu1 %v170_v60 }
 0x123   :  { %239 = vmatmul.f32.gmra.mxu2 %v177_v61 }
 0x12b   :  { %242 = vmatmul.f32.gmra.mxu2 %v178_v62 }
 0x16f   :  { %v201_v0 = vpop.f32.mrf.mxu1 }
 0x170   :  { %v202_v1 = vadd.f32 %v632_v63, %v201_v0 }
 0x172   :  { %v249_v2 = vmax.f32 %v202_v1, 0.0 }
 0x174   :  { %266 = vst.msk [vmem:[%s798_s4] sm:$0xff] %vm265_vm1, %v249_v2  ;;  %298 = vrot.lane.b32.xlu0 %v249_v2, %s436_s11 }
 0x176   :  { %v222_v3 = vpop.f32.mrf.mxu2  ;;  %v246_v21 = vpop.f32.mrf.mxu3 }
 0x177   :  { %v223_v4 = vadd.f32 %v632_v63, %v222_v3  ;;  %v204_v5 = vpop.f32.mrf.mxu1  ;;  %v247_v22 = vadd.f32 %v632_v63, %v246_v21 }
 0x178   :  { %v205_v6 = vadd.f32 %v632_v63, %v204_v5 }
 0x179   :  { %v256_v7 = vmax.f32 %v223_v4, 0.0  ;;  %v264_v24 = vmax.f32 %v247_v22, 0.0 }
 0x17a   :  { %v250_v8 = vmax.f32 %v205_v6, 0.0 }
 0x17b   :  { %273 = vst.msk [vmem:[%s798_s4 + $0x38] sm:$0xff] %vm265_vm1, %v256_v7  ;;  %312 = vrot.lane.b32.xlu1 %v256_v7, %s436_s11 }
 0x17c   :  { %267 = vst.msk [vmem:[%s798_s4 + $0x8] sm:$0xff] %vm265_vm1, %v250_v8  ;;  %300 = vrot.lane.b32.xlu0 %v250_v8, %s436_s11 }
 0x17d   :  { %281 = vst.msk [vmem:[%s798_s4 + $0x78] sm:$0xff] %vm265_vm1, %v264_v24 }
 0x17e   :  { %v225_v9 = vpop.f32.mrf.mxu2 }
 0x17f   :  { %v226_v10 = vadd.f32 %v632_v63, %v225_v9  ;;  %v207_v11 = vpop.f32.mrf.mxu1 }
 0x180   :  { %v208_v12 = vadd.f32 %v632_v63, %v207_v11 }
 0x181   :  { %v257_v13 = vmax.f32 %v226_v10, 0.0 }
 0x182   :  { %v251_v14 = vmax.f32 %v208_v12, 0.0 }
 0x183   :  { %274 = vst.msk [vmem:[%s798_s4 + $0x40] sm:$0xff] %vm265_vm1, %v257_v13  ;;  %314 = vrot.lane.b32.xlu2 %v257_v13, %s436_s11 }
 0x184   :  { %268 = vst.msk [vmem:[%s798_s4 + $0x10] sm:$0xff] %vm265_vm1, %v251_v14  ;;  %302 = vrot.lane.b32.xlu1 %v251_v14, %s436_s11 }
 0x186   :  { %v228_v15 = vpop.f32.mrf.mxu2 }
 0x187   :  { %v229_v16 = vadd.f32 %v632_v63, %v228_v15  ;;  %v210_v17 = vpop.f32.mrf.mxu1 }
 0x188   :  { %v211_v18 = vadd.f32 %v632_v63, %v210_v17 }
 0x189   :  { %v258_v19 = vmax.f32 %v229_v16, 0.0 }
 0x18a   :  { %v252_v20 = vmax.f32 %v211_v18, 0.0 }
 0x18b   :  { %275 = vst.msk [vmem:[%s798_s4 + $0x48] sm:$0xff] %vm265_vm1, %v258_v19  ;;  %316 = vrot.lane.b32.xlu0 %v258_v19, %s436_s11 }
 0x18c   :  { %269 = vst.msk [vmem:[%s798_s4 + $0x18] sm:$0xff] %vm265_vm1, %v252_v20  ;;  %304 = vrot.lane.b32.xlu1 %v252_v20, %s436_s11 }
 0x18e   :  { %v231_v23 = vpop.f32.mrf.mxu2 }
 0x18f   :  { %v232_v25 = vadd.f32 %v632_v63, %v231_v23  ;;  %v213_v26 = vpop.f32.mrf.mxu1 }
 0x190   :  { %v214_v27 = vadd.f32 %v632_v63, %v213_v26 }
 0x191   :  { %v259_v28 = vmax.f32 %v232_v25, 0.0 }
 0x192   :  { %v253_v29 = vmax.f32 %v214_v27, 0.0 }
 0x193   :  { %276 = vst.msk [vmem:[%s798_s4 + $0x50] sm:$0xff] %vm265_vm1, %v259_v28 }
 0x194   :  { %270 = vst.msk [vmem:[%s798_s4 + $0x20] sm:$0xff] %vm265_vm1, %v253_v29  ;;  %306 = vrot.lane.b32.xlu2 %v253_v29, %s436_s11  ;;  %318 = vrot.lane.b32.xlu1 %v259_v28, %s436_s11 }
 0x196   :  { %v234_v30 = vpop.f32.mrf.mxu2 }
 0x197   :  { %v235_v31 = vadd.f32 %v632_v63, %v234_v30  ;;  %v216_v32 = vpop.f32.mrf.mxu1 }
 0x198   :  { %v217_v33 = vadd.f32 %v632_v63, %v216_v32 }
 0x199   :  { %v260_v34 = vmax.f32 %v235_v31, 0.0 }
 0x19a   :  { %v254_v35 = vmax.f32 %v217_v33, 0.0 }
 0x19b   :  { %277 = vst.msk [vmem:[%s798_s4 + $0x58] sm:$0xff] %vm265_vm1, %v260_v34 }
 0x19c   :  { %320 = vrot.lane.b32.xlu2 %v260_v34, %s436_s11  ;;  %271 = vst.msk [vmem:[%s798_s4 + $0x28] sm:$0xff] %vm265_vm1, %v254_v35 }
 0x19e   :  { %v237_v36 = vpop.f32.mrf.mxu2 }
 0x19f   :  { %v238_v37 = vadd.f32 %v632_v63, %v237_v36  ;;  %v219_v38 = vpop.f32.mrf.mxu1 }
 0x1a0   :  { %v220_v39 = vadd.f32 %v632_v63, %v219_v38 }
 0x1a1   :  { %v261_v40 = vmax.f32 %v238_v37, 0.0 }
 0x1a2   :  { %v255_v41 = vmax.f32 %v220_v39, 0.0 }
 0x1a3   :  { %278 = vst.msk [vmem:[%s798_s4 + $0x60] sm:$0xff] %vm265_vm1, %v261_v40  ;;  %322 = vrot.lane.b32.xlu0 %v261_v40, %s436_s11 }
 0x1a4   :  { %308 = vrot.lane.b32.xlu2 %v254_v35, %s436_s11  ;;  %272 = vst.msk [vmem:[%s798_s4 + $0x30] sm:$0xff] %vm265_vm1, %v255_v41 }
 0x1a6   :  { %v240_v42 = vpop.f32.mrf.mxu2 }
 0x1a7   :  { %v241_v43 = vadd.f32 %v632_v63, %v240_v42 }
 0x1a9   :  { %v262_v44 = vmax.f32 %v241_v43, 0.0 }
 0x1ab   :  { %310 = vrot.lane.b32.xlu0 %v255_v41, %s436_s11  ;;  %279 = vst.msk [vmem:[%s798_s4 + $0x68] sm:$0xff] %vm265_vm1, %v262_v44  ;;  %324 = vrot.lane.b32.xlu1 %v262_v44, %s436_s11 }
 0x1ae   :  { %v243_v45 = vpop.f32.mrf.mxu2 }
 0x1af   :  { %v244_v46 = vadd.f32 %v632_v63, %v243_v45 }
 0x1b1   :  { %v263_v47 = vmax.f32 %v244_v46, 0.0 }
 0x1b3   :  { %328 = vrot.lane.b32.xlu0 %v264_v24, %s436_s11  ;;  %280 = vst.msk [vmem:[%s798_s4 + $0x70] sm:$0xff] %vm265_vm1, %v263_v47  ;;  %326 = vrot.lane.b32.xlu2 %v263_v47, %s436_s11 }
 0x1dd   :  { %v315_v48 = vpop.permute.xlu2 %314 }
 0x1de   :  { %355 = vst.msk [vmem:[%s799_s5 + $0x40] sm:$0xff] %vm346_vm2, %v315_v48 }
 0x1e6   :  { %v299_v49 = vpop.permute.xlu0 %298 }
 0x1e7   :  { %347 = vst.msk [vmem:[%s799_s5] sm:$0xff] %vm346_vm2, %v299_v49 }
 0x1ed   :  { %v313_v50 = vpop.permute.xlu1 %312 }
 0x1ee   :  { %354 = vst.msk [vmem:[%s799_s5 + $0x38] sm:$0xff] %vm346_vm2, %v313_v50  ;;  %v307_v51 = vpop.permute.xlu2 %306  ;;  %v301_v52 = vpop.permute.xlu0 %300 }
 0x1ef   :  { %351 = vst.msk [vmem:[%s799_s5 + $0x20] sm:$0xff] %vm346_vm2, %v307_v51 }
 0x1f0   :  { %348 = vst.msk [vmem:[%s799_s5 + $0x8] sm:$0xff] %vm346_vm2, %v301_v52 }
 0x1f6   :  { %v321_v53 = vpop.permute.xlu2 %320  ;;  %v303_v54 = vpop.permute.xlu1 %302 }
 0x1f7   :  { %358 = vst.msk [vmem:[%s799_s5 + $0x58] sm:$0xff] %vm346_vm2, %v321_v53 }
 0x1f8   :  { %349 = vst.msk [vmem:[%s799_s5 + $0x10] sm:$0xff] %vm346_vm2, %v303_v54 }
 0x1fd   :  { %v317_v55 = vpop.permute.xlu0 %316 }
 0x1fe   :  { %356 = vst.msk [vmem:[%s799_s5 + $0x48] sm:$0xff] %vm346_vm2, %v317_v55  ;;  %v309_v56 = vpop.permute.xlu2 %308  ;;  %v305_v57 = vpop.permute.xlu1 %304 }
 0x1ff   :  { %352 = vst.msk [vmem:[%s799_s5 + $0x28] sm:$0xff] %vm346_vm2, %v309_v56 }
 0x200   :  { %350 = vst.msk [vmem:[%s799_s5 + $0x18] sm:$0xff] %vm346_vm2, %v305_v57 }
 0x206   :  { %v319_v58 = vpop.permute.xlu1 %318 }
 0x207   :  { %357 = vst.msk [vmem:[%s799_s5 + $0x50] sm:$0xff] %vm346_vm2, %v319_v58 }
 0x20d   :  { %v327_v59 = vpop.permute.xlu2 %326 }
 0x20e   :  { %361 = vst.msk [vmem:[%s799_s5 + $0x70] sm:$0xff] %vm346_vm2, %v327_v59 }
 0x215   :  { %v323_v60 = vpop.permute.xlu0 %322 }
 0x216   :  { %359 = vst.msk [vmem:[%s799_s5 + $0x60] sm:$0xff] %vm346_vm2, %v323_v60 }
 0x21d   :  { %v311_v61 = vpop.permute.xlu0 %310  ;;  %v325_v62 = vpop.permute.xlu1 %324 }
 0x21e   :  { %353 = vst.msk [vmem:[%s799_s5 + $0x30] sm:$0xff] %vm346_vm2, %v311_v61 }
 0x21f   :  { %360 = vst.msk [vmem:[%s799_s5 + $0x68] sm:$0xff] %vm346_vm2, %v325_v62 }
 0x225   :  { %v329_v63 = vpop.permute.xlu0 %328 }
 0x226   :  { %362 = vst.msk [vmem:[%s799_s5 + $0x78] sm:$0xff] %vm346_vm2, %v329_v63 }

// kernel: neural_net_forward.3
= control target key start
LH: loop header
LB: loop body
LE: loop exit
PB: predicated region body
PF: predicated region fallthrough
CT: control target
= control target key end

     0   :  { %vm2396_vm0 = vcmask 1041409   ;;  %vm2398_vm1 = vcmask 64512   ;;  %vm2421_vm2 = vcmask 130048   ;;  %s3352_s22 = smov 112   ;;  %vm2445_vm7 = vcmask 261120   ;;  %s3354_s23 = smov 80   ;;  %s6665_s3 = inlined_call_operand.vmem [shape: f32[7168,112], index: 3, kind: input, shape index: {}]   ;;  %s6666_s0 = inlined_call_operand.vmem [shape: f32[2,7168], index: 0, kind: input, shape index: {}]   ;;  %s6667_s4 = inlined_call_operand.vmem [shape: f32[1,112], index: 4, kind: input, shape index: {}]   ;;  %s6668_s6 = inlined_call_operand.vmem [shape: f32[1,8], index: 6, kind: input, shape index: {}]   ;;  %s6669_s5 = inlined_call_operand.vmem [shape: f32[512,8], index: 5, kind: input, shape index: {}]   ;;  %s6670_s1 = inlined_call_operand.vmem [shape: f32[2,512], index: 1, kind: input, shape index: {}]   ;;  %s6671_s9 = inlined_call_operand.vmem [shape: f32[32,128], index: 9, kind: input, shape index: {}]   ;;  %s6672_s8 = inlined_call_operand.vmem [shape: f32[8,128], index: 8, kind: input, shape index: {}]   ;;  %s6673_s7 = inlined_call_operand.vmem [shape: f32[16,128], index: 7, kind: input, shape index: {}]   ;;  %s6674_s2 = inlined_call_operand.vmem [shape: f32[2,7,8], index: 2, kind: input, shape index: {}]   ;;  %s6675_s10 = inlined_call_operand.vmem [shape: f32[1,128], index: 10, kind: input, shape index: {}]   ;;  %s6676_s12 = inlined_call_operand.vmem [shape: f32[8,1], index: 12, kind: input, shape index: {}]   ;;  %s6677_s11 = inlined_call_operand.vmem [shape: f32[32,1], index: 11, kind: input, shape index: {}]   ;;  %s6678_s13 = inlined_call_operand.<no memory space> [shape: f32[1,1], index: 13, kind: input, shape index: {}]   ;;  %s6679_s14 = inlined_call_operand.vmem [shape: f32[2,1], index: 14, kind: output, shape index: {}]  }
   0x1   :  { %v78_v0 = vld [vmem:[%s6665_s3 + $0x78] sm:$0xff]  ;;  %v77_v2 = vld [vmem:[%s6665_s3 + $0x70] sm:$0xff]  ;;  %v76_v6 = vld [vmem:[%s6665_s3 + $0x68] sm:$0xff]  ;;  %s3355_s24 = smov 48  }
   0x2   :  { %v110_v1 = vld [vmem:[%s6665_s3 + $0x178] sm:$0xff]  ;;  %1104 = vmatpush.msra.mxu0 %v78_v0  ;;  %v109_v4 = vld [vmem:[%s6665_s3 + $0x170] sm:$0xff]  ;;  %v108_v8 = vld [vmem:[%s6665_s3 + $0x168] sm:$0xff] }
   0x3   :  { %1144 = vmatpush.msra.mxu2 %v110_v1  ;;  %v94_v3 = vld [vmem:[%s6665_s3 + $0xf8] sm:$0xff]  ;;  %v93_v7 = vld [vmem:[%s6665_s3 + $0xf0] sm:$0xff]  ;;  %v92_v10 = vld [vmem:[%s6665_s3 + $0xe8] sm:$0xff] }
   0x4   :  { %v126_v5 = vld [vmem:[%s6665_s3 + $0x1f8] sm:$0xff]  ;;  %1124 = vmatpush.msra.mxu1 %v94_v3  ;;  %1105 = vmatpush.msra.mxu0 %v77_v2  ;;  %v125_v9 = vld [vmem:[%s6665_s3 + $0x1f0] sm:$0xff]  ;;  %v75_v11 = vld [vmem:[%s6665_s3 + $0x60] sm:$0xff] }
   0x5   :  { %1164 = vmatpush.msra.mxu3 %v126_v5  ;;  %1145 = vmatpush.msra.mxu2 %v109_v4  ;;  %v107_v12 = vld [vmem:[%s6665_s3 + $0x160] sm:$0xff]  ;;  %v124_v13 = vld [vmem:[%s6665_s3 + $0x1e8] sm:$0xff]  ;;  %v74_v16 = vld [vmem:[%s6665_s3 + $0x58] sm:$0xff] }
   0x6   :  { %1125 = vmatpush.msra.mxu1 %v93_v7  ;;  %1106 = vmatpush.msra.mxu0 %v76_v6  ;;  %v91_v14 = vld [vmem:[%s6665_s3 + $0xe0] sm:$0xff]  ;;  %v106_v17 = vld [vmem:[%s6665_s3 + $0x158] sm:$0xff]  ;;  %v73_v20 = vld [vmem:[%s6665_s3 + $0x50] sm:$0xff] }
   0x7   :  { %1165 = vmatpush.msra.mxu3 %v125_v9  ;;  %1146 = vmatpush.msra.mxu2 %v108_v8  ;;  %v123_v15 = vld [vmem:[%s6665_s3 + $0x1e0] sm:$0xff]  ;;  %v90_v18 = vld [vmem:[%s6665_s3 + $0xd8] sm:$0xff]  ;;  %v105_v21 = vld [vmem:[%s6665_s3 + $0x150] sm:$0xff] }
   0x8   :  { %1126 = vmatpush.msra.mxu1 %v92_v10  ;;  %1107 = vmatpush.msra.mxu0 %v75_v11  ;;  %v122_v19 = vld [vmem:[%s6665_s3 + $0x1d8] sm:$0xff]  ;;  %v89_v22 = vld [vmem:[%s6665_s3 + $0xd0] sm:$0xff]  ;;  %v72_v24 = vld [vmem:[%s6665_s3 + $0x48] sm:$0xff] }
   0x9   :  { %1166 = vmatpush.msra.mxu3 %v124_v13  ;;  %1147 = vmatpush.msra.mxu2 %v107_v12  ;;  %v121_v23 = vld [vmem:[%s6665_s3 + $0x1d0] sm:$0xff]  ;;  %v104_v25 = vld [vmem:[%s6665_s3 + $0x148] sm:$0xff]  ;;  %v71_v28 = vld [vmem:[%s6665_s3 + $0x40] sm:$0xff] }
   0xa   :  { %1127 = vmatpush.msra.mxu1 %v91_v14  ;;  %1108 = vmatpush.msra.mxu0 %v74_v16  ;;  %v88_v26 = vld [vmem:[%s6665_s3 + $0xc8] sm:$0xff]  ;;  %v103_v29 = vld [vmem:[%s6665_s3 + $0x140] sm:$0xff]  ;;  %v70_v32 = vld [vmem:[%s6665_s3 + $0x38] sm:$0xff] }
   0xb   :  { %1167 = vmatpush.msra.mxu3 %v123_v15  ;;  %1148 = vmatpush.msra.mxu2 %v106_v17  ;;  %v120_v27 = vld [vmem:[%s6665_s3 + $0x1c8] sm:$0xff]  ;;  %v87_v30 = vld [vmem:[%s6665_s3 + $0xc0] sm:$0xff]  ;;  %v102_v33 = vld [vmem:[%s6665_s3 + $0x138] sm:$0xff] }
   0xc   :  { %1128 = vmatpush.msra.mxu1 %v90_v18  ;;  %1109 = vmatpush.msra.mxu0 %v73_v20  ;;  %v119_v31 = vld [vmem:[%s6665_s3 + $0x1c0] sm:$0xff]  ;;  %v86_v34 = vld [vmem:[%s6665_s3 + $0xb8] sm:$0xff]  ;;  %v69_v36 = vld [vmem:[%s6665_s3 + $0x30] sm:$0xff] }
   0xd   :  { %1168 = vmatpush.msra.mxu3 %v122_v19  ;;  %1149 = vmatpush.msra.mxu2 %v105_v21  ;;  %v118_v35 = vld [vmem:[%s6665_s3 + $0x1b8] sm:$0xff]  ;;  %v101_v37 = vld [vmem:[%s6665_s3 + $0x130] sm:$0xff]  ;;  %v68_v40 = vld [vmem:[%s6665_s3 + $0x28] sm:$0xff] }
   0xe   :  { %1129 = vmatpush.msra.mxu1 %v89_v22  ;;  %1110 = vmatpush.msra.mxu0 %v72_v24  ;;  %v85_v38 = vld [vmem:[%s6665_s3 + $0xb0] sm:$0xff]  ;;  %v100_v41 = vld [vmem:[%s6665_s3 + $0x128] sm:$0xff]  ;;  %v67_v44 = vld [vmem:[%s6665_s3 + $0x20] sm:$0xff] }
   0xf   :  { %1169 = vmatpush.msra.mxu3 %v121_v23  ;;  %1150 = vmatpush.msra.mxu2 %v104_v25  ;;  %v117_v39 = vld [vmem:[%s6665_s3 + $0x1b0] sm:$0xff]  ;;  %v84_v42 = vld [vmem:[%s6665_s3 + $0xa8] sm:$0xff]  ;;  %v99_v45 = vld [vmem:[%s6665_s3 + $0x120] sm:$0xff] }
  0x10   :  { %1130 = vmatpush.msra.mxu1 %v88_v26  ;;  %1111 = vmatpush.msra.mxu0 %v71_v28  ;;  %v116_v43 = vld [vmem:[%s6665_s3 + $0x1a8] sm:$0xff]  ;;  %v83_v46 = vld [vmem:[%s6665_s3 + $0xa0] sm:$0xff]  ;;  %v66_v48 = vld [vmem:[%s6665_s3 + $0x18] sm:$0xff] }
  0x11   :  { %1170 = vmatpush.msra.mxu3 %v120_v27  ;;  %1151 = vmatpush.msra.mxu2 %v103_v29  ;;  %v115_v47 = vld [vmem:[%s6665_s3 + $0x1a0] sm:$0xff]  ;;  %v98_v49 = vld [vmem:[%s6665_s3 + $0x118] sm:$0xff]  ;;  %v65_v52 = vld [vmem:[%s6665_s3 + $0x10] sm:$0xff] }
  0x12   :  { %1131 = vmatpush.msra.mxu1 %v87_v30  ;;  %1112 = vmatpush.msra.mxu0 %v70_v32  ;;  %v82_v50 = vld [vmem:[%s6665_s3 + $0x98] sm:$0xff]  ;;  %v97_v53 = vld [vmem:[%s6665_s3 + $0x110] sm:$0xff]  ;;  %v64_v56 = vld [vmem:[%s6665_s3 + $0x8] sm:$0xff] }
  0x13   :  { %1171 = vmatpush.msra.mxu3 %v119_v31  ;;  %1152 = vmatpush.msra.mxu2 %v102_v33  ;;  %v114_v51 = vld [vmem:[%s6665_s3 + $0x198] sm:$0xff]  ;;  %v81_v54 = vld [vmem:[%s6665_s3 + $0x90] sm:$0xff]  ;;  %v96_v57 = vld [vmem:[%s6665_s3 + $0x108] sm:$0xff] }
  0x14   :  { %1132 = vmatpush.msra.mxu1 %v86_v34  ;;  %1113 = vmatpush.msra.mxu0 %v69_v36  ;;  %v113_v55 = vld [vmem:[%s6665_s3 + $0x190] sm:$0xff]  ;;  %v80_v58 = vld [vmem:[%s6665_s3 + $0x88] sm:$0xff]  ;;  %v63_v60 = vld [vmem:[%s6665_s3] sm:$0xff] }
  0x15   :  { %1172 = vmatpush.msra.mxu3 %v118_v35  ;;  %1153 = vmatpush.msra.mxu2 %v101_v37  ;;  %v112_v59 = vld [vmem:[%s6665_s3 + $0x188] sm:$0xff]  ;;  %v95_v61 = vld [vmem:[%s6665_s3 + $0x100] sm:$0xff]  ;;  %v142_v62 = vld [vmem:[%s6665_s3 + $0x278] sm:$0xff] }
  0x16   :  { %1133 = vmatpush.msra.mxu1 %v85_v38  ;;  %1114 = vmatpush.msra.mxu0 %v68_v40  ;;  %v174_v63 = vld [vmem:[%s6665_s3 + $0x378] sm:$0xff]  ;;  %v79_v0 = vld [vmem:[%s6665_s3 + $0x80] sm:$0xff]  ;;  %v141_v2 = vld [vmem:[%s6665_s3 + $0x270] sm:$0xff] }
  0x17   :  { %1173 = vmatpush.msra.mxu3 %v117_v39  ;;  %1154 = vmatpush.msra.mxu2 %v100_v41  ;;  %v111_v1 = vld [vmem:[%s6665_s3 + $0x180] sm:$0xff]  ;;  %v158_v3 = vld [vmem:[%s6665_s3 + $0x2f8] sm:$0xff]  ;;  %v173_v4 = vld [vmem:[%s6665_s3 + $0x370] sm:$0xff] }
  0x18   :  { %1134 = vmatpush.msra.mxu1 %v84_v42  ;;  %1115 = vmatpush.msra.mxu0 %v67_v44  ;;  %v190_v5 = vld [vmem:[%s6665_s3 + $0x3f8] sm:$0xff]  ;;  %v140_v6 = vld [vmem:[%s6665_s3 + $0x268] sm:$0xff]  ;;  %v157_v7 = vld [vmem:[%s6665_s3 + $0x2f0] sm:$0xff] }
  0x19   :  { %1174 = vmatpush.msra.mxu3 %v116_v43  ;;  %1155 = vmatpush.msra.mxu2 %v99_v45  ;;  %v172_v8 = vld [vmem:[%s6665_s3 + $0x368] sm:$0xff]  ;;  %v189_v9 = vld [vmem:[%s6665_s3 + $0x3f0] sm:$0xff]  ;;  %v139_v10 = vld [vmem:[%s6665_s3 + $0x260] sm:$0xff] }
  0x1a   :  { %1135 = vmatpush.msra.mxu1 %v83_v46  ;;  %1116 = vmatpush.msra.mxu0 %v66_v48  ;;  %v156_v11 = vld [vmem:[%s6665_s3 + $0x2e8] sm:$0xff]  ;;  %v171_v12 = vld [vmem:[%s6665_s3 + $0x360] sm:$0xff]  ;;  %v138_v14 = vld [vmem:[%s6665_s3 + $0x258] sm:$0xff] }
  0x1b   :  { %1175 = vmatpush.msra.mxu3 %v115_v47  ;;  %1156 = vmatpush.msra.mxu2 %v98_v49  ;;  %v188_v13 = vld [vmem:[%s6665_s3 + $0x3e8] sm:$0xff]  ;;  %v155_v15 = vld [vmem:[%s6665_s3 + $0x2e0] sm:$0xff]  ;;  %v170_v16 = vld [vmem:[%s6665_s3 + $0x358] sm:$0xff] }
  0x1c   :  { %1136 = vmatpush.msra.mxu1 %v82_v50  ;;  %1117 = vmatpush.msra.mxu0 %v65_v52  ;;  %v187_v17 = vld [vmem:[%s6665_s3 + $0x3e0] sm:$0xff]  ;;  %v137_v18 = vld [vmem:[%s6665_s3 + $0x250] sm:$0xff]  ;;  %v154_v19 = vld [vmem:[%s6665_s3 + $0x2d8] sm:$0xff] }
  0x1d   :  { %1176 = vmatpush.msra.mxu3 %v114_v51  ;;  %1157 = vmatpush.msra.mxu2 %v97_v53  ;;  %v169_v20 = vld [vmem:[%s6665_s3 + $0x350] sm:$0xff]  ;;  %v186_v21 = vld [vmem:[%s6665_s3 + $0x3d8] sm:$0xff]  ;;  %v136_v22 = vld [vmem:[%s6665_s3 + $0x248] sm:$0xff] }
  0x1e   :  { %1137 = vmatpush.msra.mxu1 %v81_v54  ;;  %1118 = vmatpush.msra.mxu0 %v64_v56  ;;  %v153_v23 = vld [vmem:[%s6665_s3 + $0x2d0] sm:$0xff]  ;;  %v168_v24 = vld [vmem:[%s6665_s3 + $0x348] sm:$0xff]  ;;  %v49_v26 = vld [vmem:[%s6666_s0] sm:$0xff] }
  0x1f   :  { %1177 = vmatpush.msra.mxu3 %v113_v55  ;;  %1158 = vmatpush.msra.mxu2 %v96_v57  ;;  %v185_v25 = vld [vmem:[%s6665_s3 + $0x3d0] sm:$0xff]  ;;  %v135_v27 = vld [vmem:[%s6665_s3 + $0x240] sm:$0xff]  ;;  %v152_v28 = vld [vmem:[%s6665_s3 + $0x2c8] sm:$0xff]  ;;  %977 = vst [vmem:[#allocation1] ss:$4 sm:$0xff] %v49_v26 }
  0x20   :  { %1138 = vmatpush.msra.mxu1 %v80_v58  ;;  %1119 = vmatpush.msra.mxu0 %v63_v60  ;;  %v167_v29 = vld [vmem:[%s6665_s3 + $0x340] sm:$0xff]  ;;  %v184_v30 = vld [vmem:[%s6665_s3 + $0x3c8] sm:$0xff]  ;;  %v134_v31 = vld [vmem:[%s6665_s3 + $0x238] sm:$0xff] }
  0x21   :  { %1178 = vmatpush.msra.mxu3 %v112_v59  ;;  %1159 = vmatpush.msra.mxu2 %v95_v61  ;;  %v151_v32 = vld [vmem:[%s6665_s3 + $0x2c0] sm:$0xff]  ;;  %v166_v33 = vld [vmem:[%s6665_s3 + $0x338] sm:$0xff]  ;;  %v133_v35 = vld [vmem:[%s6665_s3 + $0x230] sm:$0xff] }
  0x22   :  { %1184 = vmatpush.msrb.mxu0 %v142_v62  ;;  %1139 = vmatpush.msra.mxu1 %v79_v0  ;;  %v183_v34 = vld [vmem:[%s6665_s3 + $0x3c0] sm:$0xff]  ;;  %v150_v36 = vld [vmem:[%s6665_s3 + $0x2b8] sm:$0xff]  ;;  %v165_v37 = vld [vmem:[%s6665_s3 + $0x330] sm:$0xff] }
  0x23   :  { %1224 = vmatpush.msrb.mxu2 %v174_v63  ;;  %1179 = vmatpush.msra.mxu3 %v111_v1  ;;  %v182_v38 = vld [vmem:[%s6665_s3 + $0x3b8] sm:$0xff]  ;;  %v132_v39 = vld [vmem:[%s6665_s3 + $0x228] sm:$0xff]  ;;  %v149_v40 = vld [vmem:[%s6665_s3 + $0x2b0] sm:$0xff] }
  0x24   :  { %1185 = vmatpush.msrb.mxu0 %v141_v2  ;;  %1204 = vmatpush.msrb.mxu1 %v158_v3  ;;  %v164_v41 = vld [vmem:[%s6665_s3 + $0x328] sm:$0xff]  ;;  %v181_v42 = vld [vmem:[%s6665_s3 + $0x3b0] sm:$0xff]  ;;  %v131_v43 = vld [vmem:[%s6665_s3 + $0x220] sm:$0xff] }
  0x25   :  { %1225 = vmatpush.msrb.mxu2 %v173_v4  ;;  %1244 = vmatpush.msrb.mxu3 %v190_v5  ;;  %v148_v44 = vld [vmem:[%s6665_s3 + $0x2a8] sm:$0xff]  ;;  %v51_v45 = vld [vmem:[%s6666_s0 + $0x10] sm:$0xff]  ;;  %v163_v51 = vld [vmem:[%s6665_s3 + $0x320] sm:$0xff] }
  0x26   :  { %1186 = vmatpush.msrb.mxu0 %v140_v6  ;;  %1205 = vmatpush.msrb.mxu1 %v157_v7  ;;  %v50_v46 = vld [vmem:[%s6666_s0 + $0x8] sm:$0xff]  ;;  %v980_v47 = vld.sshfl [vmem:[#allocation1] sm:$0xff pattern:$0x73625140]  ;;  %v130_v53 = vld [vmem:[%s6665_s3 + $0x218] sm:$0xff] }
  0x27   :  { %1226 = vmatpush.msrb.mxu2 %v172_v8  ;;  %1245 = vmatpush.msrb.mxu3 %v189_v9  ;;  %v982_v48 = vld.sshfl [vmem:[#allocation1 + $0x10] sm:$0xff pattern:$0x73625140]  ;;  %v3764_v49 = vld.sshfl [vmem:[#allocation1 + $0x8] sm:$0xff pattern:$0x73625140] }
  0x28   :  { %1187 = vmatpush.msrb.mxu0 %v139_v10  ;;  %1206 = vmatpush.msrb.mxu1 %v156_v11  ;;  %v3766_v50 = vld.sshfl [vmem:[#allocation1 + $0x18] sm:$0xff pattern:$0x73625140]  ;;  %v180_v52 = vld [vmem:[%s6665_s3 + $0x3a8] sm:$0xff]  ;;  %v147_v54 = vld [vmem:[%s6665_s3 + $0x2a0] sm:$0xff] }
  0x29   :  { %1227 = vmatpush.msrb.mxu2 %v171_v12  ;;  %1246 = vmatpush.msrb.mxu3 %v188_v13  ;;  %988 = vst [vmem:[#allocation1] ss:$4 sm:$0xff] %v51_v45  ;;  %v162_v55 = vld [vmem:[%s6665_s3 + $0x318] sm:$0xff]  ;;  %v179_v56 = vld [vmem:[%s6665_s3 + $0x3a0] sm:$0xff]  ;;  %v129_v57 = vld [vmem:[%s6665_s3 + $0x210] sm:$0xff] }
  0x2a   :  { %1188 = vmatpush.msrb.mxu0 %v138_v14  ;;  %1207 = vmatpush.msrb.mxu1 %v155_v15  ;;  %979 = vst [vmem:[#allocation1 + $0x20] ss:$4 sm:$0xff] %v50_v46  ;;  %v146_v58 = vld [vmem:[%s6665_s3 + $0x298] sm:$0xff]  ;;  %v161_v59 = vld [vmem:[%s6665_s3 + $0x310] sm:$0xff]  ;;  %v128_v61 = vld [vmem:[%s6665_s3 + $0x208] sm:$0xff] }
  0x2b   :  { %1228 = vmatpush.msrb.mxu2 %v170_v16  ;;  %1247 = vmatpush.msrb.mxu3 %v187_v17  ;;  %v178_v60 = vld [vmem:[%s6665_s3 + $0x398] sm:$0xff]  ;;  %v145_v62 = vld [vmem:[%s6665_s3 + $0x290] sm:$0xff]  ;;  %v160_v63 = vld [vmem:[%s6665_s3 + $0x308] sm:$0xff] }
  0x2c   :  { %1189 = vmatpush.msrb.mxu0 %v137_v18  ;;  %1208 = vmatpush.msrb.mxu1 %v154_v19  ;;  %v177_v0 = vld [vmem:[%s6665_s3 + $0x390] sm:$0xff]  ;;  %v127_v1 = vld [vmem:[%s6665_s3 + $0x200] sm:$0xff]  ;;  %v144_v2 = vld [vmem:[%s6665_s3 + $0x288] sm:$0xff] }
  0x2d   :  { %1229 = vmatpush.msrb.mxu2 %v169_v20  ;;  %1248 = vmatpush.msrb.mxu3 %v186_v21  ;;  %v159_v3 = vld [vmem:[%s6665_s3 + $0x300] sm:$0xff]  ;;  %v176_v4 = vld [vmem:[%s6665_s3 + $0x388] sm:$0xff]  ;;  %v52_v5 = vld [vmem:[%s6666_s0 + $0x18] sm:$0xff] }
  0x2e   :  { %1190 = vmatpush.msrb.mxu0 %v136_v22  ;;  %1209 = vmatpush.msrb.mxu1 %v153_v23  ;;  %v206_v10 = vld [vmem:[%s6665_s3 + $0x478] sm:$0xff]  ;;  %v143_v12 = vld [vmem:[%s6665_s3 + $0x280] sm:$0xff]  ;;  %v205_v14 = vld [vmem:[%s6665_s3 + $0x470] sm:$0xff] }
  0x2f   :  { %1230 = vmatpush.msrb.mxu2 %v168_v24  ;;  %1249 = vmatpush.msrb.mxu3 %v185_v25  ;;  %v238_v11 = vld [vmem:[%s6665_s3 + $0x578] sm:$0xff]  ;;  %v175_v13 = vld [vmem:[%s6665_s3 + $0x380] sm:$0xff]  ;;  %v237_v16 = vld [vmem:[%s6665_s3 + $0x570] sm:$0xff] }
  0x30   :  { %1191 = vmatpush.msrb.mxu0 %v135_v27  ;;  %1210 = vmatpush.msrb.mxu1 %v152_v28  ;;  %v222_v15 = vld [vmem:[%s6665_s3 + $0x4f8] sm:$0xff]  ;;  %v204_v18 = vld [vmem:[%s6665_s3 + $0x468] sm:$0xff]  ;;  %v221_v19 = vld [vmem:[%s6665_s3 + $0x4f0] sm:$0xff] }
  0x31   :  { %1231 = vmatpush.msrb.mxu2 %v167_v29  ;;  %1250 = vmatpush.msrb.mxu3 %v184_v30  ;;  %v986_v6 = vld.sshfl [vmem:[#allocation1 + $0x30] sm:$0xff pattern:$0x73625140]  ;;  %v3825_v7 = vld.sshfl [vmem:[#allocation1 + $0x20] sm:$0xff pattern:$0x73625140] }
  0x32   :  { %1192 = vmatpush.msrb.mxu0 %v134_v31  ;;  %1211 = vmatpush.msrb.mxu1 %v151_v32  ;;  %v987_v8 = vld.sshfl [vmem:[#allocation1 + $0x38] sm:$0xff pattern:$0x73625140]  ;;  %v3827_v9 = vld.sshfl [vmem:[#allocation1 + $0x28] sm:$0xff pattern:$0x73625140] }
  0x33   :  { %1232 = vmatpush.msrb.mxu2 %v166_v33  ;;  %1251 = vmatpush.msrb.mxu3 %v183_v34  ;;  %989 = vst [vmem:[#allocation1 + $0x20] ss:$4 sm:$0xff] %v52_v5  ;;  %v254_v17 = vld [vmem:[%s6665_s3 + $0x5f8] sm:$0xff]  ;;  %v236_v20 = vld [vmem:[%s6665_s3 + $0x568] sm:$0xff]  ;;  %v253_v21 = vld [vmem:[%s6665_s3 + $0x5f0] sm:$0xff] }
  0x34   :  { %1193 = vmatpush.msrb.mxu0 %v133_v35  ;;  %1212 = vmatpush.msrb.mxu1 %v150_v36  ;;  %v203_v22 = vld [vmem:[%s6665_s3 + $0x460] sm:$0xff]  ;;  %v220_v23 = vld [vmem:[%s6665_s3 + $0x4e8] sm:$0xff]  ;;  %v202_v26 = vld [vmem:[%s6665_s3 + $0x458] sm:$0xff] }
  0x35   :  { %1233 = vmatpush.msrb.mxu2 %v165_v37  ;;  %1252 = vmatpush.msrb.mxu3 %v182_v38  ;;  %v235_v24 = vld [vmem:[%s6665_s3 + $0x560] sm:$0xff]  ;;  %v252_v25 = vld [vmem:[%s6665_s3 + $0x5e8] sm:$0xff]  ;;  %v234_v28 = vld [vmem:[%s6665_s3 + $0x558] sm:$0xff] }
  0x36   :  { %1194 = vmatpush.msrb.mxu0 %v132_v39  ;;  %1213 = vmatpush.msrb.mxu1 %v149_v40  ;;  %v219_v27 = vld [vmem:[%s6665_s3 + $0x4e0] sm:$0xff]  ;;  %v3893_v31 = vld.sshfl [vmem:[#allocation1 + $0x10] sm:$0xff pattern:$0x73625140]  ;;  %v218_v36 = vld [vmem:[%s6665_s3 + $0x4d8] sm:$0xff] }
  0x37   :  { %1234 = vmatpush.msrb.mxu2 %v164_v41  ;;  %1253 = vmatpush.msrb.mxu3 %v181_v42  ;;  %v3888_v29 = vld.sshfl [vmem:[#allocation1] sm:$0xff pattern:$0x73625140]  ;;  %v3898_v33 = vld.sshfl [vmem:[#allocation1 + $0x8] sm:$0xff pattern:$0x73625140] }
  0x38   :  { %1195 = vmatpush.msrb.mxu0 %v131_v43  ;;  %1214 = vmatpush.msrb.mxu1 %v148_v44  ;;  %v251_v30 = vld [vmem:[%s6665_s3 + $0x5e0] sm:$0xff]  ;;  %v3900_v34 = vld.sshfl [vmem:[#allocation1 + $0x18] sm:$0xff pattern:$0x73625140]  ;;  %v201_v35 = vld [vmem:[%s6665_s3 + $0x450] sm:$0xff] }
  0x39   :  { %1235 = vmatpush.msrb.mxu2 %v163_v51  ;;  %1254 = vmatpush.msrb.mxu3 %v180_v52  ;;  %v53_v32 = vld [vmem:[%s6666_s0 + $0x20] sm:$0xff]  ;;  %v233_v37 = vld [vmem:[%s6665_s3 + $0x550] sm:$0xff]  ;;  %v250_v38 = vld [vmem:[%s6665_s3 + $0x5d8] sm:$0xff] }
  0x3a   :  { %1196 = vmatpush.msrb.mxu0 %v130_v53  ;;  %1215 = vmatpush.msrb.mxu1 %v147_v54  ;;  %998 = vst [vmem:[#allocation1] ss:$4 sm:$0xff] %v53_v32  ;;  %v200_v39 = vld [vmem:[%s6665_s3 + $0x448] sm:$0xff]  ;;  %v217_v40 = vld [vmem:[%s6665_s3 + $0x4d0] sm:$0xff]  ;;  %v199_v43 = vld [vmem:[%s6665_s3 + $0x440] sm:$0xff] }
  0x3b   :  { %1236 = vmatpush.msrb.mxu2 %v162_v55  ;;  %1255 = vmatpush.msrb.mxu3 %v179_v56  ;;  %v232_v41 = vld [vmem:[%s6665_s3 + $0x548] sm:$0xff]  ;;  %v249_v42 = vld [vmem:[%s6665_s3 + $0x5d0] sm:$0xff]  ;;  %v231_v45 = vld [vmem:[%s6665_s3 + $0x540] sm:$0xff] }
  0x3c   :  { %1197 = vmatpush.msrb.mxu0 %v129_v57  ;;  %1216 = vmatpush.msrb.mxu1 %v146_v58  ;;  %v216_v44 = vld [vmem:[%s6665_s3 + $0x4c8] sm:$0xff]  ;;  %v197_v51 = vld [vmem:[%s6665_s3 + $0x430] sm:$0xff]  ;;  %v214_v52 = vld [vmem:[%s6665_s3 + $0x4b8] sm:$0xff] }
  0x3d   :  { %1237 = vmatpush.msrb.mxu2 %v161_v59  ;;  %1256 = vmatpush.msrb.mxu3 %v178_v60  ;;  %v248_v46 = vld [vmem:[%s6665_s3 + $0x5c8] sm:$0xff]  ;;  %v229_v53 = vld [vmem:[%s6665_s3 + $0x530] sm:$0xff]  ;;  %v246_v54 = vld [vmem:[%s6665_s3 + $0x5b8] sm:$0xff] }
  0x3e   :  { %1198 = vmatpush.msrb.mxu0 %v128_v61  ;;  %1217 = vmatpush.msrb.mxu1 %v145_v62  ;;  %v196_v55 = vld [vmem:[%s6665_s3 + $0x428] sm:$0xff]  ;;  %v213_v56 = vld [vmem:[%s6665_s3 + $0x4b0] sm:$0xff]  ;;  %v195_v59 = vld [vmem:[%s6665_s3 + $0x420] sm:$0xff] }
  0x3f   :  { %1238 = vmatpush.msrb.mxu2 %v160_v63  ;;  %1257 = vmatpush.msrb.mxu3 %v177_v0  ;;  %v228_v57 = vld [vmem:[%s6665_s3 + $0x528] sm:$0xff]  ;;  %v245_v58 = vld [vmem:[%s6665_s3 + $0x5b0] sm:$0xff]  ;;  %v227_v61 = vld [vmem:[%s6665_s3 + $0x520] sm:$0xff] }
  0x40   :  { %1199 = vmatpush.msrb.mxu0 %v127_v1  ;;  %1218 = vmatpush.msrb.mxu1 %v144_v2  ;;  %v212_v60 = vld [vmem:[%s6665_s3 + $0x4a8] sm:$0xff]  ;;  %v194_v63 = vld [vmem:[%s6665_s3 + $0x418] sm:$0xff]  ;;  %v211_v0 = vld [vmem:[%s6665_s3 + $0x4a0] sm:$0xff] }
  0x41   :  { %1239 = vmatpush.msrb.mxu2 %v159_v3  ;;  %1258 = vmatpush.msrb.mxu3 %v176_v4  ;;  %v244_v62 = vld [vmem:[%s6665_s3 + $0x5a8] sm:$0xff]  ;;  %v226_v1 = vld [vmem:[%s6665_s3 + $0x518] sm:$0xff]  ;;  %v243_v2 = vld [vmem:[%s6665_s3 + $0x5a0] sm:$0xff] }
  0x42   :  { %1120 = vmatmul.f32.vlgmr.msra.gmra.mxu0 %v980_v47  ;;  %1160 = vmatmul.f32.vlgmr.msra.gmra.mxu2 %v982_v48  ;;  %v198_v47 = vld [vmem:[%s6665_s3 + $0x438] sm:$0xff]  ;;  %v215_v48 = vld [vmem:[%s6665_s3 + $0x4c0] sm:$0xff]  ;;  %v193_v3 = vld [vmem:[%s6665_s3 + $0x410] sm:$0xff] }
  0x43   :  { %1264 = vmatpush.msra.mxu0 %v206_v10  ;;  %1304 = vmatpush.msra.mxu2 %v238_v11  ;;  %v210_v4 = vld [vmem:[%s6665_s3 + $0x498] sm:$0xff]  ;;  %v225_v5 = vld [vmem:[%s6665_s3 + $0x510] sm:$0xff]  ;;  %v191_v11 = vld [vmem:[%s6665_s3 + $0x400] sm:$0xff] }
  0x44   :  { %1219 = vmatpush.msrb.mxu1 %v143_v12  ;;  %1259 = vmatpush.msrb.mxu3 %v175_v13  ;;  %v241_v10 = vld [vmem:[%s6665_s3 + $0x590] sm:$0xff]  ;;  %v208_v12 = vld [vmem:[%s6665_s3 + $0x488] sm:$0xff]  ;;  %v223_v13 = vld [vmem:[%s6665_s3 + $0x500] sm:$0xff] }
  0x45   :  { %1140 = vmatmul.f32.vlgmr.msra.gmra.mxu1 %v3764_v49  ;;  %1180 = vmatmul.f32.vlgmr.msra.gmra.mxu3 %v3766_v50  ;;  %v230_v49 = vld [vmem:[%s6665_s3 + $0x538] sm:$0xff]  ;;  %v247_v50 = vld [vmem:[%s6665_s3 + $0x5c0] sm:$0xff]  ;;  %v54_v32 = vld [vmem:[%s6666_s0 + $0x28] sm:$0xff] }
  0x46   :  { %1265 = vmatpush.msra.mxu0 %v205_v14  ;;  %1284 = vmatpush.msra.mxu1 %v222_v15  ;;  %v240_v14 = vld [vmem:[%s6665_s3 + $0x588] sm:$0xff]  ;;  %v270_v15 = vld [vmem:[%s6665_s3 + $0x678] sm:$0xff] }
  0x47   :  { %1305 = vmatpush.msra.mxu2 %v237_v16  ;;  %1324 = vmatpush.msra.mxu3 %v254_v17  ;;  %v302_v16 = vld [vmem:[%s6665_s3 + $0x778] sm:$0xff]  ;;  %v207_v17 = vld [vmem:[%s6665_s3 + $0x480] sm:$0xff] }
  0x48   :  { %1266 = vmatpush.msra.mxu0 %v204_v18  ;;  %1285 = vmatpush.msra.mxu1 %v221_v19  ;;  %v239_v18 = vld [vmem:[%s6665_s3 + $0x580] sm:$0xff]  ;;  %v269_v19 = vld [vmem:[%s6665_s3 + $0x670] sm:$0xff] }
  0x49   :  { %1306 = vmatpush.msra.mxu2 %v236_v20  ;;  %1325 = vmatpush.msra.mxu3 %v253_v21  ;;  %v286_v20 = vld [vmem:[%s6665_s3 + $0x6f8] sm:$0xff]  ;;  %v301_v21 = vld [vmem:[%s6665_s3 + $0x770] sm:$0xff] }
  0x4a   :  { %1267 = vmatpush.msra.mxu0 %v203_v22  ;;  %1286 = vmatpush.msra.mxu1 %v220_v23  ;;  %v318_v22 = vld [vmem:[%s6665_s3 + $0x7f8] sm:$0xff]  ;;  %v268_v23 = vld [vmem:[%s6665_s3 + $0x668] sm:$0xff] }
  0x4b   :  { %1307 = vmatpush.msra.mxu2 %v235_v24  ;;  %1326 = vmatpush.msra.mxu3 %v252_v25  ;;  %v285_v24 = vld [vmem:[%s6665_s3 + $0x6f0] sm:$0xff]  ;;  %v300_v25 = vld [vmem:[%s6665_s3 + $0x768] sm:$0xff] }
  0x4c   :  { %1240 = vmatmul.f32.vlgmr.msrb.gmra.mxu2 %v986_v6  ;;  %1268 = vmatpush.msra.mxu0 %v202_v26  ;;  %v242_v6 = vld [vmem:[%s6665_s3 + $0x598] sm:$0xff]  ;;  %v317_v26 = vld [vmem:[%s6665_s3 + $0x7f0] sm:$0xff] }
  0x4d   :  { %1287 = vmatpush.msra.mxu1 %v219_v27  ;;  %1308 = vmatpush.msra.mxu2 %v234_v28  ;;  %v267_v27 = vld [vmem:[%s6665_s3 + $0x660] sm:$0xff] }
  0x4e   :  { %1327 = vmatpush.msra.mxu3 %v251_v30  ;;  %1200 = vmatmul.f32.vlgmr.msrb.gmra.mxu0 %v3825_v7  ;;  %v192_v7 = vld [vmem:[%s6665_s3 + $0x408] sm:$0xff]  ;;  %v4079_v28 = vld.sshfl [vmem:[#allocation1 + $0x20] sm:$0xff pattern:$0x73625140] }
  0x4f   :  { %1260 = vmatmul.f32.vlgmr.msrb.gmra.mxu3 %v987_v8  ;;  %1269 = vmatpush.msra.mxu0 %v201_v35  ;;  %v209_v8 = vld [vmem:[%s6665_s3 + $0x490] sm:$0xff]  ;;  %v4083_v30 = vld.sshfl [vmem:[#allocation1 + $0x28] sm:$0xff pattern:$0x73625140] }
  0x50   :  { %1288 = vmatpush.msra.mxu1 %v218_v36  ;;  %1309 = vmatpush.msra.mxu2 %v233_v37  ;;  %v316_v35 = vld [vmem:[%s6665_s3 + $0x7e8] sm:$0xff]  ;;  %v266_v36 = vld [vmem:[%s6665_s3 + $0x658] sm:$0xff]  ;;  %v283_v37 = vld [vmem:[%s6665_s3 + $0x6e0] sm:$0xff] }
  0x51   :  { %1328 = vmatpush.msra.mxu3 %v250_v38  ;;  %1220 = vmatmul.f32.vlgmr.msrb.gmra.mxu1 %v3827_v9  ;;  %v224_v9 = vld [vmem:[%s6665_s3 + $0x508] sm:$0xff]  ;;  %v298_v38 = vld [vmem:[%s6665_s3 + $0x758] sm:$0xff] }
  0x52   :  { %1270 = vmatpush.msra.mxu0 %v200_v39  ;;  %1289 = vmatpush.msra.mxu1 %v217_v40  ;;  %v315_v39 = vld [vmem:[%s6665_s3 + $0x7e0] sm:$0xff]  ;;  %v265_v40 = vld [vmem:[%s6665_s3 + $0x650] sm:$0xff] }
  0x53   :  { %1310 = vmatpush.msra.mxu2 %v232_v41  ;;  %1329 = vmatpush.msra.mxu3 %v249_v42  ;;  %v282_v41 = vld [vmem:[%s6665_s3 + $0x6d8] sm:$0xff]  ;;  %v297_v42 = vld [vmem:[%s6665_s3 + $0x750] sm:$0xff] }
  0x54   :  { %1271 = vmatpush.msra.mxu0 %v199_v43  ;;  %1290 = vmatpush.msra.mxu1 %v216_v44  ;;  %v314_v43 = vld [vmem:[%s6665_s3 + $0x7d8] sm:$0xff]  ;;  %v264_v44 = vld [vmem:[%s6665_s3 + $0x648] sm:$0xff] }
  0x55   :  { %1311 = vmatpush.msra.mxu2 %v231_v45  ;;  %1330 = vmatpush.msra.mxu3 %v248_v46  ;;  %v281_v45 = vld [vmem:[%s6665_s3 + $0x6d0] sm:$0xff]  ;;  %v296_v46 = vld [vmem:[%s6665_s3 + $0x748] sm:$0xff] }
  0x56   :  { %1272 = vmatpush.msra.mxu0 %v198_v47  ;;  %1291 = vmatpush.msra.mxu1 %v215_v48  ;;  %v313_v47 = vld [vmem:[%s6665_s3 + $0x7d0] sm:$0xff]  ;;  %v263_v48 = vld [vmem:[%s6665_s3 + $0x640] sm:$0xff] }
  0x57   :  { %1312 = vmatpush.msra.mxu2 %v230_v49  ;;  %1331 = vmatpush.msra.mxu3 %v247_v50  ;;  %v280_v49 = vld [vmem:[%s6665_s3 + $0x6c8] sm:$0xff]  ;;  %v295_v50 = vld [vmem:[%s6665_s3 + $0x740] sm:$0xff] }
  0x58   :  { %1273 = vmatpush.msra.mxu0 %v197_v51  ;;  %1292 = vmatpush.msra.mxu1 %v214_v52  ;;  %v312_v51 = vld [vmem:[%s6665_s3 + $0x7c8] sm:$0xff]  ;;  %v262_v52 = vld [vmem:[%s6665_s3 + $0x638] sm:$0xff] }
  0x59   :  { %1313 = vmatpush.msra.mxu2 %v229_v53  ;;  %1332 = vmatpush.msra.mxu3 %v246_v54  ;;  %v279_v53 = vld [vmem:[%s6665_s3 + $0x6c0] sm:$0xff]  ;;  %v294_v54 = vld [vmem:[%s6665_s3 + $0x738] sm:$0xff] }
  0x5a   :  { %1274 = vmatpush.msra.mxu0 %v196_v55  ;;  %1293 = vmatpush.msra.mxu1 %v213_v56  ;;  %v311_v55 = vld [vmem:[%s6665_s3 + $0x7c0] sm:$0xff]  ;;  %v261_v56 = vld [vmem:[%s6665_s3 + $0x630] sm:$0xff] }
  0x5b   :  { %1314 = vmatpush.msra.mxu2 %v228_v57  ;;  %1333 = vmatpush.msra.mxu3 %v245_v58  ;;  %v278_v57 = vld [vmem:[%s6665_s3 + $0x6b8] sm:$0xff]  ;;  %v293_v58 = vld [vmem:[%s6665_s3 + $0x730] sm:$0xff] }
  0x5c   :  { %1275 = vmatpush.msra.mxu0 %v195_v59  ;;  %1294 = vmatpush.msra.mxu1 %v212_v60  ;;  %v310_v59 = vld [vmem:[%s6665_s3 + $0x7b8] sm:$0xff]  ;;  %v260_v60 = vld [vmem:[%s6665_s3 + $0x628] sm:$0xff] }
  0x5d   :  { %1315 = vmatpush.msra.mxu2 %v227_v61  ;;  %1334 = vmatpush.msra.mxu3 %v244_v62  ;;  %v277_v61 = vld [vmem:[%s6665_s3 + $0x6b0] sm:$0xff]  ;;  %v292_v62 = vld [vmem:[%s6665_s3 + $0x728] sm:$0xff] }
  0x5e   :  { %1276 = vmatpush.msra.mxu0 %v194_v63  ;;  %1295 = vmatpush.msra.mxu1 %v211_v0  ;;  %v309_v63 = vld [vmem:[%s6665_s3 + $0x7b0] sm:$0xff]  ;;  %v259_v0 = vld [vmem:[%s6665_s3 + $0x620] sm:$0xff] }
  0x5f   :  { %1316 = vmatpush.msra.mxu2 %v226_v1  ;;  %1335 = vmatpush.msra.mxu3 %v243_v2  ;;  %v276_v1 = vld [vmem:[%s6665_s3 + $0x6a8] sm:$0xff]  ;;  %v291_v2 = vld [vmem:[%s6665_s3 + $0x720] sm:$0xff] }
  0x60   :  { %1277 = vmatpush.msra.mxu0 %v193_v3  ;;  %1296 = vmatpush.msra.mxu1 %v210_v4  ;;  %v308_v3 = vld [vmem:[%s6665_s3 + $0x7a8] sm:$0xff]  ;;  %v258_v4 = vld [vmem:[%s6665_s3 + $0x618] sm:$0xff] }
  0x61   :  { %1317 = vmatpush.msra.mxu2 %v225_v5  ;;  %1336 = vmatpush.msra.mxu3 %v242_v6  ;;  %v275_v5 = vld [vmem:[%s6665_s3 + $0x6a0] sm:$0xff]  ;;  %v290_v6 = vld [vmem:[%s6665_s3 + $0x718] sm:$0xff] }
  0x62   :  { %1278 = vmatpush.msra.mxu0 %v192_v7  ;;  %1297 = vmatpush.msra.mxu1 %v209_v8  ;;  %v307_v7 = vld [vmem:[%s6665_s3 + $0x7a0] sm:$0xff]  ;;  %v257_v8 = vld [vmem:[%s6665_s3 + $0x610] sm:$0xff] }
  0x63   :  { %1318 = vmatpush.msra.mxu2 %v224_v9  ;;  %1337 = vmatpush.msra.mxu3 %v241_v10  ;;  %v274_v9 = vld [vmem:[%s6665_s3 + $0x698] sm:$0xff]  ;;  %v289_v10 = vld [vmem:[%s6665_s3 + $0x710] sm:$0xff] }
  0x64   :  { %1279 = vmatpush.msra.mxu0 %v191_v11  ;;  %1298 = vmatpush.msra.mxu1 %v208_v12  ;;  %v306_v11 = vld [vmem:[%s6665_s3 + $0x798] sm:$0xff]  ;;  %v256_v12 = vld [vmem:[%s6665_s3 + $0x608] sm:$0xff] }
  0x65   :  { %1319 = vmatpush.msra.mxu2 %v223_v13  ;;  %1338 = vmatpush.msra.mxu3 %v240_v14  ;;  %v273_v13 = vld [vmem:[%s6665_s3 + $0x690] sm:$0xff]  ;;  %v288_v14 = vld [vmem:[%s6665_s3 + $0x708] sm:$0xff] }
  0x66   :  { %1280 = vmatmul.f32.vlgmr.msra.gmra.mxu0 %v3888_v29  ;;  %1320 = vmatmul.f32.vlgmr.msra.gmra.mxu2 %v3893_v31  ;;  %v4081_v29 = vld.sshfl [vmem:[#allocation1 + $0x30] sm:$0xff pattern:$0x73625140]  ;;  %v284_v31 = vld [vmem:[%s6665_s3 + $0x6e8] sm:$0xff] }
  0x67   :  { %1344 = vmatpush.msrb.mxu0 %v270_v15  ;;  %1384 = vmatpush.msrb.mxu2 %v302_v16  ;;  %v305_v15 = vld [vmem:[%s6665_s3 + $0x790] sm:$0xff]  ;;  %v255_v16 = vld [vmem:[%s6665_s3 + $0x600] sm:$0xff] }
  0x68   :  { %1299 = vmatpush.msra.mxu1 %v207_v17  ;;  %1339 = vmatpush.msra.mxu3 %v239_v18  ;;  %v272_v17 = vld [vmem:[%s6665_s3 + $0x688] sm:$0xff]  ;;  %v287_v18 = vld [vmem:[%s6665_s3 + $0x700] sm:$0xff] }
  0x69   :  { %1300 = vmatmul.f32.vlgmr.msra.gmra.mxu1 %v3898_v33  ;;  %1340 = vmatmul.f32.vlgmr.msra.gmra.mxu3 %v3900_v34  ;;  %v4091_v33 = vld.sshfl [vmem:[#allocation1 + $0x38] sm:$0xff pattern:$0x73625140]  ;;  %v299_v34 = vld [vmem:[%s6665_s3 + $0x760] sm:$0xff] }
  0x6a   :  { %1345 = vmatpush.msrb.mxu0 %v269_v19  ;;  %1364 = vmatpush.msrb.mxu1 %v286_v20  ;;  %999 = vst [vmem:[#allocation1 + $0x20] ss:$4 sm:$0xff] %v54_v32  ;;  %v304_v19 = vld [vmem:[%s6665_s3 + $0x788] sm:$0xff]  ;;  %v334_v20 = vld [vmem:[%s6665_s3 + $0x878] sm:$0xff]  ;;  %v331_v32 = vld [vmem:[%s6665_s3 + $0x860] sm:$0xff] }
  0x6b   :  { %1385 = vmatpush.msrb.mxu2 %v301_v21  ;;  %1404 = vmatpush.msrb.mxu3 %v318_v22  ;;  %v366_v21 = vld [vmem:[%s6665_s3 + $0x978] sm:$0xff]  ;;  %v271_v22 = vld [vmem:[%s6665_s3 + $0x680] sm:$0xff] }
  0x6c   :  { %1346 = vmatpush.msrb.mxu0 %v268_v23  ;;  %1365 = vmatpush.msrb.mxu1 %v285_v24  ;;  %v303_v23 = vld [vmem:[%s6665_s3 + $0x780] sm:$0xff]  ;;  %v333_v24 = vld [vmem:[%s6665_s3 + $0x870] sm:$0xff] }
  0x6d   :  { %1386 = vmatpush.msrb.mxu2 %v300_v25  ;;  %1405 = vmatpush.msrb.mxu3 %v317_v26  ;;  %v350_v25 = vld [vmem:[%s6665_s3 + $0x8f8] sm:$0xff]  ;;  %v365_v26 = vld [vmem:[%s6665_s3 + $0x970] sm:$0xff] }
  0x6e   :  { %1347 = vmatpush.msrb.mxu0 %v267_v27  ;;  %1366 = vmatpush.msrb.mxu1 %v284_v31  ;;  %v382_v27 = vld [vmem:[%s6665_s3 + $0x9f8] sm:$0xff]  ;;  %v364_v31 = vld [vmem:[%s6665_s3 + $0x968] sm:$0xff] }
  0x6f   :  { %1387 = vmatpush.msrb.mxu2 %v299_v34  ;;  %1406 = vmatpush.msrb.mxu3 %v316_v35  ;;  %v363_v34 = vld [vmem:[%s6665_s3 + $0x960] sm:$0xff]  ;;  %v380_v35 = vld [vmem:[%s6665_s3 + $0x9e8] sm:$0xff] }
  0x70   :  { %1348 = vmatpush.msrb.mxu0 %v266_v36  ;;  %1367 = vmatpush.msrb.mxu1 %v283_v37  ;;  %v330_v36 = vld [vmem:[%s6665_s3 + $0x858] sm:$0xff]  ;;  %v347_v37 = vld [vmem:[%s6665_s3 + $0x8e0] sm:$0xff] }
  0x71   :  { %1388 = vmatpush.msrb.mxu2 %v298_v38  ;;  %1407 = vmatpush.msrb.mxu3 %v315_v39  ;;  %v362_v38 = vld [vmem:[%s6665_s3 + $0x958] sm:$0xff]  ;;  %v379_v39 = vld [vmem:[%s6665_s3 + $0x9e0] sm:$0xff] }
  0x72   :  { %1349 = vmatpush.msrb.mxu0 %v265_v40  ;;  %1368 = vmatpush.msrb.mxu1 %v282_v41  ;;  %v329_v40 = vld [vmem:[%s6665_s3 + $0x850] sm:$0xff]  ;;  %v346_v41 = vld [vmem:[%s6665_s3 + $0x8d8] sm:$0xff] }
  0x73   :  { %1389 = vmatpush.msrb.mxu2 %v297_v42  ;;  %1408 = vmatpush.msrb.mxu3 %v314_v43  ;;  %v361_v42 = vld [vmem:[%s6665_s3 + $0x950] sm:$0xff]  ;;  %v378_v43 = vld [vmem:[%s6665_s3 + $0x9d8] sm:$0xff] }
  0x74   :  { %1350 = vmatpush.msrb.mxu0 %v264_v44  ;;  %1369 = vmatpush.msrb.mxu1 %v281_v45  ;;  %v328_v44 = vld [vmem:[%s6665_s3 + $0x848] sm:$0xff]  ;;  %v345_v45 = vld [vmem:[%s6665_s3 + $0x8d0] sm:$0xff] }
  0x75   :  { %1390 = vmatpush.msrb.mxu2 %v296_v46  ;;  %1409 = vmatpush.msrb.mxu3 %v313_v47  ;;  %v360_v46 = vld [vmem:[%s6665_s3 + $0x948] sm:$0xff]  ;;  %v377_v47 = vld [vmem:[%s6665_s3 + $0x9d0] sm:$0xff] }
  0x76   :  { %1351 = vmatpush.msrb.mxu0 %v263_v48  ;;  %1370 = vmatpush.msrb.mxu1 %v280_v49  ;;  %v327_v48 = vld [vmem:[%s6665_s3 + $0x840] sm:$0xff]  ;;  %v344_v49 = vld [vmem:[%s6665_s3 + $0x8c8] sm:$0xff] }
  0x77   :  { %1391 = vmatpush.msrb.mxu2 %v295_v50  ;;  %1410 = vmatpush.msrb.mxu3 %v312_v51  ;;  %v359_v50 = vld [vmem:[%s6665_s3 + $0x940] sm:$0xff]  ;;  %v376_v51 = vld [vmem:[%s6665_s3 + $0x9c8] sm:$0xff] }
  0x78   :  { %1352 = vmatpush.msrb.mxu0 %v262_v52  ;;  %1371 = vmatpush.msrb.mxu1 %v279_v53  ;;  %v326_v52 = vld [vmem:[%s6665_s3 + $0x838] sm:$0xff]  ;;  %v343_v53 = vld [vmem:[%s6665_s3 + $0x8c0] sm:$0xff] }
  0x79   :  { %1392 = vmatpush.msrb.mxu2 %v294_v54  ;;  %1411 = vmatpush.msrb.mxu3 %v311_v55  ;;  %v358_v54 = vld [vmem:[%s6665_s3 + $0x938] sm:$0xff]  ;;  %v375_v55 = vld [vmem:[%s6665_s3 + $0x9c0] sm:$0xff] }
  0x7a   :  { %1353 = vmatpush.msrb.mxu0 %v261_v56  ;;  %1372 = vmatpush.msrb.mxu1 %v278_v57  ;;  %v325_v56 = vld [vmem:[%s6665_s3 + $0x830] sm:$0xff]  ;;  %v342_v57 = vld [vmem:[%s6665_s3 + $0x8b8] sm:$0xff] }
  0x7b   :  { %1393 = vmatpush.msrb.mxu2 %v293_v58  ;;  %1412 = vmatpush.msrb.mxu3 %v310_v59  ;;  %v357_v58 = vld [vmem:[%s6665_s3 + $0x930] sm:$0xff]  ;;  %v374_v59 = vld [vmem:[%s6665_s3 + $0x9b8] sm:$0xff] }
  0x7c   :  { %1354 = vmatpush.msrb.mxu0 %v260_v60  ;;  %1373 = vmatpush.msrb.mxu1 %v277_v61  ;;  %v324_v60 = vld [vmem:[%s6665_s3 + $0x828] sm:$0xff]  ;;  %v341_v61 = vld [vmem:[%s6665_s3 + $0x8b0] sm:$0xff] }
  0x7d   :  { %1394 = vmatpush.msrb.mxu2 %v292_v62  ;;  %1413 = vmatpush.msrb.mxu3 %v309_v63  ;;  %v356_v62 = vld [vmem:[%s6665_s3 + $0x928] sm:$0xff]  ;;  %v373_v63 = vld [vmem:[%s6665_s3 + $0x9b0] sm:$0xff] }
  0x7e   :  { %1355 = vmatpush.msrb.mxu0 %v259_v0  ;;  %1374 = vmatpush.msrb.mxu1 %v276_v1  ;;  %v323_v0 = vld [vmem:[%s6665_s3 + $0x820] sm:$0xff]  ;;  %v340_v1 = vld [vmem:[%s6665_s3 + $0x8a8] sm:$0xff] }
  0x7f   :  { %1395 = vmatpush.msrb.mxu2 %v291_v2  ;;  %1414 = vmatpush.msrb.mxu3 %v308_v3  ;;  %v355_v2 = vld [vmem:[%s6665_s3 + $0x920] sm:$0xff]  ;;  %v372_v3 = vld [vmem:[%s6665_s3 + $0x9a8] sm:$0xff] }
  0x80   :  { %1356 = vmatpush.msrb.mxu0 %v258_v4  ;;  %1375 = vmatpush.msrb.mxu1 %v275_v5  ;;  %v322_v4 = vld [vmem:[%s6665_s3 + $0x818] sm:$0xff]  ;;  %v339_v5 = vld [vmem:[%s6665_s3 + $0x8a0] sm:$0xff] }
  0x81   :  { %1396 = vmatpush.msrb.mxu2 %v290_v6  ;;  %1415 = vmatpush.msrb.mxu3 %v307_v7  ;;  %v354_v6 = vld [vmem:[%s6665_s3 + $0x918] sm:$0xff]  ;;  %v371_v7 = vld [vmem:[%s6665_s3 + $0x9a0] sm:$0xff] }
  0x82   :  { %1357 = vmatpush.msrb.mxu0 %v257_v8  ;;  %1376 = vmatpush.msrb.mxu1 %v274_v9  ;;  %v321_v8 = vld [vmem:[%s6665_s3 + $0x810] sm:$0xff]  ;;  %v338_v9 = vld [vmem:[%s6665_s3 + $0x898] sm:$0xff] }
  0x83   :  { %1397 = vmatpush.msrb.mxu2 %v289_v10  ;;  %1416 = vmatpush.msrb.mxu3 %v306_v11  ;;  %v353_v10 = vld [vmem:[%s6665_s3 + $0x910] sm:$0xff]  ;;  %v370_v11 = vld [vmem:[%s6665_s3 + $0x998] sm:$0xff] }
  0x84   :  { %1358 = vmatpush.msrb.mxu0 %v256_v12  ;;  %1377 = vmatpush.msrb.mxu1 %v273_v13  ;;  %v320_v12 = vld [vmem:[%s6665_s3 + $0x808] sm:$0xff]  ;;  %v337_v13 = vld [vmem:[%s6665_s3 + $0x890] sm:$0xff] }
  0x85   :  { %1398 = vmatpush.msrb.mxu2 %v288_v14  ;;  %1417 = vmatpush.msrb.mxu3 %v305_v15  ;;  %v352_v14 = vld [vmem:[%s6665_s3 + $0x908] sm:$0xff]  ;;  %v369_v15 = vld [vmem:[%s6665_s3 + $0x990] sm:$0xff] }
  0x86   :  { %1359 = vmatpush.msrb.mxu0 %v255_v16  ;;  %1378 = vmatpush.msrb.mxu1 %v272_v17  ;;  %v319_v16 = vld [vmem:[%s6665_s3 + $0x800] sm:$0xff]  ;;  %v336_v17 = vld [vmem:[%s6665_s3 + $0x888] sm:$0xff] }
  0x87   :  { %1399 = vmatpush.msrb.mxu2 %v287_v18  ;;  %1418 = vmatpush.msrb.mxu3 %v304_v19  ;;  %v351_v18 = vld [vmem:[%s6665_s3 + $0x900] sm:$0xff]  ;;  %v368_v19 = vld [vmem:[%s6665_s3 + $0x988] sm:$0xff] }
  0x88   :  { %1360 = vmatmul.f32.vlgmr.msrb.gmra.mxu0 %v4079_v28  ;;  %1400 = vmatmul.f32.vlgmr.msrb.gmra.mxu2 %v4081_v29  ;;  %v332_v28 = vld [vmem:[%s6665_s3 + $0x868] sm:$0xff]  ;;  %v349_v29 = vld [vmem:[%s6665_s3 + $0x8f0] sm:$0xff] }
  0x89   :  { %1424 = vmatpush.msra.mxu0 %v334_v20  ;;  %1464 = vmatpush.msra.mxu2 %v366_v21  ;;  %v1000_v20 = vld.sshfl [vmem:[#allocation1] sm:$0xff pattern:$0x73625140]  ;;  %v1002_v21 = vld.sshfl [vmem:[#allocation1 + $0x10] sm:$0xff pattern:$0x73625140] }
  0x8a   :  { %1379 = vmatpush.msrb.mxu1 %v271_v22  ;;  %1419 = vmatpush.msrb.mxu3 %v303_v23  ;;  %v398_v22 = vld [vmem:[%s6665_s3 + $0xa78] sm:$0xff] }
  0x8b   :  { %1380 = vmatmul.f32.vlgmr.msrb.gmra.mxu1 %v4083_v30  ;;  %1420 = vmatmul.f32.vlgmr.msrb.gmra.mxu3 %v4091_v33  ;;  %v381_v30 = vld [vmem:[%s6665_s3 + $0x9f0] sm:$0xff]  ;;  %v348_v33 = vld [vmem:[%s6665_s3 + $0x8e8] sm:$0xff]  ;;  %v430_v23 = vld [vmem:[%s6665_s3 + $0xb78] sm:$0xff] }
  0x8c   :  { %1425 = vmatpush.msra.mxu0 %v333_v24  ;;  %1444 = vmatpush.msra.mxu1 %v350_v25  ;;  %v335_v24 = vld [vmem:[%s6665_s3 + $0x880] sm:$0xff] }
  0x8d   :  { %1465 = vmatpush.msra.mxu2 %v365_v26  ;;  %1484 = vmatpush.msra.mxu3 %v382_v27  ;;  %v367_v25 = vld [vmem:[%s6665_s3 + $0x980] sm:$0xff]  ;;  %v1001_v26 = vld.sshfl [vmem:[#allocation1 + $0x8] sm:$0xff pattern:$0x73625140] }
  0x8e   :  { %1426 = vmatpush.msra.mxu0 %v332_v28  ;;  %1445 = vmatpush.msra.mxu1 %v349_v29  ;;  %v1003_v27 = vld.sshfl [vmem:[#allocation1 + $0x18] sm:$0xff pattern:$0x73625140]  ;;  %v397_v28 = vld [vmem:[%s6665_s3 + $0xa70] sm:$0xff] }
  0x8f   :  { %1466 = vmatpush.msra.mxu2 %v364_v31  ;;  %1485 = vmatpush.msra.mxu3 %v381_v30  ;;  %v414_v29 = vld [vmem:[%s6665_s3 + $0xaf8] sm:$0xff]  ;;  %v429_v31 = vld [vmem:[%s6665_s3 + $0xb70] sm:$0xff] }
  0x90   :  { %1427 = vmatpush.msra.mxu0 %v331_v32  ;;  %1446 = vmatpush.msra.mxu1 %v348_v33  ;;  %v446_v30 = vld [vmem:[%s6665_s3 + $0xbf8] sm:$0xff]  ;;  %v396_v32 = vld [vmem:[%s6665_s3 + $0xa68] sm:$0xff]  ;;  %v413_v33 = vld [vmem:[%s6665_s3 + $0xaf0] sm:$0xff] }
  0x91   :  { %1467 = vmatpush.msra.mxu2 %v363_v34  ;;  %1486 = vmatpush.msra.mxu3 %v380_v35  ;;  %v428_v34 = vld [vmem:[%s6665_s3 + $0xb68] sm:$0xff]  ;;  %v445_v35 = vld [vmem:[%s6665_s3 + $0xbf0] sm:$0xff] }
  0x92   :  { %1428 = vmatpush.msra.mxu0 %v330_v36  ;;  %1447 = vmatpush.msra.mxu1 %v347_v37  ;;  %v395_v36 = vld [vmem:[%s6665_s3 + $0xa60] sm:$0xff]  ;;  %v412_v37 = vld [vmem:[%s6665_s3 + $0xae8] sm:$0xff] }
  0x93   :  { %1468 = vmatpush.msra.mxu2 %v362_v38  ;;  %1487 = vmatpush.msra.mxu3 %v379_v39  ;;  %v427_v38 = vld [vmem:[%s6665_s3 + $0xb60] sm:$0xff]  ;;  %v444_v39 = vld [vmem:[%s6665_s3 + $0xbe8] sm:$0xff] }
  0x94   :  { %1429 = vmatpush.msra.mxu0 %v329_v40  ;;  %1448 = vmatpush.msra.mxu1 %v346_v41  ;;  %v394_v40 = vld [vmem:[%s6665_s3 + $0xa58] sm:$0xff]  ;;  %v411_v41 = vld [vmem:[%s6665_s3 + $0xae0] sm:$0xff] }
  0x95   :  { %1469 = vmatpush.msra.mxu2 %v361_v42  ;;  %1488 = vmatpush.msra.mxu3 %v378_v43  ;;  %v426_v42 = vld [vmem:[%s6665_s3 + $0xb58] sm:$0xff]  ;;  %v443_v43 = vld [vmem:[%s6665_s3 + $0xbe0] sm:$0xff] }
  0x96   :  { %1430 = vmatpush.msra.mxu0 %v328_v44  ;;  %1449 = vmatpush.msra.mxu1 %v345_v45  ;;  %v393_v44 = vld [vmem:[%s6665_s3 + $0xa50] sm:$0xff]  ;;  %v410_v45 = vld [vmem:[%s6665_s3 + $0xad8] sm:$0xff] }
  0x97   :  { %1470 = vmatpush.msra.mxu2 %v360_v46  ;;  %1489 = vmatpush.msra.mxu3 %v377_v47  ;;  %v425_v46 = vld [vmem:[%s6665_s3 + $0xb50] sm:$0xff]  ;;  %v442_v47 = vld [vmem:[%s6665_s3 + $0xbd8] sm:$0xff] }
  0x98   :  { %1431 = vmatpush.msra.mxu0 %v327_v48  ;;  %1450 = vmatpush.msra.mxu1 %v344_v49  ;;  %v392_v48 = vld [vmem:[%s6665_s3 + $0xa48] sm:$0xff]  ;;  %v409_v49 = vld [vmem:[%s6665_s3 + $0xad0] sm:$0xff] }
  0x99   :  { %1471 = vmatpush.msra.mxu2 %v359_v50  ;;  %1490 = vmatpush.msra.mxu3 %v376_v51  ;;  %v424_v50 = vld [vmem:[%s6665_s3 + $0xb48] sm:$0xff]  ;;  %v441_v51 = vld [vmem:[%s6665_s3 + $0xbd0] sm:$0xff] }
  0x9a   :  { %1432 = vmatpush.msra.mxu0 %v326_v52  ;;  %1451 = vmatpush.msra.mxu1 %v343_v53  ;;  %v391_v52 = vld [vmem:[%s6665_s3 + $0xa40] sm:$0xff]  ;;  %v408_v53 = vld [vmem:[%s6665_s3 + $0xac8] sm:$0xff] }
  0x9b   :  { %1472 = vmatpush.msra.mxu2 %v358_v54  ;;  %1491 = vmatpush.msra.mxu3 %v375_v55  ;;  %v423_v54 = vld [vmem:[%s6665_s3 + $0xb40] sm:$0xff]  ;;  %v440_v55 = vld [vmem:[%s6665_s3 + $0xbc8] sm:$0xff] }
  0x9c   :  { %1433 = vmatpush.msra.mxu0 %v325_v56  ;;  %1452 = vmatpush.msra.mxu1 %v342_v57  ;;  %v390_v56 = vld [vmem:[%s6665_s3 + $0xa38] sm:$0xff]  ;;  %v407_v57 = vld [vmem:[%s6665_s3 + $0xac0] sm:$0xff] }
  0x9d   :  { %1473 = vmatpush.msra.mxu2 %v357_v58  ;;  %1492 = vmatpush.msra.mxu3 %v374_v59  ;;  %v422_v58 = vld [vmem:[%s6665_s3 + $0xb38] sm:$0xff]  ;;  %v439_v59 = vld [vmem:[%s6665_s3 + $0xbc0] sm:$0xff] }
  0x9e   :  { %1434 = vmatpush.msra.mxu0 %v324_v60  ;;  %1453 = vmatpush.msra.mxu1 %v341_v61  ;;  %v389_v60 = vld [vmem:[%s6665_s3 + $0xa30] sm:$0xff]  ;;  %v406_v61 = vld [vmem:[%s6665_s3 + $0xab8] sm:$0xff] }
  0x9f   :  { %1474 = vmatpush.msra.mxu2 %v356_v62  ;;  %1493 = vmatpush.msra.mxu3 %v373_v63  ;;  %v421_v62 = vld [vmem:[%s6665_s3 + $0xb30] sm:$0xff]  ;;  %v438_v63 = vld [vmem:[%s6665_s3 + $0xbb8] sm:$0xff] }
  0xa0   :  { %1435 = vmatpush.msra.mxu0 %v323_v0  ;;  %1454 = vmatpush.msra.mxu1 %v340_v1  ;;  %v388_v0 = vld [vmem:[%s6665_s3 + $0xa28] sm:$0xff]  ;;  %v405_v1 = vld [vmem:[%s6665_s3 + $0xab0] sm:$0xff] }
  0xa1   :  { %1475 = vmatpush.msra.mxu2 %v355_v2  ;;  %1494 = vmatpush.msra.mxu3 %v372_v3  ;;  %v420_v2 = vld [vmem:[%s6665_s3 + $0xb28] sm:$0xff]  ;;  %v437_v3 = vld [vmem:[%s6665_s3 + $0xbb0] sm:$0xff] }
  0xa2   :  { %1436 = vmatpush.msra.mxu0 %v322_v4  ;;  %1455 = vmatpush.msra.mxu1 %v339_v5  ;;  %v387_v4 = vld [vmem:[%s6665_s3 + $0xa20] sm:$0xff]  ;;  %v404_v5 = vld [vmem:[%s6665_s3 + $0xaa8] sm:$0xff] }
  0xa3   :  { %1476 = vmatpush.msra.mxu2 %v354_v6  ;;  %1495 = vmatpush.msra.mxu3 %v371_v7  ;;  %v419_v6 = vld [vmem:[%s6665_s3 + $0xb20] sm:$0xff]  ;;  %v436_v7 = vld [vmem:[%s6665_s3 + $0xba8] sm:$0xff] }
  0xa4   :  { %1437 = vmatpush.msra.mxu0 %v321_v8  ;;  %1456 = vmatpush.msra.mxu1 %v338_v9  ;;  %v386_v8 = vld [vmem:[%s6665_s3 + $0xa18] sm:$0xff]  ;;  %v403_v9 = vld [vmem:[%s6665_s3 + $0xaa0] sm:$0xff] }
  0xa5   :  { %1477 = vmatpush.msra.mxu2 %v353_v10  ;;  %1496 = vmatpush.msra.mxu3 %v370_v11  ;;  %v418_v10 = vld [vmem:[%s6665_s3 + $0xb18] sm:$0xff]  ;;  %v435_v11 = vld [vmem:[%s6665_s3 + $0xba0] sm:$0xff] }
  0xa6   :  { %1438 = vmatpush.msra.mxu0 %v320_v12  ;;  %1457 = vmatpush.msra.mxu1 %v337_v13  ;;  %v385_v12 = vld [vmem:[%s6665_s3 + $0xa10] sm:$0xff]  ;;  %v402_v13 = vld [vmem:[%s6665_s3 + $0xa98] sm:$0xff] }
  0xa7   :  { %1478 = vmatpush.msra.mxu2 %v352_v14  ;;  %1497 = vmatpush.msra.mxu3 %v369_v15  ;;  %v417_v14 = vld [vmem:[%s6665_s3 + $0xb10] sm:$0xff]  ;;  %v434_v15 = vld [vmem:[%s6665_s3 + $0xb98] sm:$0xff] }
  0xa8   :  { %1439 = vmatpush.msra.mxu0 %v319_v16  ;;  %1458 = vmatpush.msra.mxu1 %v336_v17  ;;  %v384_v16 = vld [vmem:[%s6665_s3 + $0xa08] sm:$0xff]  ;;  %v401_v17 = vld [vmem:[%s6665_s3 + $0xa90] sm:$0xff] }
  0xa9   :  { %1479 = vmatpush.msra.mxu2 %v351_v18  ;;  %1498 = vmatpush.msra.mxu3 %v368_v19  ;;  %v55_v18 = vld [vmem:[%s6666_s0 + $0x30] sm:$0xff]  ;;  %v416_v19 = vld [vmem:[%s6665_s3 + $0xb08] sm:$0xff] }
  0xaa   :  { %1440 = vmatmul.f32.vlgmr.msra.gmra.mxu0 %v1000_v20  ;;  %1480 = vmatmul.f32.vlgmr.msra.gmra.mxu2 %v1002_v21  ;;  %v433_v20 = vld [vmem:[%s6665_s3 + $0xb90] sm:$0xff]  ;;  %1008 = vst [vmem:[#allocation1] ss:$4 sm:$0xff] %v55_v18  ;;  %v383_v21 = vld [vmem:[%s6665_s3 + $0xa00] sm:$0xff]  ;;  %v466_v18 = vld [vmem:[%s6665_s3 + $0xc98] sm:$0xff] }
  0xab   :  { %1504 = vmatpush.msrb.mxu0 %v398_v22  ;;  %1544 = vmatpush.msrb.mxu2 %v430_v23  ;;  %v400_v22 = vld [vmem:[%s6665_s3 + $0xa88] sm:$0xff]  ;;  %v415_v23 = vld [vmem:[%s6665_s3 + $0xb00] sm:$0xff] }
  0xac   :  { %1459 = vmatpush.msra.mxu1 %v335_v24  ;;  %1499 = vmatpush.msra.mxu3 %v367_v25  ;;  %v432_v24 = vld [vmem:[%s6665_s3 + $0xb88] sm:$0xff]  ;;  %v1004_v25 = vld.sshfl [vmem:[#allocation1 + $0x20] sm:$0xff pattern:$0x73625140] }
  0xad   :  { %1460 = vmatmul.f32.vlgmr.msra.gmra.mxu1 %v1001_v26  ;;  %1500 = vmatmul.f32.vlgmr.msra.gmra.mxu3 %v1003_v27  ;;  %v1006_v26 = vld.sshfl [vmem:[#allocation1 + $0x30] sm:$0xff pattern:$0x73625140]  ;;  %v462_v27 = vld [vmem:[%s6665_s3 + $0xc78] sm:$0xff] }
  0xae   :  { %1505 = vmatpush.msrb.mxu0 %v397_v28  ;;  %1524 = vmatpush.msrb.mxu1 %v414_v29  ;;  %v494_v28 = vld [vmem:[%s6665_s3 + $0xd78] sm:$0xff]  ;;  %v399_v29 = vld [vmem:[%s6665_s3 + $0xa80] sm:$0xff] }
  0xaf   :  { %1545 = vmatpush.msrb.mxu2 %v429_v31  ;;  %1564 = vmatpush.msrb.mxu3 %v446_v30  ;;  %v431_v31 = vld [vmem:[%s6665_s3 + $0xb80] sm:$0xff]  ;;  %v1005_v30 = vld.sshfl [vmem:[#allocation1 + $0x28] sm:$0xff pattern:$0x73625140] }
  0xb0   :  { %1506 = vmatpush.msrb.mxu0 %v396_v32  ;;  %1525 = vmatpush.msrb.mxu1 %v413_v33  ;;  %v1007_v32 = vld.sshfl [vmem:[#allocation1 + $0x38] sm:$0xff pattern:$0x73625140]  ;;  %v461_v33 = vld [vmem:[%s6665_s3 + $0xc70] sm:$0xff] }
  0xb1   :  { %1546 = vmatpush.msrb.mxu2 %v428_v34  ;;  %1565 = vmatpush.msrb.mxu3 %v445_v35  ;;  %v478_v34 = vld [vmem:[%s6665_s3 + $0xcf8] sm:$0xff]  ;;  %v493_v35 = vld [vmem:[%s6665_s3 + $0xd70] sm:$0xff] }
  0xb2   :  { %1507 = vmatpush.msrb.mxu0 %v395_v36  ;;  %1526 = vmatpush.msrb.mxu1 %v412_v37  ;;  %v510_v36 = vld [vmem:[%s6665_s3 + $0xdf8] sm:$0xff]  ;;  %v460_v37 = vld [vmem:[%s6665_s3 + $0xc68] sm:$0xff] }
  0xb3   :  { %1547 = vmatpush.msrb.mxu2 %v427_v38  ;;  %1566 = vmatpush.msrb.mxu3 %v444_v39  ;;  %v477_v38 = vld [vmem:[%s6665_s3 + $0xcf0] sm:$0xff]  ;;  %v492_v39 = vld [vmem:[%s6665_s3 + $0xd68] sm:$0xff] }
  0xb4   :  { %1508 = vmatpush.msrb.mxu0 %v394_v40  ;;  %1527 = vmatpush.msrb.mxu1 %v411_v41  ;;  %v509_v40 = vld [vmem:[%s6665_s3 + $0xdf0] sm:$0xff]  ;;  %v459_v41 = vld [vmem:[%s6665_s3 + $0xc60] sm:$0xff] }
  0xb5   :  { %1548 = vmatpush.msrb.mxu2 %v426_v42  ;;  %1567 = vmatpush.msrb.mxu3 %v443_v43  ;;  %v476_v42 = vld [vmem:[%s6665_s3 + $0xce8] sm:$0xff]  ;;  %v491_v43 = vld [vmem:[%s6665_s3 + $0xd60] sm:$0xff] }
  0xb6   :  { %1509 = vmatpush.msrb.mxu0 %v393_v44  ;;  %1528 = vmatpush.msrb.mxu1 %v410_v45  ;;  %v508_v44 = vld [vmem:[%s6665_s3 + $0xde8] sm:$0xff]  ;;  %v458_v45 = vld [vmem:[%s6665_s3 + $0xc58] sm:$0xff] }
  0xb7   :  { %1549 = vmatpush.msrb.mxu2 %v425_v46  ;;  %1568 = vmatpush.msrb.mxu3 %v442_v47  ;;  %v475_v46 = vld [vmem:[%s6665_s3 + $0xce0] sm:$0xff]  ;;  %v490_v47 = vld [vmem:[%s6665_s3 + $0xd58] sm:$0xff] }
  0xb8   :  { %1510 = vmatpush.msrb.mxu0 %v392_v48  ;;  %1529 = vmatpush.msrb.mxu1 %v409_v49  ;;  %v507_v48 = vld [vmem:[%s6665_s3 + $0xde0] sm:$0xff]  ;;  %v457_v49 = vld [vmem:[%s6665_s3 + $0xc50] sm:$0xff] }
  0xb9   :  { %1550 = vmatpush.msrb.mxu2 %v424_v50  ;;  %1569 = vmatpush.msrb.mxu3 %v441_v51  ;;  %v474_v50 = vld [vmem:[%s6665_s3 + $0xcd8] sm:$0xff]  ;;  %v489_v51 = vld [vmem:[%s6665_s3 + $0xd50] sm:$0xff] }
  0xba   :  { %1511 = vmatpush.msrb.mxu0 %v391_v52  ;;  %1530 = vmatpush.msrb.mxu1 %v408_v53  ;;  %v506_v52 = vld [vmem:[%s6665_s3 + $0xdd8] sm:$0xff]  ;;  %v456_v53 = vld [vmem:[%s6665_s3 + $0xc48] sm:$0xff] }
  0xbb   :  { %1551 = vmatpush.msrb.mxu2 %v423_v54  ;;  %1570 = vmatpush.msrb.mxu3 %v440_v55  ;;  %v473_v54 = vld [vmem:[%s6665_s3 + $0xcd0] sm:$0xff]  ;;  %v488_v55 = vld [vmem:[%s6665_s3 + $0xd48] sm:$0xff] }
  0xbc   :  { %1512 = vmatpush.msrb.mxu0 %v390_v56  ;;  %1531 = vmatpush.msrb.mxu1 %v407_v57  ;;  %v505_v56 = vld [vmem:[%s6665_s3 + $0xdd0] sm:$0xff]  ;;  %v455_v57 = vld [vmem:[%s6665_s3 + $0xc40] sm:$0xff] }
  0xbd   :  { %1552 = vmatpush.msrb.mxu2 %v422_v58  ;;  %1571 = vmatpush.msrb.mxu3 %v439_v59  ;;  %v472_v58 = vld [vmem:[%s6665_s3 + $0xcc8] sm:$0xff]  ;;  %v487_v59 = vld [vmem:[%s6665_s3 + $0xd40] sm:$0xff] }
  0xbe   :  { %1513 = vmatpush.msrb.mxu0 %v389_v60  ;;  %1532 = vmatpush.msrb.mxu1 %v406_v61  ;;  %v504_v60 = vld [vmem:[%s6665_s3 + $0xdc8] sm:$0xff]  ;;  %v454_v61 = vld [vmem:[%s6665_s3 + $0xc38] sm:$0xff] }
  0xbf   :  { %1553 = vmatpush.msrb.mxu2 %v421_v62  ;;  %1572 = vmatpush.msrb.mxu3 %v438_v63  ;;  %v471_v62 = vld [vmem:[%s6665_s3 + $0xcc0] sm:$0xff]  ;;  %v486_v63 = vld [vmem:[%s6665_s3 + $0xd38] sm:$0xff] }
  0xc0   :  { %1514 = vmatpush.msrb.mxu0 %v388_v0  ;;  %1533 = vmatpush.msrb.mxu1 %v405_v1  ;;  %v503_v0 = vld [vmem:[%s6665_s3 + $0xdc0] sm:$0xff]  ;;  %v453_v1 = vld [vmem:[%s6665_s3 + $0xc30] sm:$0xff] }
  0xc1   :  { %1554 = vmatpush.msrb.mxu2 %v420_v2  ;;  %1573 = vmatpush.msrb.mxu3 %v437_v3  ;;  %v470_v2 = vld [vmem:[%s6665_s3 + $0xcb8] sm:$0xff]  ;;  %v485_v3 = vld [vmem:[%s6665_s3 + $0xd30] sm:$0xff] }
  0xc2   :  { %1515 = vmatpush.msrb.mxu0 %v387_v4  ;;  %1534 = vmatpush.msrb.mxu1 %v404_v5  ;;  %v502_v4 = vld [vmem:[%s6665_s3 + $0xdb8] sm:$0xff]  ;;  %v452_v5 = vld [vmem:[%s6665_s3 + $0xc28] sm:$0xff] }
  0xc3   :  { %1555 = vmatpush.msrb.mxu2 %v419_v6  ;;  %1574 = vmatpush.msrb.mxu3 %v436_v7  ;;  %v469_v6 = vld [vmem:[%s6665_s3 + $0xcb0] sm:$0xff]  ;;  %v484_v7 = vld [vmem:[%s6665_s3 + $0xd28] sm:$0xff] }
  0xc4   :  { %1516 = vmatpush.msrb.mxu0 %v386_v8  ;;  %1535 = vmatpush.msrb.mxu1 %v403_v9  ;;  %v501_v8 = vld [vmem:[%s6665_s3 + $0xdb0] sm:$0xff]  ;;  %v451_v9 = vld [vmem:[%s6665_s3 + $0xc20] sm:$0xff] }
  0xc5   :  { %1556 = vmatpush.msrb.mxu2 %v418_v10  ;;  %1575 = vmatpush.msrb.mxu3 %v435_v11  ;;  %v468_v10 = vld [vmem:[%s6665_s3 + $0xca8] sm:$0xff]  ;;  %v483_v11 = vld [vmem:[%s6665_s3 + $0xd20] sm:$0xff] }
  0xc6   :  { %1517 = vmatpush.msrb.mxu0 %v385_v12  ;;  %1536 = vmatpush.msrb.mxu1 %v402_v13  ;;  %v500_v12 = vld [vmem:[%s6665_s3 + $0xda8] sm:$0xff]  ;;  %v450_v13 = vld [vmem:[%s6665_s3 + $0xc18] sm:$0xff] }
  0xc7   :  { %1557 = vmatpush.msrb.mxu2 %v417_v14  ;;  %1576 = vmatpush.msrb.mxu3 %v434_v15  ;;  %v467_v14 = vld [vmem:[%s6665_s3 + $0xca0] sm:$0xff]  ;;  %v482_v15 = vld [vmem:[%s6665_s3 + $0xd18] sm:$0xff] }
  0xc8   :  { %1518 = vmatpush.msrb.mxu0 %v384_v16  ;;  %1537 = vmatpush.msrb.mxu1 %v401_v17  ;;  %v499_v16 = vld [vmem:[%s6665_s3 + $0xda0] sm:$0xff]  ;;  %v449_v17 = vld [vmem:[%s6665_s3 + $0xc10] sm:$0xff] }
  0xc9   :  { %1558 = vmatpush.msrb.mxu2 %v416_v19  ;;  %1577 = vmatpush.msrb.mxu3 %v433_v20  ;;  %v481_v19 = vld [vmem:[%s6665_s3 + $0xd10] sm:$0xff]  ;;  %v498_v20 = vld [vmem:[%s6665_s3 + $0xd98] sm:$0xff] }
  0xca   :  { %1519 = vmatpush.msrb.mxu0 %v383_v21  ;;  %1538 = vmatpush.msrb.mxu1 %v400_v22  ;;  %v448_v21 = vld [vmem:[%s6665_s3 + $0xc08] sm:$0xff]  ;;  %v465_v22 = vld [vmem:[%s6665_s3 + $0xc90] sm:$0xff] }
  0xcb   :  { %1559 = vmatpush.msrb.mxu2 %v415_v23  ;;  %1578 = vmatpush.msrb.mxu3 %v432_v24  ;;  %v56_v23 = vld [vmem:[%s6666_s0 + $0x38] sm:$0xff]  ;;  %v480_v24 = vld [vmem:[%s6665_s3 + $0xd08] sm:$0xff] }
  0xcc   :  { %1520 = vmatmul.f32.vlgmr.msrb.gmra.mxu0 %v1004_v25  ;;  %1560 = vmatmul.f32.vlgmr.msrb.gmra.mxu2 %v1006_v26  ;;  %v497_v25 = vld [vmem:[%s6665_s3 + $0xd90] sm:$0xff]  ;;  %1009 = vst [vmem:[#allocation1 + $0x20] ss:$4 sm:$0xff] %v56_v23  ;;  %v447_v26 = vld [vmem:[%s6665_s3 + $0xc00] sm:$0xff]  ;;  %v530_v23 = vld [vmem:[%s6665_s3 + $0xe98] sm:$0xff] }
  0xcd   :  { %1584 = vmatpush.msra.mxu0 %v462_v27  ;;  %1624 = vmatpush.msra.mxu2 %v494_v28  ;;  %v464_v27 = vld [vmem:[%s6665_s3 + $0xc88] sm:$0xff]  ;;  %v479_v28 = vld [vmem:[%s6665_s3 + $0xd00] sm:$0xff] }
  0xce   :  { %1539 = vmatpush.msrb.mxu1 %v399_v29  ;;  %1579 = vmatpush.msrb.mxu3 %v431_v31  ;;  %v496_v29 = vld [vmem:[%s6665_s3 + $0xd88] sm:$0xff]  ;;  %v1010_v31 = vld.sshfl [vmem:[#allocation1] sm:$0xff pattern:$0x73625140] }
  0xcf   :  { %1540 = vmatmul.f32.vlgmr.msrb.gmra.mxu1 %v1005_v30  ;;  %1580 = vmatmul.f32.vlgmr.msrb.gmra.mxu3 %v1007_v32  ;;  %v1012_v30 = vld.sshfl [vmem:[#allocation1 + $0x10] sm:$0xff pattern:$0x73625140]  ;;  %v526_v32 = vld [vmem:[%s6665_s3 + $0xe78] sm:$0xff] }
  0xd0   :  { %1585 = vmatpush.msra.mxu0 %v461_v33  ;;  %1604 = vmatpush.msra.mxu1 %v478_v34  ;;  %v558_v33 = vld [vmem:[%s6665_s3 + $0xf78] sm:$0xff]  ;;  %v463_v34 = vld [vmem:[%s6665_s3 + $0xc80] sm:$0xff] }
  0xd1   :  { %1625 = vmatpush.msra.mxu2 %v493_v35  ;;  %1644 = vmatpush.msra.mxu3 %v510_v36  ;;  %v495_v35 = vld [vmem:[%s6665_s3 + $0xd80] sm:$0xff]  ;;  %v1011_v36 = vld.sshfl [vmem:[#allocation1 + $0x8] sm:$0xff pattern:$0x73625140] }
  0xd2   :  { %1586 = vmatpush.msra.mxu0 %v460_v37  ;;  %1605 = vmatpush.msra.mxu1 %v477_v38  ;;  %v1013_v37 = vld.sshfl [vmem:[#allocation1 + $0x18] sm:$0xff pattern:$0x73625140]  ;;  %v525_v38 = vld [vmem:[%s6665_s3 + $0xe70] sm:$0xff] }
  0xd3   :  { %1626 = vmatpush.msra.mxu2 %v492_v39  ;;  %1645 = vmatpush.msra.mxu3 %v509_v40  ;;  %v542_v39 = vld [vmem:[%s6665_s3 + $0xef8] sm:$0xff]  ;;  %v557_v40 = vld [vmem:[%s6665_s3 + $0xf70] sm:$0xff] }
  0xd4   :  { %1587 = vmatpush.msra.mxu0 %v459_v41  ;;  %1606 = vmatpush.msra.mxu1 %v476_v42  ;;  %v574_v41 = vld [vmem:[%s6665_s3 + $0xff8] sm:$0xff]  ;;  %v524_v42 = vld [vmem:[%s6665_s3 + $0xe68] sm:$0xff] }
  0xd5   :  { %1627 = vmatpush.msra.mxu2 %v491_v43  ;;  %1646 = vmatpush.msra.mxu3 %v508_v44  ;;  %v541_v43 = vld [vmem:[%s6665_s3 + $0xef0] sm:$0xff]  ;;  %v556_v44 = vld [vmem:[%s6665_s3 + $0xf68] sm:$0xff] }
  0xd6   :  { %1588 = vmatpush.msra.mxu0 %v458_v45  ;;  %1607 = vmatpush.msra.mxu1 %v475_v46  ;;  %v573_v45 = vld [vmem:[%s6665_s3 + $0xff0] sm:$0xff]  ;;  %v523_v46 = vld [vmem:[%s6665_s3 + $0xe60] sm:$0xff] }
  0xd7   :  { %1628 = vmatpush.msra.mxu2 %v490_v47  ;;  %1647 = vmatpush.msra.mxu3 %v507_v48  ;;  %v540_v47 = vld [vmem:[%s6665_s3 + $0xee8] sm:$0xff]  ;;  %v555_v48 = vld [vmem:[%s6665_s3 + $0xf60] sm:$0xff] }
  0xd8   :  { %1589 = vmatpush.msra.mxu0 %v457_v49  ;;  %1608 = vmatpush.msra.mxu1 %v474_v50  ;;  %v572_v49 = vld [vmem:[%s6665_s3 + $0xfe8] sm:$0xff]  ;;  %v522_v50 = vld [vmem:[%s6665_s3 + $0xe58] sm:$0xff] }
  0xd9   :  { %1629 = vmatpush.msra.mxu2 %v489_v51  ;;  %1648 = vmatpush.msra.mxu3 %v506_v52  ;;  %v539_v51 = vld [vmem:[%s6665_s3 + $0xee0] sm:$0xff]  ;;  %v554_v52 = vld [vmem:[%s6665_s3 + $0xf58] sm:$0xff] }
  0xda   :  { %1590 = vmatpush.msra.mxu0 %v456_v53  ;;  %1609 = vmatpush.msra.mxu1 %v473_v54  ;;  %v571_v53 = vld [vmem:[%s6665_s3 + $0xfe0] sm:$0xff]  ;;  %v521_v54 = vld [vmem:[%s6665_s3 + $0xe50] sm:$0xff] }
  0xdb   :  { %1630 = vmatpush.msra.mxu2 %v488_v55  ;;  %1649 = vmatpush.msra.mxu3 %v505_v56  ;;  %v538_v55 = vld [vmem:[%s6665_s3 + $0xed8] sm:$0xff]  ;;  %v553_v56 = vld [vmem:[%s6665_s3 + $0xf50] sm:$0xff] }
  0xdc   :  { %1591 = vmatpush.msra.mxu0 %v455_v57  ;;  %1610 = vmatpush.msra.mxu1 %v472_v58  ;;  %v570_v57 = vld [vmem:[%s6665_s3 + $0xfd8] sm:$0xff]  ;;  %v520_v58 = vld [vmem:[%s6665_s3 + $0xe48] sm:$0xff] }
  0xdd   :  { %1631 = vmatpush.msra.mxu2 %v487_v59  ;;  %1650 = vmatpush.msra.mxu3 %v504_v60  ;;  %v537_v59 = vld [vmem:[%s6665_s3 + $0xed0] sm:$0xff]  ;;  %v552_v60 = vld [vmem:[%s6665_s3 + $0xf48] sm:$0xff] }
  0xde   :  { %1592 = vmatpush.msra.mxu0 %v454_v61  ;;  %1611 = vmatpush.msra.mxu1 %v471_v62  ;;  %v569_v61 = vld [vmem:[%s6665_s3 + $0xfd0] sm:$0xff]  ;;  %v519_v62 = vld [vmem:[%s6665_s3 + $0xe40] sm:$0xff] }
  0xdf   :  { %1632 = vmatpush.msra.mxu2 %v486_v63  ;;  %1651 = vmatpush.msra.mxu3 %v503_v0  ;;  %v536_v63 = vld [vmem:[%s6665_s3 + $0xec8] sm:$0xff]  ;;  %v551_v0 = vld [vmem:[%s6665_s3 + $0xf40] sm:$0xff] }
  0xe0   :  { %1593 = vmatpush.msra.mxu0 %v453_v1  ;;  %1612 = vmatpush.msra.mxu1 %v470_v2  ;;  %v568_v1 = vld [vmem:[%s6665_s3 + $0xfc8] sm:$0xff]  ;;  %v518_v2 = vld [vmem:[%s6665_s3 + $0xe38] sm:$0xff] }
  0xe1   :  { %1633 = vmatpush.msra.mxu2 %v485_v3  ;;  %1652 = vmatpush.msra.mxu3 %v502_v4  ;;  %v535_v3 = vld [vmem:[%s6665_s3 + $0xec0] sm:$0xff]  ;;  %v550_v4 = vld [vmem:[%s6665_s3 + $0xf38] sm:$0xff] }
  0xe2   :  { %1594 = vmatpush.msra.mxu0 %v452_v5  ;;  %1613 = vmatpush.msra.mxu1 %v469_v6  ;;  %v567_v5 = vld [vmem:[%s6665_s3 + $0xfc0] sm:$0xff]  ;;  %v517_v6 = vld [vmem:[%s6665_s3 + $0xe30] sm:$0xff] }
  0xe3   :  { %1634 = vmatpush.msra.mxu2 %v484_v7  ;;  %1653 = vmatpush.msra.mxu3 %v501_v8  ;;  %v534_v7 = vld [vmem:[%s6665_s3 + $0xeb8] sm:$0xff]  ;;  %v549_v8 = vld [vmem:[%s6665_s3 + $0xf30] sm:$0xff] }
  0xe4   :  { %1595 = vmatpush.msra.mxu0 %v451_v9  ;;  %1614 = vmatpush.msra.mxu1 %v468_v10  ;;  %v566_v9 = vld [vmem:[%s6665_s3 + $0xfb8] sm:$0xff]  ;;  %v516_v10 = vld [vmem:[%s6665_s3 + $0xe28] sm:$0xff] }
  0xe5   :  { %1635 = vmatpush.msra.mxu2 %v483_v11  ;;  %1654 = vmatpush.msra.mxu3 %v500_v12  ;;  %v533_v11 = vld [vmem:[%s6665_s3 + $0xeb0] sm:$0xff]  ;;  %v548_v12 = vld [vmem:[%s6665_s3 + $0xf28] sm:$0xff] }
  0xe6   :  { %1596 = vmatpush.msra.mxu0 %v450_v13  ;;  %1615 = vmatpush.msra.mxu1 %v467_v14  ;;  %v565_v13 = vld [vmem:[%s6665_s3 + $0xfb0] sm:$0xff]  ;;  %v515_v14 = vld [vmem:[%s6665_s3 + $0xe20] sm:$0xff] }
  0xe7   :  { %1636 = vmatpush.msra.mxu2 %v482_v15  ;;  %1655 = vmatpush.msra.mxu3 %v499_v16  ;;  %v532_v15 = vld [vmem:[%s6665_s3 + $0xea8] sm:$0xff]  ;;  %v547_v16 = vld [vmem:[%s6665_s3 + $0xf20] sm:$0xff] }
  0xe8   :  { %1597 = vmatpush.msra.mxu0 %v449_v17  ;;  %1616 = vmatpush.msra.mxu1 %v466_v18  ;;  %v564_v17 = vld [vmem:[%s6665_s3 + $0xfa8] sm:$0xff]  ;;  %v514_v18 = vld [vmem:[%s6665_s3 + $0xe18] sm:$0xff] }
  0xe9   :  { %1637 = vmatpush.msra.mxu2 %v481_v19  ;;  %1656 = vmatpush.msra.mxu3 %v498_v20  ;;  %v531_v19 = vld [vmem:[%s6665_s3 + $0xea0] sm:$0xff]  ;;  %v546_v20 = vld [vmem:[%s6665_s3 + $0xf18] sm:$0xff] }
  0xea   :  { %1598 = vmatpush.msra.mxu0 %v448_v21  ;;  %1617 = vmatpush.msra.mxu1 %v465_v22  ;;  %v563_v21 = vld [vmem:[%s6665_s3 + $0xfa0] sm:$0xff]  ;;  %v513_v22 = vld [vmem:[%s6665_s3 + $0xe10] sm:$0xff] }
  0xeb   :  { %1638 = vmatpush.msra.mxu2 %v480_v24  ;;  %1657 = vmatpush.msra.mxu3 %v497_v25  ;;  %v545_v24 = vld [vmem:[%s6665_s3 + $0xf10] sm:$0xff]  ;;  %v562_v25 = vld [vmem:[%s6665_s3 + $0xf98] sm:$0xff] }
  0xec   :  { %1599 = vmatpush.msra.mxu0 %v447_v26  ;;  %1618 = vmatpush.msra.mxu1 %v464_v27  ;;  %v512_v26 = vld [vmem:[%s6665_s3 + $0xe08] sm:$0xff]  ;;  %v529_v27 = vld [vmem:[%s6665_s3 + $0xe90] sm:$0xff] }
  0xed   :  { %1639 = vmatpush.msra.mxu2 %v479_v28  ;;  %1658 = vmatpush.msra.mxu3 %v496_v29  ;;  %v57_v28 = vld [vmem:[%s6666_s0 + $0x40] sm:$0xff]  ;;  %v544_v29 = vld [vmem:[%s6665_s3 + $0xf08] sm:$0xff] }
  0xee   :  { %1600 = vmatmul.f32.vlgmr.msra.gmra.mxu0 %v1010_v31  ;;  %1640 = vmatmul.f32.vlgmr.msra.gmra.mxu2 %v1012_v30  ;;  %v561_v31 = vld [vmem:[%s6665_s3 + $0xf90] sm:$0xff]  ;;  %1018 = vst [vmem:[#allocation1] ss:$4 sm:$0xff] %v57_v28  ;;  %v511_v30 = vld [vmem:[%s6665_s3 + $0xe00] sm:$0xff]  ;;  %v578_v28 = vld [vmem:[%s6665_s3 + $0x1018] sm:$0xff] }
  0xef   :  { %1664 = vmatpush.msrb.mxu0 %v526_v32  ;;  %1704 = vmatpush.msrb.mxu2 %v558_v33  ;;  %v528_v32 = vld [vmem:[%s6665_s3 + $0xe88] sm:$0xff]  ;;  %v543_v33 = vld [vmem:[%s6665_s3 + $0xf00] sm:$0xff] }
  0xf0   :  { %1619 = vmatpush.msra.mxu1 %v463_v34  ;;  %1659 = vmatpush.msra.mxu3 %v495_v35  ;;  %v560_v34 = vld [vmem:[%s6665_s3 + $0xf88] sm:$0xff]  ;;  %v1014_v35 = vld.sshfl [vmem:[#allocation1 + $0x20] sm:$0xff pattern:$0x73625140] }
  0xf1   :  { %1620 = vmatmul.f32.vlgmr.msra.gmra.mxu1 %v1011_v36  ;;  %1660 = vmatmul.f32.vlgmr.msra.gmra.mxu3 %v1013_v37  ;;  %v1016_v36 = vld.sshfl [vmem:[#allocation1 + $0x30] sm:$0xff pattern:$0x73625140]  ;;  %v590_v37 = vld [vmem:[%s6665_s3 + $0x1078] sm:$0xff] }
  0xf2   :  { %1665 = vmatpush.msrb.mxu0 %v525_v38  ;;  %1684 = vmatpush.msrb.mxu1 %v542_v39  ;;  %v622_v38 = vld [vmem:[%s6665_s3 + $0x1178] sm:$0xff]  ;;  %v527_v39 = vld [vmem:[%s6665_s3 + $0xe80] sm:$0xff] }
  0xf3   :  { %1705 = vmatpush.msrb.mxu2 %v557_v40  ;;  %1724 = vmatpush.msrb.mxu3 %v574_v41  ;;  %v559_v40 = vld [vmem:[%s6665_s3 + $0xf80] sm:$0xff]  ;;  %v1015_v41 = vld.sshfl [vmem:[#allocation1 + $0x28] sm:$0xff pattern:$0x73625140] }
  0xf4   :  { %1666 = vmatpush.msrb.mxu0 %v524_v42  ;;  %1685 = vmatpush.msrb.mxu1 %v541_v43  ;;  %v59_v42 = vld [vmem:[%s6666_s0 + $0x50] sm:$0xff]  ;;  %v1017_v43 = vld.sshfl [vmem:[#allocation1 + $0x38] sm:$0xff pattern:$0x73625140] }
  0xf5   :  { %1706 = vmatpush.msrb.mxu2 %v556_v44  ;;  %1725 = vmatpush.msrb.mxu3 %v573_v45  ;;  %v589_v44 = vld [vmem:[%s6665_s3 + $0x1070] sm:$0xff]  ;;  %v606_v45 = vld [vmem:[%s6665_s3 + $0x10f8] sm:$0xff] }
  0xf6   :  { %1667 = vmatpush.msrb.mxu0 %v523_v46  ;;  %1686 = vmatpush.msrb.mxu1 %v540_v47  ;;  %v621_v46 = vld [vmem:[%s6665_s3 + $0x1170] sm:$0xff]  ;;  %v638_v47 = vld [vmem:[%s6665_s3 + $0x11f8] sm:$0xff] }
  0xf7   :  { %1707 = vmatpush.msrb.mxu2 %v555_v48  ;;  %1726 = vmatpush.msrb.mxu3 %v572_v49  ;;  %v588_v48 = vld [vmem:[%s6665_s3 + $0x1068] sm:$0xff]  ;;  %v605_v49 = vld [vmem:[%s6665_s3 + $0x10f0] sm:$0xff] }
  0xf8   :  { %1668 = vmatpush.msrb.mxu0 %v522_v50  ;;  %1687 = vmatpush.msrb.mxu1 %v539_v51  ;;  %v620_v50 = vld [vmem:[%s6665_s3 + $0x1168] sm:$0xff]  ;;  %v637_v51 = vld [vmem:[%s6665_s3 + $0x11f0] sm:$0xff] }
  0xf9   :  { %1708 = vmatpush.msrb.mxu2 %v554_v52  ;;  %1727 = vmatpush.msrb.mxu3 %v571_v53  ;;  %v5063_v52 = vld.sshfl [vmem:[#allocation1] sm:$0xff pattern:$0x73625140]  ;;  %v5065_v53 = vld.sshfl [vmem:[#allocation1 + $0x10] sm:$0xff pattern:$0x73625140] }
  0xfa   :  { %1669 = vmatpush.msrb.mxu0 %v521_v54  ;;  %1688 = vmatpush.msrb.mxu1 %v538_v55  ;;  %v5067_v54 = vld.sshfl [vmem:[#allocation1 + $0x8] sm:$0xff pattern:$0x73625140]  ;;  %v5069_v55 = vld.sshfl [vmem:[#allocation1 + $0x18] sm:$0xff pattern:$0x73625140] }
  0xfb   :  { %1709 = vmatpush.msrb.mxu2 %v553_v56  ;;  %1728 = vmatpush.msrb.mxu3 %v570_v57  ;;  %v587_v56 = vld [vmem:[%s6665_s3 + $0x1060] sm:$0xff]  ;;  %v604_v57 = vld [vmem:[%s6665_s3 + $0x10e8] sm:$0xff]  ;;  %1028 = vst [vmem:[#allocation1] ss:$4 sm:$0xff] %v59_v42 }
  0xfc   :  { %1670 = vmatpush.msrb.mxu0 %v520_v58  ;;  %1689 = vmatpush.msrb.mxu1 %v537_v59  ;;  %v619_v58 = vld [vmem:[%s6665_s3 + $0x1160] sm:$0xff]  ;;  %v636_v59 = vld [vmem:[%s6665_s3 + $0x11e8] sm:$0xff] }
  0xfd   :  { %1710 = vmatpush.msrb.mxu2 %v552_v60  ;;  %1729 = vmatpush.msrb.mxu3 %v569_v61  ;;  %v586_v60 = vld [vmem:[%s6665_s3 + $0x1058] sm:$0xff]  ;;  %v603_v61 = vld [vmem:[%s6665_s3 + $0x10e0] sm:$0xff]  ;;  %v592_v42 = vld [vmem:[%s6665_s3 + $0x1088] sm:$0xff] }
  0xfe   :  { %1671 = vmatpush.msrb.mxu0 %v519_v62  ;;  %1690 = vmatpush.msrb.mxu1 %v536_v63  ;;  %v618_v62 = vld [vmem:[%s6665_s3 + $0x1158] sm:$0xff]  ;;  %v635_v63 = vld [vmem:[%s6665_s3 + $0x11e0] sm:$0xff] }
  0xff   :  { %1711 = vmatpush.msrb.mxu2 %v551_v0  ;;  %1730 = vmatpush.msrb.mxu3 %v568_v1  ;;  %v585_v0 = vld [vmem:[%s6665_s3 + $0x1050] sm:$0xff]  ;;  %v602_v1 = vld [vmem:[%s6665_s3 + $0x10d8] sm:$0xff] }
 0x100   :  { %1672 = vmatpush.msrb.mxu0 %v518_v2  ;;  %1691 = vmatpush.msrb.mxu1 %v535_v3  ;;  %v617_v2 = vld [vmem:[%s6665_s3 + $0x1150] sm:$0xff]  ;;  %v634_v3 = vld [vmem:[%s6665_s3 + $0x11d8] sm:$0xff] }
 0x101   :  { %1712 = vmatpush.msrb.mxu2 %v550_v4  ;;  %1731 = vmatpush.msrb.mxu3 %v567_v5  ;;  %v584_v4 = vld [vmem:[%s6665_s3 + $0x1048] sm:$0xff]  ;;  %v601_v5 = vld [vmem:[%s6665_s3 + $0x10d0] sm:$0xff] }
 0x102   :  { %1673 = vmatpush.msrb.mxu0 %v517_v6  ;;  %1692 = vmatpush.msrb.mxu1 %v534_v7  ;;  %v616_v6 = vld [vmem:[%s6665_s3 + $0x1148] sm:$0xff]  ;;  %v633_v7 = vld [vmem:[%s6665_s3 + $0x11d0] sm:$0xff] }
 0x103   :  { %1713 = vmatpush.msrb.mxu2 %v549_v8  ;;  %1732 = vmatpush.msrb.mxu3 %v566_v9  ;;  %v583_v8 = vld [vmem:[%s6665_s3 + $0x1040] sm:$0xff]  ;;  %v600_v9 = vld [vmem:[%s6665_s3 + $0x10c8] sm:$0xff] }
 0x104   :  { %1674 = vmatpush.msrb.mxu0 %v516_v10  ;;  %1693 = vmatpush.msrb.mxu1 %v533_v11  ;;  %v615_v10 = vld [vmem:[%s6665_s3 + $0x1140] sm:$0xff]  ;;  %v632_v11 = vld [vmem:[%s6665_s3 + $0x11c8] sm:$0xff] }
 0x105   :  { %1714 = vmatpush.msrb.mxu2 %v548_v12  ;;  %1733 = vmatpush.msrb.mxu3 %v565_v13  ;;  %v582_v12 = vld [vmem:[%s6665_s3 + $0x1038] sm:$0xff]  ;;  %v599_v13 = vld [vmem:[%s6665_s3 + $0x10c0] sm:$0xff] }
 0x106   :  { %1675 = vmatpush.msrb.mxu0 %v515_v14  ;;  %1694 = vmatpush.msrb.mxu1 %v532_v15  ;;  %v614_v14 = vld [vmem:[%s6665_s3 + $0x1138] sm:$0xff]  ;;  %v631_v15 = vld [vmem:[%s6665_s3 + $0x11c0] sm:$0xff] }
 0x107   :  { %1715 = vmatpush.msrb.mxu2 %v547_v16  ;;  %1734 = vmatpush.msrb.mxu3 %v564_v17  ;;  %v581_v16 = vld [vmem:[%s6665_s3 + $0x1030] sm:$0xff]  ;;  %v598_v17 = vld [vmem:[%s6665_s3 + $0x10b8] sm:$0xff] }
 0x108   :  { %1676 = vmatpush.msrb.mxu0 %v514_v18  ;;  %1695 = vmatpush.msrb.mxu1 %v531_v19  ;;  %v613_v18 = vld [vmem:[%s6665_s3 + $0x1130] sm:$0xff]  ;;  %v630_v19 = vld [vmem:[%s6665_s3 + $0x11b8] sm:$0xff] }
 0x109   :  { %1716 = vmatpush.msrb.mxu2 %v546_v20  ;;  %1735 = vmatpush.msrb.mxu3 %v563_v21  ;;  %v580_v20 = vld [vmem:[%s6665_s3 + $0x1028] sm:$0xff]  ;;  %v597_v21 = vld [vmem:[%s6665_s3 + $0x10b0] sm:$0xff] }
 0x10a   :  { %1677 = vmatpush.msrb.mxu0 %v513_v22  ;;  %1696 = vmatpush.msrb.mxu1 %v530_v23  ;;  %v612_v22 = vld [vmem:[%s6665_s3 + $0x1128] sm:$0xff]  ;;  %v629_v23 = vld [vmem:[%s6665_s3 + $0x11b0] sm:$0xff] }
 0x10b   :  { %1717 = vmatpush.msrb.mxu2 %v545_v24  ;;  %1736 = vmatpush.msrb.mxu3 %v562_v25  ;;  %v579_v24 = vld [vmem:[%s6665_s3 + $0x1020] sm:$0xff]  ;;  %v596_v25 = vld [vmem:[%s6665_s3 + $0x10a8] sm:$0xff] }
 0x10c   :  { %1678 = vmatpush.msrb.mxu0 %v512_v26  ;;  %1697 = vmatpush.msrb.mxu1 %v529_v27  ;;  %v611_v26 = vld [vmem:[%s6665_s3 + $0x1120] sm:$0xff]  ;;  %v628_v27 = vld [vmem:[%s6665_s3 + $0x11a8] sm:$0xff] }
 0x10d   :  { %1718 = vmatpush.msrb.mxu2 %v544_v29  ;;  %1737 = vmatpush.msrb.mxu3 %v561_v31  ;;  %v595_v29 = vld [vmem:[%s6665_s3 + $0x10a0] sm:$0xff]  ;;  %v610_v31 = vld [vmem:[%s6665_s3 + $0x1118] sm:$0xff] }
 0x10e   :  { %1679 = vmatpush.msrb.mxu0 %v511_v30  ;;  %1698 = vmatpush.msrb.mxu1 %v528_v32  ;;  %v627_v30 = vld [vmem:[%s6665_s3 + $0x11a0] sm:$0xff]  ;;  %v577_v32 = vld [vmem:[%s6665_s3 + $0x1010] sm:$0xff] }
 0x10f   :  { %1719 = vmatpush.msrb.mxu2 %v543_v33  ;;  %1738 = vmatpush.msrb.mxu3 %v560_v34  ;;  %v594_v33 = vld [vmem:[%s6665_s3 + $0x1098] sm:$0xff]  ;;  %v609_v34 = vld [vmem:[%s6665_s3 + $0x1110] sm:$0xff] }
 0x110   :  { %1680 = vmatmul.f32.vlgmr.msrb.gmra.mxu0 %v1014_v35  ;;  %1720 = vmatmul.f32.vlgmr.msrb.gmra.mxu2 %v1016_v36  ;;  %v626_v35 = vld [vmem:[%s6665_s3 + $0x1198] sm:$0xff]  ;;  %v576_v36 = vld [vmem:[%s6665_s3 + $0x1008] sm:$0xff] }
 0x111   :  { %1744 = vmatpush.msra.mxu0 %v590_v37  ;;  %1784 = vmatpush.msra.mxu2 %v622_v38  ;;  %v593_v37 = vld [vmem:[%s6665_s3 + $0x1090] sm:$0xff]  ;;  %v58_v38 = vld [vmem:[%s6666_s0 + $0x48] sm:$0xff] }
 0x112   :  { %1699 = vmatpush.msrb.mxu1 %v527_v39  ;;  %1739 = vmatpush.msrb.mxu3 %v559_v40  ;;  %v608_v39 = vld [vmem:[%s6665_s3 + $0x1108] sm:$0xff]  ;;  %v625_v40 = vld [vmem:[%s6665_s3 + $0x1190] sm:$0xff]  ;;  %1019 = vst [vmem:[#allocation1 + $0x20] ss:$4 sm:$0xff] %v58_v38 }
 0x113   :  { %1700 = vmatmul.f32.vlgmr.msrb.gmra.mxu1 %v1015_v41  ;;  %1740 = vmatmul.f32.vlgmr.msrb.gmra.mxu3 %v1017_v43  ;;  %v575_v41 = vld [vmem:[%s6665_s3 + $0x1000] sm:$0xff]  ;;  %v641_v38 = vld [vmem:[%s6665_s3 + $0x1210] sm:$0xff] }
 0x114   :  { %1745 = vmatpush.msra.mxu0 %v589_v44  ;;  %1764 = vmatpush.msra.mxu1 %v606_v45  ;;  %v607_v43 = vld [vmem:[%s6665_s3 + $0x1100] sm:$0xff]  ;;  %v624_v44 = vld [vmem:[%s6665_s3 + $0x1188] sm:$0xff]  ;;  %v654_v45 = vld [vmem:[%s6665_s3 + $0x1278] sm:$0xff] }
 0x115   :  { %1785 = vmatpush.msra.mxu2 %v621_v46  ;;  %1804 = vmatpush.msra.mxu3 %v638_v47  ;;  %v686_v46 = vld [vmem:[%s6665_s3 + $0x1378] sm:$0xff]  ;;  %v591_v47 = vld [vmem:[%s6665_s3 + $0x1080] sm:$0xff] }
 0x116   :  { %1746 = vmatpush.msra.mxu0 %v588_v48  ;;  %1765 = vmatpush.msra.mxu1 %v605_v49  ;;  %v623_v48 = vld [vmem:[%s6665_s3 + $0x1180] sm:$0xff]  ;;  %v60_v49 = vld [vmem:[%s6666_s0 + $0x58] sm:$0xff] }
 0x117   :  { %1786 = vmatpush.msra.mxu2 %v620_v50  ;;  %1805 = vmatpush.msra.mxu3 %v637_v51  ;;  %v653_v50 = vld [vmem:[%s6665_s3 + $0x1270] sm:$0xff]  ;;  %v670_v51 = vld [vmem:[%s6665_s3 + $0x12f8] sm:$0xff] }
 0x118   :  { %1747 = vmatpush.msra.mxu0 %v587_v56  ;;  %1766 = vmatpush.msra.mxu1 %v604_v57  ;;  %v685_v56 = vld [vmem:[%s6665_s3 + $0x1370] sm:$0xff] }
 0x119   :  { %1787 = vmatpush.msra.mxu2 %v619_v58  ;;  %1806 = vmatpush.msra.mxu3 %v636_v59  ;;  %v669_v57 = vld [vmem:[%s6665_s3 + $0x12f0] sm:$0xff]  ;;  %v684_v58 = vld [vmem:[%s6665_s3 + $0x1368] sm:$0xff] }
 0x11a   :  { %1748 = vmatpush.msra.mxu0 %v586_v60  ;;  %1767 = vmatpush.msra.mxu1 %v603_v61  ;;  %v701_v59 = vld [vmem:[%s6665_s3 + $0x13f0] sm:$0xff]  ;;  %v5273_v60 = vld.sshfl [vmem:[#allocation1 + $0x20] sm:$0xff pattern:$0x73625140] }
 0x11b   :  { %1788 = vmatpush.msra.mxu2 %v618_v62  ;;  %1807 = vmatpush.msra.mxu3 %v635_v63  ;;  %v5275_v61 = vld.sshfl [vmem:[#allocation1 + $0x30] sm:$0xff pattern:$0x73625140]  ;;  %v5277_v62 = vld.sshfl [vmem:[#allocation1 + $0x28] sm:$0xff pattern:$0x73625140] }
 0x11c   :  { %1749 = vmatpush.msra.mxu0 %v585_v0  ;;  %1768 = vmatpush.msra.mxu1 %v602_v1  ;;  %v5279_v63 = vld.sshfl [vmem:[#allocation1 + $0x38] sm:$0xff pattern:$0x73625140]  ;;  %v651_v0 = vld [vmem:[%s6665_s3 + $0x1260] sm:$0xff]  ;;  %v700_v1 = vld [vmem:[%s6665_s3 + $0x13e8] sm:$0xff] }
 0x11d   :  { %1789 = vmatpush.msra.mxu2 %v617_v2  ;;  %1808 = vmatpush.msra.mxu3 %v634_v3  ;;  %1029 = vst [vmem:[#allocation1 + $0x20] ss:$4 sm:$0xff] %v60_v49  ;;  %v650_v2 = vld [vmem:[%s6665_s3 + $0x1258] sm:$0xff]  ;;  %v667_v3 = vld [vmem:[%s6665_s3 + $0x12e0] sm:$0xff]  ;;  %v688_v49 = vld [vmem:[%s6665_s3 + $0x1388] sm:$0xff] }
 0x11e   :  { %1750 = vmatpush.msra.mxu0 %v584_v4  ;;  %1769 = vmatpush.msra.mxu1 %v601_v5  ;;  %v682_v4 = vld [vmem:[%s6665_s3 + $0x1358] sm:$0xff]  ;;  %v699_v5 = vld [vmem:[%s6665_s3 + $0x13e0] sm:$0xff] }
 0x11f   :  { %1790 = vmatpush.msra.mxu2 %v616_v6  ;;  %1809 = vmatpush.msra.mxu3 %v633_v7  ;;  %v649_v6 = vld [vmem:[%s6665_s3 + $0x1250] sm:$0xff]  ;;  %v666_v7 = vld [vmem:[%s6665_s3 + $0x12d8] sm:$0xff] }
 0x120   :  { %1751 = vmatpush.msra.mxu0 %v583_v8  ;;  %1770 = vmatpush.msra.mxu1 %v600_v9  ;;  %v681_v8 = vld [vmem:[%s6665_s3 + $0x1350] sm:$0xff]  ;;  %v698_v9 = vld [vmem:[%s6665_s3 + $0x13d8] sm:$0xff] }
 0x121   :  { %1791 = vmatpush.msra.mxu2 %v615_v10  ;;  %1810 = vmatpush.msra.mxu3 %v632_v11  ;;  %v648_v10 = vld [vmem:[%s6665_s3 + $0x1248] sm:$0xff]  ;;  %v665_v11 = vld [vmem:[%s6665_s3 + $0x12d0] sm:$0xff] }
 0x122   :  { %1752 = vmatpush.msra.mxu0 %v582_v12  ;;  %1771 = vmatpush.msra.mxu1 %v599_v13  ;;  %v680_v12 = vld [vmem:[%s6665_s3 + $0x1348] sm:$0xff]  ;;  %v697_v13 = vld [vmem:[%s6665_s3 + $0x13d0] sm:$0xff] }
 0x123   :  { %1792 = vmatpush.msra.mxu2 %v614_v14  ;;  %1811 = vmatpush.msra.mxu3 %v631_v15  ;;  %v647_v14 = vld [vmem:[%s6665_s3 + $0x1240] sm:$0xff]  ;;  %v664_v15 = vld [vmem:[%s6665_s3 + $0x12c8] sm:$0xff] }
 0x124   :  { %1753 = vmatpush.msra.mxu0 %v581_v16  ;;  %1772 = vmatpush.msra.mxu1 %v598_v17  ;;  %v679_v16 = vld [vmem:[%s6665_s3 + $0x1340] sm:$0xff]  ;;  %v696_v17 = vld [vmem:[%s6665_s3 + $0x13c8] sm:$0xff] }
 0x125   :  { %1793 = vmatpush.msra.mxu2 %v613_v18  ;;  %1812 = vmatpush.msra.mxu3 %v630_v19  ;;  %v646_v18 = vld [vmem:[%s6665_s3 + $0x1238] sm:$0xff]  ;;  %v663_v19 = vld [vmem:[%s6665_s3 + $0x12c0] sm:$0xff] }
 0x126   :  { %1754 = vmatpush.msra.mxu0 %v580_v20  ;;  %1773 = vmatpush.msra.mxu1 %v597_v21  ;;  %v678_v20 = vld [vmem:[%s6665_s3 + $0x1338] sm:$0xff]  ;;  %v695_v21 = vld [vmem:[%s6665_s3 + $0x13c0] sm:$0xff] }
 0x127   :  { %1794 = vmatpush.msra.mxu2 %v612_v22  ;;  %1813 = vmatpush.msra.mxu3 %v629_v23  ;;  %v645_v22 = vld [vmem:[%s6665_s3 + $0x1230] sm:$0xff]  ;;  %v662_v23 = vld [vmem:[%s6665_s3 + $0x12b8] sm:$0xff] }
 0x128   :  { %1755 = vmatpush.msra.mxu0 %v579_v24  ;;  %1774 = vmatpush.msra.mxu1 %v596_v25  ;;  %v677_v24 = vld [vmem:[%s6665_s3 + $0x1330] sm:$0xff]  ;;  %v694_v25 = vld [vmem:[%s6665_s3 + $0x13b8] sm:$0xff] }
 0x129   :  { %1795 = vmatpush.msra.mxu2 %v611_v26  ;;  %1814 = vmatpush.msra.mxu3 %v628_v27  ;;  %v644_v26 = vld [vmem:[%s6665_s3 + $0x1228] sm:$0xff]  ;;  %v661_v27 = vld [vmem:[%s6665_s3 + $0x12b0] sm:$0xff] }
 0x12a   :  { %1756 = vmatpush.msra.mxu0 %v578_v28  ;;  %1775 = vmatpush.msra.mxu1 %v595_v29  ;;  %v676_v28 = vld [vmem:[%s6665_s3 + $0x1328] sm:$0xff]  ;;  %v693_v29 = vld [vmem:[%s6665_s3 + $0x13b0] sm:$0xff] }
 0x12b   :  { %1796 = vmatpush.msra.mxu2 %v610_v31  ;;  %1815 = vmatpush.msra.mxu3 %v627_v30  ;;  %v643_v31 = vld [vmem:[%s6665_s3 + $0x1220] sm:$0xff]  ;;  %v660_v30 = vld [vmem:[%s6665_s3 + $0x12a8] sm:$0xff] }
 0x12c   :  { %1757 = vmatpush.msra.mxu0 %v577_v32  ;;  %1776 = vmatpush.msra.mxu1 %v594_v33  ;;  %v675_v32 = vld [vmem:[%s6665_s3 + $0x1320] sm:$0xff]  ;;  %v692_v33 = vld [vmem:[%s6665_s3 + $0x13a8] sm:$0xff] }
 0x12d   :  { %1797 = vmatpush.msra.mxu2 %v609_v34  ;;  %1816 = vmatpush.msra.mxu3 %v626_v35  ;;  %v642_v34 = vld [vmem:[%s6665_s3 + $0x1218] sm:$0xff]  ;;  %v659_v35 = vld [vmem:[%s6665_s3 + $0x12a0] sm:$0xff] }
 0x12e   :  { %1758 = vmatpush.msra.mxu0 %v576_v36  ;;  %1777 = vmatpush.msra.mxu1 %v593_v37  ;;  %v674_v36 = vld [vmem:[%s6665_s3 + $0x1318] sm:$0xff]  ;;  %v691_v37 = vld [vmem:[%s6665_s3 + $0x13a0] sm:$0xff] }
 0x12f   :  { %1798 = vmatpush.msra.mxu2 %v608_v39  ;;  %1817 = vmatpush.msra.mxu3 %v625_v40  ;;  %v658_v39 = vld [vmem:[%s6665_s3 + $0x1298] sm:$0xff]  ;;  %v673_v40 = vld [vmem:[%s6665_s3 + $0x1310] sm:$0xff] }
 0x130   :  { %1759 = vmatpush.msra.mxu0 %v575_v41  ;;  %1778 = vmatpush.msra.mxu1 %v592_v42  ;;  %v690_v41 = vld [vmem:[%s6665_s3 + $0x1398] sm:$0xff]  ;;  %v640_v42 = vld [vmem:[%s6665_s3 + $0x1208] sm:$0xff] }
 0x131   :  { %1799 = vmatpush.msra.mxu2 %v607_v43  ;;  %1818 = vmatpush.msra.mxu3 %v624_v44  ;;  %v657_v43 = vld [vmem:[%s6665_s3 + $0x1290] sm:$0xff]  ;;  %v672_v44 = vld [vmem:[%s6665_s3 + $0x1308] sm:$0xff] }
 0x132   :  { %1760 = vmatmul.f32.vlgmr.msra.gmra.mxu0 %v5063_v52  ;;  %1800 = vmatmul.f32.vlgmr.msra.gmra.mxu2 %v5065_v53  ;;  %v702_v52 = vld [vmem:[%s6665_s3 + $0x13f8] sm:$0xff]  ;;  %v652_v53 = vld [vmem:[%s6665_s3 + $0x1268] sm:$0xff] }
 0x133   :  { %1824 = vmatpush.msrb.mxu0 %v654_v45  ;;  %1864 = vmatpush.msrb.mxu2 %v686_v46  ;;  %v689_v45 = vld [vmem:[%s6665_s3 + $0x1390] sm:$0xff]  ;;  %v639_v46 = vld [vmem:[%s6665_s3 + $0x1200] sm:$0xff] }
 0x134   :  { %1779 = vmatpush.msra.mxu1 %v591_v47  ;;  %1819 = vmatpush.msra.mxu3 %v623_v48  ;;  %v656_v47 = vld [vmem:[%s6665_s3 + $0x1288] sm:$0xff]  ;;  %v671_v48 = vld [vmem:[%s6665_s3 + $0x1300] sm:$0xff] }
 0x135   :  { %1780 = vmatmul.f32.vlgmr.msra.gmra.mxu1 %v5067_v54  ;;  %1820 = vmatmul.f32.vlgmr.msra.gmra.mxu3 %v5069_v55  ;;  %v668_v54 = vld [vmem:[%s6665_s3 + $0x12e8] sm:$0xff]  ;;  %v683_v55 = vld [vmem:[%s6665_s3 + $0x1360] sm:$0xff] }
 0x136   :  { %1825 = vmatpush.msrb.mxu0 %v653_v50  ;;  %1844 = vmatpush.msrb.mxu1 %v670_v51  ;;  %v718_v50 = vld [vmem:[%s6665_s3 + $0x1478] sm:$0xff] }
 0x137   :  { %1865 = vmatpush.msrb.mxu2 %v685_v56  ;;  %1884 = vmatpush.msrb.mxu3 %v702_v52  ;;  %v750_v51 = vld [vmem:[%s6665_s3 + $0x1578] sm:$0xff]  ;;  %v655_v56 = vld [vmem:[%s6665_s3 + $0x1280] sm:$0xff] }
 0x138   :  { %1826 = vmatpush.msrb.mxu0 %v652_v53  ;;  %1845 = vmatpush.msrb.mxu1 %v669_v57  ;;  %v687_v52 = vld [vmem:[%s6665_s3 + $0x1380] sm:$0xff]  ;;  %v717_v57 = vld [vmem:[%s6665_s3 + $0x1470] sm:$0xff] }
 0x139   :  { %1866 = vmatpush.msrb.mxu2 %v684_v58  ;;  %1885 = vmatpush.msrb.mxu3 %v701_v59  ;;  %v61_v53 = vld [vmem:[%s6666_s0 + $0x60] sm:$0xff]  ;;  %v734_v58 = vld [vmem:[%s6665_s3 + $0x14f8] sm:$0xff]  ;;  %v749_v59 = vld [vmem:[%s6665_s3 + $0x1570] sm:$0xff] }
 0x13a   :  { %1827 = vmatpush.msrb.mxu0 %v651_v0  ;;  %1846 = vmatpush.msrb.mxu1 %v668_v54  ;;  %v733_v0 = vld [vmem:[%s6665_s3 + $0x14f0] sm:$0xff]  ;;  %v748_v54 = vld [vmem:[%s6665_s3 + $0x1568] sm:$0xff] }
 0x13b   :  { %1867 = vmatpush.msrb.mxu2 %v683_v55  ;;  %1886 = vmatpush.msrb.mxu3 %v700_v1  ;;  %v765_v55 = vld [vmem:[%s6665_s3 + $0x15f0] sm:$0xff]  ;;  %v5480_v1 = vld.sshfl [vmem:[#allocation1] sm:$0xff pattern:$0x73625140] }
 0x13c   :  { %1828 = vmatpush.msrb.mxu0 %v650_v2  ;;  %1847 = vmatpush.msrb.mxu1 %v667_v3  ;;  %v5482_v2 = vld.sshfl [vmem:[#allocation1 + $0x10] sm:$0xff pattern:$0x73625140]  ;;  %v5484_v3 = vld.sshfl [vmem:[#allocation1 + $0x8] sm:$0xff pattern:$0x73625140] }
 0x13d   :  { %1868 = vmatpush.msrb.mxu2 %v682_v4  ;;  %1887 = vmatpush.msrb.mxu3 %v699_v5  ;;  %v5486_v4 = vld.sshfl [vmem:[#allocation1 + $0x18] sm:$0xff pattern:$0x73625140]  ;;  %v715_v5 = vld [vmem:[%s6665_s3 + $0x1460] sm:$0xff] }
 0x13e   :  { %1829 = vmatpush.msrb.mxu0 %v649_v6  ;;  %1848 = vmatpush.msrb.mxu1 %v666_v7  ;;  %1038 = vst [vmem:[#allocation1] ss:$4 sm:$0xff] %v61_v53  ;;  %v764_v6 = vld [vmem:[%s6665_s3 + $0x15e8] sm:$0xff]  ;;  %v714_v7 = vld [vmem:[%s6665_s3 + $0x1458] sm:$0xff] }
 0x13f   :  { %1869 = vmatpush.msrb.mxu2 %v681_v8  ;;  %1888 = vmatpush.msrb.mxu3 %v698_v9  ;;  %v731_v8 = vld [vmem:[%s6665_s3 + $0x14e0] sm:$0xff]  ;;  %v746_v9 = vld [vmem:[%s6665_s3 + $0x1558] sm:$0xff]  ;;  %v752_v53 = vld [vmem:[%s6665_s3 + $0x1588] sm:$0xff] }
 0x140   :  { %1830 = vmatpush.msrb.mxu0 %v648_v10  ;;  %1849 = vmatpush.msrb.mxu1 %v665_v11  ;;  %v763_v10 = vld [vmem:[%s6665_s3 + $0x15e0] sm:$0xff]  ;;  %v713_v11 = vld [vmem:[%s6665_s3 + $0x1450] sm:$0xff] }
 0x141   :  { %1870 = vmatpush.msrb.mxu2 %v680_v12  ;;  %1889 = vmatpush.msrb.mxu3 %v697_v13  ;;  %v730_v12 = vld [vmem:[%s6665_s3 + $0x14d8] sm:$0xff]  ;;  %v745_v13 = vld [vmem:[%s6665_s3 + $0x1550] sm:$0xff] }
 0x142   :  { %1831 = vmatpush.msrb.mxu0 %v647_v14  ;;  %1850 = vmatpush.msrb.mxu1 %v664_v15  ;;  %v762_v14 = vld [vmem:[%s6665_s3 + $0x15d8] sm:$0xff]  ;;  %v712_v15 = vld [vmem:[%s6665_s3 + $0x1448] sm:$0xff] }
 0x143   :  { %1871 = vmatpush.msrb.mxu2 %v679_v16  ;;  %1890 = vmatpush.msrb.mxu3 %v696_v17  ;;  %v729_v16 = vld [vmem:[%s6665_s3 + $0x14d0] sm:$0xff]  ;;  %v744_v17 = vld [vmem:[%s6665_s3 + $0x1548] sm:$0xff] }
 0x144   :  { %1832 = vmatpush.msrb.mxu0 %v646_v18  ;;  %1851 = vmatpush.msrb.mxu1 %v663_v19  ;;  %v761_v18 = vld [vmem:[%s6665_s3 + $0x15d0] sm:$0xff]  ;;  %v711_v19 = vld [vmem:[%s6665_s3 + $0x1440] sm:$0xff] }
 0x145   :  { %1872 = vmatpush.msrb.mxu2 %v678_v20  ;;  %1891 = vmatpush.msrb.mxu3 %v695_v21  ;;  %v728_v20 = vld [vmem:[%s6665_s3 + $0x14c8] sm:$0xff]  ;;  %v743_v21 = vld [vmem:[%s6665_s3 + $0x1540] sm:$0xff] }
 0x146   :  { %1833 = vmatpush.msrb.mxu0 %v645_v22  ;;  %1852 = vmatpush.msrb.mxu1 %v662_v23  ;;  %v760_v22 = vld [vmem:[%s6665_s3 + $0x15c8] sm:$0xff]  ;;  %v710_v23 = vld [vmem:[%s6665_s3 + $0x1438] sm:$0xff] }
 0x147   :  { %1873 = vmatpush.msrb.mxu2 %v677_v24  ;;  %1892 = vmatpush.msrb.mxu3 %v694_v25  ;;  %v727_v24 = vld [vmem:[%s6665_s3 + $0x14c0] sm:$0xff]  ;;  %v742_v25 = vld [vmem:[%s6665_s3 + $0x1538] sm:$0xff] }
 0x148   :  { %1834 = vmatpush.msrb.mxu0 %v644_v26  ;;  %1853 = vmatpush.msrb.mxu1 %v661_v27  ;;  %v759_v26 = vld [vmem:[%s6665_s3 + $0x15c0] sm:$0xff]  ;;  %v709_v27 = vld [vmem:[%s6665_s3 + $0x1430] sm:$0xff] }
 0x149   :  { %1874 = vmatpush.msrb.mxu2 %v676_v28  ;;  %1893 = vmatpush.msrb.mxu3 %v693_v29  ;;  %v726_v28 = vld [vmem:[%s6665_s3 + $0x14b8] sm:$0xff]  ;;  %v741_v29 = vld [vmem:[%s6665_s3 + $0x1530] sm:$0xff] }
 0x14a   :  { %1835 = vmatpush.msrb.mxu0 %v643_v31  ;;  %1854 = vmatpush.msrb.mxu1 %v660_v30  ;;  %v758_v31 = vld [vmem:[%s6665_s3 + $0x15b8] sm:$0xff]  ;;  %v708_v30 = vld [vmem:[%s6665_s3 + $0x1428] sm:$0xff] }
 0x14b   :  { %1875 = vmatpush.msrb.mxu2 %v675_v32  ;;  %1894 = vmatpush.msrb.mxu3 %v692_v33  ;;  %v725_v32 = vld [vmem:[%s6665_s3 + $0x14b0] sm:$0xff]  ;;  %v740_v33 = vld [vmem:[%s6665_s3 + $0x1528] sm:$0xff] }
 0x14c   :  { %1836 = vmatpush.msrb.mxu0 %v642_v34  ;;  %1855 = vmatpush.msrb.mxu1 %v659_v35  ;;  %v757_v34 = vld [vmem:[%s6665_s3 + $0x15b0] sm:$0xff]  ;;  %v707_v35 = vld [vmem:[%s6665_s3 + $0x1420] sm:$0xff] }
 0x14d   :  { %1876 = vmatpush.msrb.mxu2 %v674_v36  ;;  %1895 = vmatpush.msrb.mxu3 %v691_v37  ;;  %v724_v36 = vld [vmem:[%s6665_s3 + $0x14a8] sm:$0xff]  ;;  %v739_v37 = vld [vmem:[%s6665_s3 + $0x1520] sm:$0xff] }
 0x14e   :  { %1837 = vmatpush.msrb.mxu0 %v641_v38  ;;  %1856 = vmatpush.msrb.mxu1 %v658_v39  ;;  %v756_v38 = vld [vmem:[%s6665_s3 + $0x15a8] sm:$0xff]  ;;  %v706_v39 = vld [vmem:[%s6665_s3 + $0x1418] sm:$0xff] }
 0x14f   :  { %1877 = vmatpush.msrb.mxu2 %v673_v40  ;;  %1896 = vmatpush.msrb.mxu3 %v690_v41  ;;  %v723_v40 = vld [vmem:[%s6665_s3 + $0x14a0] sm:$0xff]  ;;  %v738_v41 = vld [vmem:[%s6665_s3 + $0x1518] sm:$0xff] }
 0x150   :  { %1838 = vmatpush.msrb.mxu0 %v640_v42  ;;  %1857 = vmatpush.msrb.mxu1 %v657_v43  ;;  %v755_v42 = vld [vmem:[%s6665_s3 + $0x15a0] sm:$0xff]  ;;  %v705_v43 = vld [vmem:[%s6665_s3 + $0x1410] sm:$0xff] }
 0x151   :  { %1878 = vmatpush.msrb.mxu2 %v672_v44  ;;  %1897 = vmatpush.msrb.mxu3 %v689_v45  ;;  %v722_v44 = vld [vmem:[%s6665_s3 + $0x1498] sm:$0xff]  ;;  %v737_v45 = vld [vmem:[%s6665_s3 + $0x1510] sm:$0xff] }
 0x152   :  { %1839 = vmatpush.msrb.mxu0 %v639_v46  ;;  %1858 = vmatpush.msrb.mxu1 %v656_v47  ;;  %v754_v46 = vld [vmem:[%s6665_s3 + $0x1598] sm:$0xff]  ;;  %v704_v47 = vld [vmem:[%s6665_s3 + $0x1408] sm:$0xff] }
 0x153   :  { %1879 = vmatpush.msrb.mxu2 %v671_v48  ;;  %1898 = vmatpush.msrb.mxu3 %v688_v49  ;;  %v721_v48 = vld [vmem:[%s6665_s3 + $0x1490] sm:$0xff]  ;;  %v736_v49 = vld [vmem:[%s6665_s3 + $0x1508] sm:$0xff] }
 0x154   :  { %1840 = vmatmul.f32.vlgmr.msrb.gmra.mxu0 %v5273_v60  ;;  %1880 = vmatmul.f32.vlgmr.msrb.gmra.mxu2 %v5275_v61  ;;  %v766_v60 = vld [vmem:[%s6665_s3 + $0x15f8] sm:$0xff]  ;;  %v716_v61 = vld [vmem:[%s6665_s3 + $0x1468] sm:$0xff] }
 0x155   :  { %1904 = vmatpush.msra.mxu0 %v718_v50  ;;  %1944 = vmatpush.msra.mxu2 %v750_v51  ;;  %v753_v50 = vld [vmem:[%s6665_s3 + $0x1590] sm:$0xff]  ;;  %v703_v51 = vld [vmem:[%s6665_s3 + $0x1400] sm:$0xff] }
 0x156   :  { %1859 = vmatpush.msrb.mxu1 %v655_v56  ;;  %1899 = vmatpush.msrb.mxu3 %v687_v52  ;;  %v720_v56 = vld [vmem:[%s6665_s3 + $0x1488] sm:$0xff]  ;;  %v735_v52 = vld [vmem:[%s6665_s3 + $0x1500] sm:$0xff] }
 0x157   :  { %1860 = vmatmul.f32.vlgmr.msrb.gmra.mxu1 %v5277_v62  ;;  %1900 = vmatmul.f32.vlgmr.msrb.gmra.mxu3 %v5279_v63  ;;  %v732_v62 = vld [vmem:[%s6665_s3 + $0x14e8] sm:$0xff]  ;;  %v747_v63 = vld [vmem:[%s6665_s3 + $0x1560] sm:$0xff] }
 0x158   :  { %1905 = vmatpush.msra.mxu0 %v717_v57  ;;  %1924 = vmatpush.msra.mxu1 %v734_v58  ;;  %v782_v57 = vld [vmem:[%s6665_s3 + $0x1678] sm:$0xff] }
 0x159   :  { %1945 = vmatpush.msra.mxu2 %v749_v59  ;;  %1964 = vmatpush.msra.mxu3 %v766_v60  ;;  %v814_v58 = vld [vmem:[%s6665_s3 + $0x1778] sm:$0xff]  ;;  %v719_v59 = vld [vmem:[%s6665_s3 + $0x1480] sm:$0xff] }
 0x15a   :  { %1906 = vmatpush.msra.mxu0 %v716_v61  ;;  %1925 = vmatpush.msra.mxu1 %v733_v0  ;;  %v751_v60 = vld [vmem:[%s6665_s3 + $0x1580] sm:$0xff]  ;;  %v62_v61 = vld [vmem:[%s6666_s0 + $0x68] sm:$0xff]  ;;  %v781_v0 = vld [vmem:[%s6665_s3 + $0x1670] sm:$0xff] }
 0x15b   :  { %1946 = vmatpush.msra.mxu2 %v748_v54  ;;  %1965 = vmatpush.msra.mxu3 %v765_v55  ;;  %v798_v54 = vld [vmem:[%s6665_s3 + $0x16f8] sm:$0xff]  ;;  %v813_v55 = vld [vmem:[%s6665_s3 + $0x1770] sm:$0xff] }
 0x15c   :  { %1907 = vmatpush.msra.mxu0 %v715_v5  ;;  %1926 = vmatpush.msra.mxu1 %v732_v62  ;;  %v797_v5 = vld [vmem:[%s6665_s3 + $0x16f0] sm:$0xff]  ;;  %v812_v62 = vld [vmem:[%s6665_s3 + $0x1768] sm:$0xff] }
 0x15d   :  { %1947 = vmatpush.msra.mxu2 %v747_v63  ;;  %1966 = vmatpush.msra.mxu3 %v764_v6  ;;  %v829_v63 = vld [vmem:[%s6665_s3 + $0x17f0] sm:$0xff]  ;;  %v5687_v6 = vld.sshfl [vmem:[#allocation1 + $0x20] sm:$0xff pattern:$0x73625140] }
 0x15e   :  { %1908 = vmatpush.msra.mxu0 %v714_v7  ;;  %1927 = vmatpush.msra.mxu1 %v731_v8  ;;  %v5689_v7 = vld.sshfl [vmem:[#allocation1 + $0x30] sm:$0xff pattern:$0x73625140]  ;;  %v5691_v8 = vld.sshfl [vmem:[#allocation1 + $0x28] sm:$0xff pattern:$0x73625140] }
 0x15f   :  { %1948 = vmatpush.msra.mxu2 %v746_v9  ;;  %1967 = vmatpush.msra.mxu3 %v763_v10  ;;  %v5693_v9 = vld.sshfl [vmem:[#allocation1 + $0x38] sm:$0xff pattern:$0x73625140]  ;;  %v779_v10 = vld [vmem:[%s6665_s3 + $0x1660] sm:$0xff] }
 0x160   :  { %1909 = vmatpush.msra.mxu0 %v713_v11  ;;  %1928 = vmatpush.msra.mxu1 %v730_v12  ;;  %1039 = vst [vmem:[#allocation1 + $0x20] ss:$4 sm:$0xff] %v62_v61  ;;  %v828_v11 = vld [vmem:[%s6665_s3 + $0x17e8] sm:$0xff]  ;;  %v778_v12 = vld [vmem:[%s6665_s3 + $0x1658] sm:$0xff] }
 0x161   :  { %1949 = vmatpush.msra.mxu2 %v745_v13  ;;  %1968 = vmatpush.msra.mxu3 %v762_v14  ;;  %v795_v13 = vld [vmem:[%s6665_s3 + $0x16e0] sm:$0xff]  ;;  %v810_v14 = vld [vmem:[%s6665_s3 + $0x1758] sm:$0xff]  ;;  %v816_v61 = vld [vmem:[%s6665_s3 + $0x1788] sm:$0xff] }
 0x162   :  { %1910 = vmatpush.msra.mxu0 %v712_v15  ;;  %1929 = vmatpush.msra.mxu1 %v729_v16  ;;  %v827_v15 = vld [vmem:[%s6665_s3 + $0x17e0] sm:$0xff]  ;;  %v777_v16 = vld [vmem:[%s6665_s3 + $0x1650] sm:$0xff] }
 0x163   :  { %1950 = vmatpush.msra.mxu2 %v744_v17  ;;  %1969 = vmatpush.msra.mxu3 %v761_v18  ;;  %v794_v17 = vld [vmem:[%s6665_s3 + $0x16d8] sm:$0xff]  ;;  %v809_v18 = vld [vmem:[%s6665_s3 + $0x1750] sm:$0xff] }
 0x164   :  { %1911 = vmatpush.msra.mxu0 %v711_v19  ;;  %1930 = vmatpush.msra.mxu1 %v728_v20  ;;  %v826_v19 = vld [vmem:[%s6665_s3 + $0x17d8] sm:$0xff]  ;;  %v776_v20 = vld [vmem:[%s6665_s3 + $0x1648] sm:$0xff] }
 0x165   :  { %1951 = vmatpush.msra.mxu2 %v743_v21  ;;  %1970 = vmatpush.msra.mxu3 %v760_v22  ;;  %v793_v21 = vld [vmem:[%s6665_s3 + $0x16d0] sm:$0xff]  ;;  %v808_v22 = vld [vmem:[%s6665_s3 + $0x1748] sm:$0xff] }
 0x166   :  { %1912 = vmatpush.msra.mxu0 %v710_v23  ;;  %1931 = vmatpush.msra.mxu1 %v727_v24  ;;  %v825_v23 = vld [vmem:[%s6665_s3 + $0x17d0] sm:$0xff]  ;;  %v775_v24 = vld [vmem:[%s6665_s3 + $0x1640] sm:$0xff] }
 0x167   :  { %1952 = vmatpush.msra.mxu2 %v742_v25  ;;  %1971 = vmatpush.msra.mxu3 %v759_v26  ;;  %v792_v25 = vld [vmem:[%s6665_s3 + $0x16c8] sm:$0xff]  ;;  %v807_v26 = vld [vmem:[%s6665_s3 + $0x1740] sm:$0xff] }
 0x168   :  { %1913 = vmatpush.msra.mxu0 %v709_v27  ;;  %1932 = vmatpush.msra.mxu1 %v726_v28  ;;  %v824_v27 = vld [vmem:[%s6665_s3 + $0x17c8] sm:$0xff]  ;;  %v774_v28 = vld [vmem:[%s6665_s3 + $0x1638] sm:$0xff] }
 0x169   :  { %1953 = vmatpush.msra.mxu2 %v741_v29  ;;  %1972 = vmatpush.msra.mxu3 %v758_v31  ;;  %v791_v29 = vld [vmem:[%s6665_s3 + $0x16c0] sm:$0xff]  ;;  %v806_v31 = vld [vmem:[%s6665_s3 + $0x1738] sm:$0xff] }
 0x16a   :  { %1914 = vmatpush.msra.mxu0 %v708_v30  ;;  %1933 = vmatpush.msra.mxu1 %v725_v32  ;;  %v823_v30 = vld [vmem:[%s6665_s3 + $0x17c0] sm:$0xff]  ;;  %v773_v32 = vld [vmem:[%s6665_s3 + $0x1630] sm:$0xff] }
 0x16b   :  { %1954 = vmatpush.msra.mxu2 %v740_v33  ;;  %1973 = vmatpush.msra.mxu3 %v757_v34  ;;  %v790_v33 = vld [vmem:[%s6665_s3 + $0x16b8] sm:$0xff]  ;;  %v805_v34 = vld [vmem:[%s6665_s3 + $0x1730] sm:$0xff] }
 0x16c   :  { %1915 = vmatpush.msra.mxu0 %v707_v35  ;;  %1934 = vmatpush.msra.mxu1 %v724_v36  ;;  %v822_v35 = vld [vmem:[%s6665_s3 + $0x17b8] sm:$0xff]  ;;  %v772_v36 = vld [vmem:[%s6665_s3 + $0x1628] sm:$0xff] }
 0x16d   :  { %1955 = vmatpush.msra.mxu2 %v739_v37  ;;  %1974 = vmatpush.msra.mxu3 %v756_v38  ;;  %v789_v37 = vld [vmem:[%s6665_s3 + $0x16b0] sm:$0xff]  ;;  %v804_v38 = vld [vmem:[%s6665_s3 + $0x1728] sm:$0xff] }
 0x16e   :  { %1916 = vmatpush.msra.mxu0 %v706_v39  ;;  %1935 = vmatpush.msra.mxu1 %v723_v40  ;;  %v821_v39 = vld [vmem:[%s6665_s3 + $0x17b0] sm:$0xff]  ;;  %v771_v40 = vld [vmem:[%s6665_s3 + $0x1620] sm:$0xff] }
 0x16f   :  { %1956 = vmatpush.msra.mxu2 %v738_v41  ;;  %1975 = vmatpush.msra.mxu3 %v755_v42  ;;  %v788_v41 = vld [vmem:[%s6665_s3 + $0x16a8] sm:$0xff]  ;;  %v803_v42 = vld [vmem:[%s6665_s3 + $0x1720] sm:$0xff] }
 0x170   :  { %1917 = vmatpush.msra.mxu0 %v705_v43  ;;  %1936 = vmatpush.msra.mxu1 %v722_v44  ;;  %v820_v43 = vld [vmem:[%s6665_s3 + $0x17a8] sm:$0xff]  ;;  %v770_v44 = vld [vmem:[%s6665_s3 + $0x1618] sm:$0xff] }
 0x171   :  { %1957 = vmatpush.msra.mxu2 %v737_v45  ;;  %1976 = vmatpush.msra.mxu3 %v754_v46  ;;  %v787_v45 = vld [vmem:[%s6665_s3 + $0x16a0] sm:$0xff]  ;;  %v802_v46 = vld [vmem:[%s6665_s3 + $0x1718] sm:$0xff] }
 0x172   :  { %1918 = vmatpush.msra.mxu0 %v704_v47  ;;  %1937 = vmatpush.msra.mxu1 %v721_v48  ;;  %v819_v47 = vld [vmem:[%s6665_s3 + $0x17a0] sm:$0xff]  ;;  %v769_v48 = vld [vmem:[%s6665_s3 + $0x1610] sm:$0xff] }
 0x173   :  { %1958 = vmatpush.msra.mxu2 %v736_v49  ;;  %1977 = vmatpush.msra.mxu3 %v753_v50  ;;  %v786_v49 = vld [vmem:[%s6665_s3 + $0x1698] sm:$0xff]  ;;  %v801_v50 = vld [vmem:[%s6665_s3 + $0x1710] sm:$0xff] }
 0x174   :  { %1919 = vmatpush.msra.mxu0 %v703_v51  ;;  %1938 = vmatpush.msra.mxu1 %v720_v56  ;;  %v818_v51 = vld [vmem:[%s6665_s3 + $0x1798] sm:$0xff]  ;;  %v768_v56 = vld [vmem:[%s6665_s3 + $0x1608] sm:$0xff] }
 0x175   :  { %1959 = vmatpush.msra.mxu2 %v735_v52  ;;  %1978 = vmatpush.msra.mxu3 %v752_v53  ;;  %v785_v52 = vld [vmem:[%s6665_s3 + $0x1690] sm:$0xff]  ;;  %v800_v53 = vld [vmem:[%s6665_s3 + $0x1708] sm:$0xff] }
 0x176   :  { %1920 = vmatmul.f32.vlgmr.msra.gmra.mxu0 %v5480_v1  ;;  %1960 = vmatmul.f32.vlgmr.msra.gmra.mxu2 %v5482_v2  ;;  %v830_v1 = vld [vmem:[%s6665_s3 + $0x17f8] sm:$0xff]  ;;  %v780_v2 = vld [vmem:[%s6665_s3 + $0x1668] sm:$0xff] }
 0x177   :  { %1984 = vmatpush.msrb.mxu0 %v782_v57  ;;  %2024 = vmatpush.msrb.mxu2 %v814_v58  ;;  %v817_v57 = vld [vmem:[%s6665_s3 + $0x1790] sm:$0xff]  ;;  %v767_v58 = vld [vmem:[%s6665_s3 + $0x1600] sm:$0xff] }
 0x178   :  { %1939 = vmatpush.msra.mxu1 %v719_v59  ;;  %1979 = vmatpush.msra.mxu3 %v751_v60  ;;  %v784_v59 = vld [vmem:[%s6665_s3 + $0x1688] sm:$0xff]  ;;  %v799_v60 = vld [vmem:[%s6665_s3 + $0x1700] sm:$0xff] }
 0x179   :  { %1940 = vmatmul.f32.vlgmr.msra.gmra.mxu1 %v5484_v3  ;;  %1980 = vmatmul.f32.vlgmr.msra.gmra.mxu3 %v5486_v4  ;;  %v796_v3 = vld [vmem:[%s6665_s3 + $0x16e8] sm:$0xff]  ;;  %v811_v4 = vld [vmem:[%s6665_s3 + $0x1760] sm:$0xff] }
 0x17a   :  { %1985 = vmatpush.msrb.mxu0 %v781_v0  ;;  %2004 = vmatpush.msrb.mxu1 %v798_v54  ;;  %v846_v0 = vld [vmem:[%s6665_s3 + $0x1878] sm:$0xff] }
 0x17b   :  { %2025 = vmatpush.msrb.mxu2 %v813_v55  ;;  %2044 = vmatpush.msrb.mxu3 %v830_v1  ;;  %v878_v54 = vld [vmem:[%s6665_s3 + $0x1978] sm:$0xff]  ;;  %v783_v55 = vld [vmem:[%s6665_s3 + $0x1680] sm:$0xff] }
 0x17c   :  { %1986 = vmatpush.msrb.mxu0 %v780_v2  ;;  %2005 = vmatpush.msrb.mxu1 %v797_v5  ;;  %v815_v1 = vld [vmem:[%s6665_s3 + $0x1780] sm:$0xff]  ;;  %v845_v2 = vld [vmem:[%s6665_s3 + $0x1870] sm:$0xff]  ;;  %v862_v5 = vld [vmem:[%s6665_s3 + $0x18f8] sm:$0xff] }
 0x17d   :  { %2026 = vmatpush.msrb.mxu2 %v812_v62  ;;  %2045 = vmatpush.msrb.mxu3 %v829_v63  ;;  %v877_v62 = vld [vmem:[%s6665_s3 + $0x1970] sm:$0xff]  ;;  %v894_v63 = vld [vmem:[%s6665_s3 + $0x19f8] sm:$0xff] }
 0x17e   :  { %1987 = vmatpush.msrb.mxu0 %v779_v10  ;;  %2006 = vmatpush.msrb.mxu1 %v796_v3  ;;  %v876_v10 = vld [vmem:[%s6665_s3 + $0x1968] sm:$0xff] }
 0x17f   :  { %2027 = vmatpush.msrb.mxu2 %v811_v4  ;;  %2046 = vmatpush.msrb.mxu3 %v828_v11  ;;  %v860_v3 = vld [vmem:[%s6665_s3 + $0x18e8] sm:$0xff]  ;;  %v875_v4 = vld [vmem:[%s6665_s3 + $0x1960] sm:$0xff] }
 0x180   :  { %1988 = vmatpush.msrb.mxu0 %v778_v12  ;;  %2007 = vmatpush.msrb.mxu1 %v795_v13  ;;  %v892_v11 = vld [vmem:[%s6665_s3 + $0x19e8] sm:$0xff]  ;;  %v842_v12 = vld [vmem:[%s6665_s3 + $0x1858] sm:$0xff]  ;;  %v859_v13 = vld [vmem:[%s6665_s3 + $0x18e0] sm:$0xff] }
 0x181   :  { %2028 = vmatpush.msrb.mxu2 %v810_v14  ;;  %2047 = vmatpush.msrb.mxu3 %v827_v15  ;;  %v874_v14 = vld [vmem:[%s6665_s3 + $0x1958] sm:$0xff]  ;;  %v891_v15 = vld [vmem:[%s6665_s3 + $0x19e0] sm:$0xff] }
 0x182   :  { %1989 = vmatpush.msrb.mxu0 %v777_v16  ;;  %2008 = vmatpush.msrb.mxu1 %v794_v17  ;;  %v841_v16 = vld [vmem:[%s6665_s3 + $0x1850] sm:$0xff]  ;;  %v858_v17 = vld [vmem:[%s6665_s3 + $0x18d8] sm:$0xff] }
 0x183   :  { %2029 = vmatpush.msrb.mxu2 %v809_v18  ;;  %2048 = vmatpush.msrb.mxu3 %v826_v19  ;;  %v873_v18 = vld [vmem:[%s6665_s3 + $0x1950] sm:$0xff]  ;;  %v890_v19 = vld [vmem:[%s6665_s3 + $0x19d8] sm:$0xff] }
 0x184   :  { %1990 = vmatpush.msrb.mxu0 %v776_v20  ;;  %2009 = vmatpush.msrb.mxu1 %v793_v21  ;;  %v840_v20 = vld [vmem:[%s6665_s3 + $0x1848] sm:$0xff]  ;;  %v857_v21 = vld [vmem:[%s6665_s3 + $0x18d0] sm:$0xff] }
 0x185   :  { %2030 = vmatpush.msrb.mxu2 %v808_v22  ;;  %2049 = vmatpush.msrb.mxu3 %v825_v23  ;;  %v872_v22 = vld [vmem:[%s6665_s3 + $0x1948] sm:$0xff]  ;;  %v889_v23 = vld [vmem:[%s6665_s3 + $0x19d0] sm:$0xff] }
 0x186   :  { %1991 = vmatpush.msrb.mxu0 %v775_v24  ;;  %2010 = vmatpush.msrb.mxu1 %v792_v25  ;;  %v839_v24 = vld [vmem:[%s6665_s3 + $0x1840] sm:$0xff]  ;;  %v856_v25 = vld [vmem:[%s6665_s3 + $0x18c8] sm:$0xff] }
 0x187   :  { %2031 = vmatpush.msrb.mxu2 %v807_v26  ;;  %2050 = vmatpush.msrb.mxu3 %v824_v27  ;;  %v871_v26 = vld [vmem:[%s6665_s3 + $0x1940] sm:$0xff]  ;;  %v888_v27 = vld [vmem:[%s6665_s3 + $0x19c8] sm:$0xff] }
 0x188   :  { %1992 = vmatpush.msrb.mxu0 %v774_v28  ;;  %2011 = vmatpush.msrb.mxu1 %v791_v29  ;;  %v838_v28 = vld [vmem:[%s6665_s3 + $0x1838] sm:$0xff]  ;;  %v855_v29 = vld [vmem:[%s6665_s3 + $0x18c0] sm:$0xff] }
 0x189   :  { %2032 = vmatpush.msrb.mxu2 %v806_v31  ;;  %2051 = vmatpush.msrb.mxu3 %v823_v30  ;;  %v870_v31 = vld [vmem:[%s6665_s3 + $0x1938] sm:$0xff]  ;;  %v887_v30 = vld [vmem:[%s6665_s3 + $0x19c0] sm:$0xff] }
 0x18a   :  { %1993 = vmatpush.msrb.mxu0 %v773_v32  ;;  %2012 = vmatpush.msrb.mxu1 %v790_v33  ;;  %v837_v32 = vld [vmem:[%s6665_s3 + $0x1830] sm:$0xff]  ;;  %v854_v33 = vld [vmem:[%s6665_s3 + $0x18b8] sm:$0xff] }
 0x18b   :  { %2033 = vmatpush.msrb.mxu2 %v805_v34  ;;  %2052 = vmatpush.msrb.mxu3 %v822_v35  ;;  %v869_v34 = vld [vmem:[%s6665_s3 + $0x1930] sm:$0xff]  ;;  %v886_v35 = vld [vmem:[%s6665_s3 + $0x19b8] sm:$0xff] }
 0x18c   :  { %1994 = vmatpush.msrb.mxu0 %v772_v36  ;;  %2013 = vmatpush.msrb.mxu1 %v789_v37  ;;  %v836_v36 = vld [vmem:[%s6665_s3 + $0x1828] sm:$0xff]  ;;  %v853_v37 = vld [vmem:[%s6665_s3 + $0x18b0] sm:$0xff] }
 0x18d   :  { %2034 = vmatpush.msrb.mxu2 %v804_v38  ;;  %2053 = vmatpush.msrb.mxu3 %v821_v39  ;;  %v868_v38 = vld [vmem:[%s6665_s3 + $0x1928] sm:$0xff]  ;;  %v885_v39 = vld [vmem:[%s6665_s3 + $0x19b0] sm:$0xff] }
 0x18e   :  { %1995 = vmatpush.msrb.mxu0 %v771_v40  ;;  %2014 = vmatpush.msrb.mxu1 %v788_v41  ;;  %v835_v40 = vld [vmem:[%s6665_s3 + $0x1820] sm:$0xff]  ;;  %v852_v41 = vld [vmem:[%s6665_s3 + $0x18a8] sm:$0xff] }
 0x18f   :  { %2035 = vmatpush.msrb.mxu2 %v803_v42  ;;  %2054 = vmatpush.msrb.mxu3 %v820_v43  ;;  %v867_v42 = vld [vmem:[%s6665_s3 + $0x1920] sm:$0xff]  ;;  %v884_v43 = vld [vmem:[%s6665_s3 + $0x19a8] sm:$0xff] }
 0x190   :  { %1996 = vmatpush.msrb.mxu0 %v770_v44  ;;  %2015 = vmatpush.msrb.mxu1 %v787_v45  ;;  %v834_v44 = vld [vmem:[%s6665_s3 + $0x1818] sm:$0xff]  ;;  %v851_v45 = vld [vmem:[%s6665_s3 + $0x18a0] sm:$0xff] }
 0x191   :  { %2036 = vmatpush.msrb.mxu2 %v802_v46  ;;  %2055 = vmatpush.msrb.mxu3 %v819_v47  ;;  %v866_v46 = vld [vmem:[%s6665_s3 + $0x1918] sm:$0xff]  ;;  %v883_v47 = vld [vmem:[%s6665_s3 + $0x19a0] sm:$0xff] }
 0x192   :  { %1997 = vmatpush.msrb.mxu0 %v769_v48  ;;  %2016 = vmatpush.msrb.mxu1 %v786_v49  ;;  %v833_v48 = vld [vmem:[%s6665_s3 + $0x1810] sm:$0xff]  ;;  %v850_v49 = vld [vmem:[%s6665_s3 + $0x1898] sm:$0xff] }
 0x193   :  { %2037 = vmatpush.msrb.mxu2 %v801_v50  ;;  %2056 = vmatpush.msrb.mxu3 %v818_v51  ;;  %v865_v50 = vld [vmem:[%s6665_s3 + $0x1910] sm:$0xff]  ;;  %v882_v51 = vld [vmem:[%s6665_s3 + $0x1998] sm:$0xff] }
 0x194   :  { %1998 = vmatpush.msrb.mxu0 %v768_v56  ;;  %2017 = vmatpush.msrb.mxu1 %v785_v52  ;;  %v832_v56 = vld [vmem:[%s6665_s3 + $0x1808] sm:$0xff]  ;;  %v849_v52 = vld [vmem:[%s6665_s3 + $0x1890] sm:$0xff] }
 0x195   :  { %2038 = vmatpush.msrb.mxu2 %v800_v53  ;;  %2057 = vmatpush.msrb.mxu3 %v817_v57  ;;  %v3289_v53 = vld [vmem:[%s6667_s4] ss:$0 sm:$0xff]  ;;  %v864_v57 = vld [vmem:[%s6665_s3 + $0x1908] sm:$0xff] }
 0x196   :  { %1999 = vmatpush.msrb.mxu0 %v767_v58  ;;  %2018 = vmatpush.msrb.mxu1 %v784_v59  ;;  %v881_v58 = vld [vmem:[%s6665_s3 + $0x1990] sm:$0xff]  ;;  %v1121_v59 = vpop.f32.mrf.mxu0 }
 0x197   :  { %2039 = vmatpush.msrb.mxu2 %v799_v60  ;;  %2058 = vmatpush.msrb.mxu3 %v816_v61  ;;  %v831_v60 = vld [vmem:[%s6665_s3 + $0x1800] sm:$0xff]  ;;  %v848_v61 = vld [vmem:[%s6665_s3 + $0x1888] sm:$0xff] }
 0x198   :  { %2000 = vmatmul.f32.vlgmr.msrb.gmra.mxu0 %v5687_v6  ;;  %2040 = vmatmul.f32.vlgmr.msrb.gmra.mxu2 %v5689_v7  ;;  %v844_v6 = vld [vmem:[%s6665_s3 + $0x1868] sm:$0xff]  ;;  %v861_v7 = vld [vmem:[%s6665_s3 + $0x18f0] sm:$0xff] }
 0x199   :  { %2064 = vmatpush.msra.mxu0 %v846_v0  ;;  %2104 = vmatpush.msra.mxu2 %v878_v54  ;;  %v863_v0 = vld [vmem:[%s6665_s3 + $0x1900] sm:$0xff]  ;;  %v880_v54 = vld [vmem:[%s6665_s3 + $0x1988] sm:$0xff] }
 0x19a   :  { %2019 = vmatpush.msrb.mxu1 %v783_v55  ;;  %2059 = vmatpush.msrb.mxu3 %v815_v1  ;;  %v1040_v55 = vld.sshfl [vmem:[#allocation1] sm:$0xff pattern:$0x73625140]  ;;  %v1042_v1 = vld.sshfl [vmem:[#allocation1 + $0x10] sm:$0xff pattern:$0x73625140] }
 0x19b   :  { %2020 = vmatmul.f32.vlgmr.msrb.gmra.mxu1 %v5691_v8  ;;  %2060 = vmatmul.f32.vlgmr.msrb.gmra.mxu3 %v5693_v9  ;;  %v893_v8 = vld [vmem:[%s6665_s3 + $0x19f0] sm:$0xff]  ;;  %v843_v9 = vld [vmem:[%s6665_s3 + $0x1860] sm:$0xff] }
 0x19c   :  { %2065 = vmatpush.msra.mxu0 %v845_v2  ;;  %2084 = vmatpush.msra.mxu1 %v862_v5  ;;  %v1122_v2 = vadd.f32 %v3289_v53, %v1121_v59  ;;  %v910_v5 = vld [vmem:[%s6665_s3 + $0x1a78] sm:$0xff]  ;;  %v900_v53 = vld [vmem:[%s6665_s3 + $0x1a28] sm:$0xff]  ;;  %v949_v59 = vld [vmem:[%s6665_s3 + $0x1bb0] sm:$0xff] }
 0x19d   :  { %2105 = vmatpush.msra.mxu2 %v877_v62  ;;  %2124 = vmatpush.msra.mxu3 %v894_v63  ;;  %v942_v62 = vld [vmem:[%s6665_s3 + $0x1b78] sm:$0xff]  ;;  %v1141_v63 = vpop.f32.mrf.mxu1 }
 0x19e   :  { %2066 = vmatpush.msra.mxu0 %v844_v6  ;;  %2085 = vmatpush.msra.mxu1 %v861_v7  ;;  %v847_v6 = vld [vmem:[%s6665_s3 + $0x1880] sm:$0xff] }
 0x19f   :  { %2106 = vmatpush.msra.mxu2 %v876_v10  ;;  %2125 = vmatpush.msra.mxu3 %v893_v8  ;;  %v879_v7 = vld [vmem:[%s6665_s3 + $0x1980] sm:$0xff]  ;;  %v1041_v10 = vld.sshfl [vmem:[#allocation1 + $0x8] sm:$0xff pattern:$0x73625140] }
 0x1a0   :  { %2067 = vmatpush.msra.mxu0 %v843_v9  ;;  %2086 = vmatpush.msra.mxu1 %v860_v3  ;;  %v1043_v8 = vld.sshfl [vmem:[#allocation1 + $0x18] sm:$0xff pattern:$0x73625140]  ;;  %v909_v9 = vld [vmem:[%s6665_s3 + $0x1a70] sm:$0xff] }
 0x1a1   :  { %2107 = vmatpush.msra.mxu2 %v875_v4  ;;  %2126 = vmatpush.msra.mxu3 %v892_v11  ;;  %v926_v3 = vld [vmem:[%s6665_s3 + $0x1af8] sm:$0xff]  ;;  %v1142_v4 = vadd.f32 %v1141_v63, %v1122_v2  ;;  %v941_v11 = vld [vmem:[%s6665_s3 + $0x1b70] sm:$0xff]  ;;  %v947_v63 = vld [vmem:[%s6665_s3 + $0x1ba0] sm:$0xff] }
 0x1a2   :  { %2068 = vmatpush.msra.mxu0 %v842_v12  ;;  %2087 = vmatpush.msra.mxu1 %v859_v13  ;;  %v958_v12 = vld [vmem:[%s6665_s3 + $0x1bf8] sm:$0xff]  ;;  %v1161_v13 = vpop.f32.mrf.mxu2 }
 0x1a3   :  { %2108 = vmatpush.msra.mxu2 %v874_v14  ;;  %2127 = vmatpush.msra.mxu3 %v891_v15  ;;  %v908_v14 = vld [vmem:[%s6665_s3 + $0x1a68] sm:$0xff]  ;;  %v925_v15 = vld [vmem:[%s6665_s3 + $0x1af0] sm:$0xff]  ;;  %v898_v2 = vld [vmem:[%s6665_s3 + $0x1a18] sm:$0xff] }
 0x1a4   :  { %2069 = vmatpush.msra.mxu0 %v841_v16  ;;  %2088 = vmatpush.msra.mxu1 %v858_v17  ;;  %v940_v16 = vld [vmem:[%s6665_s3 + $0x1b68] sm:$0xff]  ;;  %v957_v17 = vld [vmem:[%s6665_s3 + $0x1bf0] sm:$0xff] }
 0x1a5   :  { %2109 = vmatpush.msra.mxu2 %v873_v18  ;;  %2128 = vmatpush.msra.mxu3 %v890_v19  ;;  %v907_v18 = vld [vmem:[%s6665_s3 + $0x1a60] sm:$0xff]  ;;  %v924_v19 = vld [vmem:[%s6665_s3 + $0x1ae8] sm:$0xff] }
 0x1a6   :  { %2070 = vmatpush.msra.mxu0 %v840_v20  ;;  %2089 = vmatpush.msra.mxu1 %v857_v21  ;;  %v1162_v20 = vadd.f32 %v1161_v13, %v1142_v4  ;;  %v939_v21 = vld [vmem:[%s6665_s3 + $0x1b60] sm:$0xff]  ;;  %v896_v4 = vld [vmem:[%s6665_s3 + $0x1a08] sm:$0xff] }
 0x1a7   :  { %2110 = vmatpush.msra.mxu2 %v872_v22  ;;  %2129 = vmatpush.msra.mxu3 %v889_v23  ;;  %v956_v22 = vld [vmem:[%s6665_s3 + $0x1be8] sm:$0xff]  ;;  %v1181_v23 = vpop.f32.mrf.mxu3 }
 0x1a8   :  { %2071 = vmatpush.msra.mxu0 %v839_v24  ;;  %2090 = vmatpush.msra.mxu1 %v856_v25  ;;  %v906_v24 = vld [vmem:[%s6665_s3 + $0x1a58] sm:$0xff]  ;;  %v923_v25 = vld [vmem:[%s6665_s3 + $0x1ae0] sm:$0xff]  ;;  %v928_v13 = vld [vmem:[%s6665_s3 + $0x1b08] sm:$0xff] }
 0x1a9   :  { %2111 = vmatpush.msra.mxu2 %v871_v26  ;;  %2130 = vmatpush.msra.mxu3 %v888_v27  ;;  %v938_v26 = vld [vmem:[%s6665_s3 + $0x1b58] sm:$0xff]  ;;  %v955_v27 = vld [vmem:[%s6665_s3 + $0x1be0] sm:$0xff] }
 0x1aa   :  { %2072 = vmatpush.msra.mxu0 %v838_v28  ;;  %2091 = vmatpush.msra.mxu1 %v855_v29  ;;  %v905_v28 = vld [vmem:[%s6665_s3 + $0x1a50] sm:$0xff]  ;;  %v922_v29 = vld [vmem:[%s6665_s3 + $0x1ad8] sm:$0xff] }
 0x1ab   :  { %2112 = vmatpush.msra.mxu2 %v870_v31  ;;  %2131 = vmatpush.msra.mxu3 %v887_v30  ;;  %v1182_v31 = vadd.f32 %v1181_v23, %v1162_v20  ;;  %v937_v30 = vld [vmem:[%s6665_s3 + $0x1b50] sm:$0xff] }
 0x1ac   :  { %2073 = vmatpush.msra.mxu0 %v837_v32  ;;  %2092 = vmatpush.msra.mxu1 %v854_v33  ;;  %v954_v32 = vld [vmem:[%s6665_s3 + $0x1bd8] sm:$0xff]  ;;  %v1201_v33 = vpop.f32.mrf.mxu0 }
 0x1ad   :  { %2113 = vmatpush.msra.mxu2 %v869_v34  ;;  %2132 = vmatpush.msra.mxu3 %v886_v35  ;;  %v904_v34 = vld [vmem:[%s6665_s3 + $0x1a48] sm:$0xff]  ;;  %v921_v35 = vld [vmem:[%s6665_s3 + $0x1ad0] sm:$0xff] }
 0x1ae   :  { %2074 = vmatpush.msra.mxu0 %v836_v36  ;;  %2093 = vmatpush.msra.mxu1 %v853_v37  ;;  %v936_v36 = vld [vmem:[%s6665_s3 + $0x1b48] sm:$0xff]  ;;  %v953_v37 = vld [vmem:[%s6665_s3 + $0x1bd0] sm:$0xff] }
 0x1af   :  { %2114 = vmatpush.msra.mxu2 %v868_v38  ;;  %2133 = vmatpush.msra.mxu3 %v885_v39  ;;  %v903_v38 = vld [vmem:[%s6665_s3 + $0x1a40] sm:$0xff]  ;;  %v920_v39 = vld [vmem:[%s6665_s3 + $0x1ac8] sm:$0xff] }
 0x1b0   :  { %2075 = vmatpush.msra.mxu0 %v835_v40  ;;  %2094 = vmatpush.msra.mxu1 %v852_v41  ;;  %v1202_v40 = vadd.f32 %v1201_v33, %v1182_v31  ;;  %v935_v41 = vld [vmem:[%s6665_s3 + $0x1b40] sm:$0xff] }
 0x1b1   :  { %2115 = vmatpush.msra.mxu2 %v867_v42  ;;  %2134 = vmatpush.msra.mxu3 %v884_v43  ;;  %v952_v42 = vld [vmem:[%s6665_s3 + $0x1bc8] sm:$0xff]  ;;  %v1221_v43 = vpop.f32.mrf.mxu1 }
 0x1b2   :  { %2076 = vmatpush.msra.mxu0 %v834_v44  ;;  %2095 = vmatpush.msra.mxu1 %v851_v45  ;;  %v902_v44 = vld [vmem:[%s6665_s3 + $0x1a38] sm:$0xff]  ;;  %v919_v45 = vld [vmem:[%s6665_s3 + $0x1ac0] sm:$0xff] }
 0x1b3   :  { %2116 = vmatpush.msra.mxu2 %v866_v46  ;;  %2135 = vmatpush.msra.mxu3 %v883_v47  ;;  %v934_v46 = vld [vmem:[%s6665_s3 + $0x1b38] sm:$0xff]  ;;  %v951_v47 = vld [vmem:[%s6665_s3 + $0x1bc0] sm:$0xff] }
 0x1b4   :  { %2077 = vmatpush.msra.mxu0 %v833_v48  ;;  %2096 = vmatpush.msra.mxu1 %v850_v49  ;;  %v901_v48 = vld [vmem:[%s6665_s3 + $0x1a30] sm:$0xff]  ;;  %v918_v49 = vld [vmem:[%s6665_s3 + $0x1ab8] sm:$0xff] }
 0x1b5   :  { %2117 = vmatpush.msra.mxu2 %v865_v50  ;;  %2136 = vmatpush.msra.mxu3 %v882_v51  ;;  %v1222_v50 = vadd.f32 %v1221_v43, %v1202_v40  ;;  %v933_v51 = vld [vmem:[%s6665_s3 + $0x1b30] sm:$0xff] }
 0x1b6   :  { %2078 = vmatpush.msra.mxu0 %v832_v56  ;;  %2097 = vmatpush.msra.mxu1 %v849_v52  ;;  %v950_v56 = vld [vmem:[%s6665_s3 + $0x1bb8] sm:$0xff]  ;;  %v1241_v52 = vpop.f32.mrf.mxu2 }
 0x1b7   :  { %2118 = vmatpush.msra.mxu2 %v864_v57  ;;  %2137 = vmatpush.msra.mxu3 %v881_v58  ;;  %v917_v57 = vld [vmem:[%s6665_s3 + $0x1ab0] sm:$0xff]  ;;  %v932_v58 = vld [vmem:[%s6665_s3 + $0x1b28] sm:$0xff] }
 0x1b8   :  { %2079 = vmatpush.msra.mxu0 %v831_v60  ;;  %2098 = vmatpush.msra.mxu1 %v848_v61  ;;  %v899_v60 = vld [vmem:[%s6665_s3 + $0x1a20] sm:$0xff]  ;;  %v916_v61 = vld [vmem:[%s6665_s3 + $0x1aa8] sm:$0xff] }
 0x1b9   :  { %2119 = vmatpush.msra.mxu2 %v863_v0  ;;  %2138 = vmatpush.msra.mxu3 %v880_v54  ;;  %v1242_v0 = vadd.f32 %v1241_v52, %v1222_v50  ;;  %v931_v54 = vld [vmem:[%s6665_s3 + $0x1b20] sm:$0xff] }
 0x1ba   :  { %2080 = vmatmul.f32.vlgmr.msra.gmra.mxu0 %v1040_v55  ;;  %2120 = vmatmul.f32.vlgmr.msra.gmra.mxu2 %v1042_v1  ;;  %v948_v55 = vld [vmem:[%s6665_s3 + $0x1ba8] sm:$0xff]  ;;  %v1261_v1 = vpop.f32.mrf.mxu3 }
 0x1bb   :  { %2144 = vmatpush.msrb.mxu0 %v910_v5  ;;  %2184 = vmatpush.msrb.mxu2 %v942_v62  ;;  %v915_v5 = vld [vmem:[%s6665_s3 + $0x1aa0] sm:$0xff]  ;;  %v930_v62 = vld [vmem:[%s6665_s3 + $0x1b18] sm:$0xff] }
 0x1bc   :  { %2099 = vmatpush.msra.mxu1 %v847_v6  ;;  %2139 = vmatpush.msra.mxu3 %v879_v7  ;;  %v1281_v6 = vpop.f32.mrf.mxu0  ;;  %v897_v7 = vld [vmem:[%s6665_s3 + $0x1a10] sm:$0xff] }
 0x1bd   :  { %2100 = vmatmul.f32.vlgmr.msra.gmra.mxu1 %v1041_v10  ;;  %2140 = vmatmul.f32.vlgmr.msra.gmra.mxu3 %v1043_v8  ;;  %v914_v10 = vld [vmem:[%s6665_s3 + $0x1a98] sm:$0xff]  ;;  %v1262_v8 = vadd.f32 %v1261_v1, %v1242_v0 }
 0x1be   :  { %2145 = vmatpush.msrb.mxu0 %v909_v9  ;;  %2164 = vmatpush.msrb.mxu1 %v926_v3  ;;  %v929_v9 = vld [vmem:[%s6665_s3 + $0x1b10] sm:$0xff]  ;;  %v946_v3 = vld [vmem:[%s6665_s3 + $0x1b98] sm:$0xff]  ;;  %v1321_v20 = vpop.f32.mrf.mxu2 }
 0x1bf   :  { %2185 = vmatpush.msrb.mxu2 %v941_v11  ;;  %2204 = vmatpush.msrb.mxu3 %v958_v12  ;;  %v913_v11 = vld [vmem:[%s6665_s3 + $0x1a90] sm:$0xff]  ;;  %v1282_v12 = vadd.f32 %v1281_v6, %v1262_v8 }
 0x1c0   :  { %2146 = vmatpush.msrb.mxu0 %v908_v14  ;;  %2165 = vmatpush.msrb.mxu1 %v925_v15  ;;  %v945_v14 = vld [vmem:[%s6665_s3 + $0x1b90] sm:$0xff]  ;;  %v1301_v15 = vpop.f32.mrf.mxu1 }
 0x1c1   :  { %2186 = vmatpush.msrb.mxu2 %v940_v16  ;;  %2205 = vmatpush.msrb.mxu3 %v957_v17  ;;  %v895_v16 = vld [vmem:[%s6665_s3 + $0x1a00] sm:$0xff]  ;;  %v912_v17 = vld [vmem:[%s6665_s3 + $0x1a88] sm:$0xff]  ;;  %v1302_v23 = vadd.f32 %v1301_v15, %v1282_v12  ;;  %v2271_v8 = vld [vmem:[%s6669_s5 + $0x170] sm:$0xff] }
 0x1c2   :  { %2147 = vmatpush.msrb.mxu0 %v907_v18  ;;  %2166 = vmatpush.msrb.mxu1 %v924_v19  ;;  %v927_v18 = vld [vmem:[%s6665_s3 + $0x1b00] sm:$0xff]  ;;  %v944_v19 = vld [vmem:[%s6665_s3 + $0x1b88] sm:$0xff]  ;;  %v2256_v12 = vld [vmem:[%s6669_s5 + $0xf8] sm:$0xff] }
 0x1c3   :  { %2187 = vmatpush.msrb.mxu2 %v939_v21  ;;  %2206 = vmatpush.msrb.mxu3 %v956_v22  ;;  %v1044_v21 = vld.sshfl [vmem:[#allocation1 + $0x20] sm:$0xff pattern:$0x73625140]  ;;  %v1046_v22 = vld.sshfl [vmem:[#allocation1 + $0x30] sm:$0xff pattern:$0x73625140] }
 0x1c4   :  { %2148 = vmatpush.msrb.mxu0 %v906_v24  ;;  %2167 = vmatpush.msrb.mxu1 %v923_v25  ;;  %v911_v24 = vld [vmem:[%s6665_s3 + $0x1a80] sm:$0xff]  ;;  %v1361_v31 = vpop.f32.mrf.mxu0  ;;  %v2287_v15 = vld [vmem:[%s6669_s5 + $0x1f0] sm:$0xff] }
 0x1c5   :  { %2188 = vmatpush.msrb.mxu2 %v938_v26  ;;  %2207 = vmatpush.msrb.mxu3 %v955_v27  ;;  %v943_v25 = vld [vmem:[%s6665_s3 + $0x1b80] sm:$0xff]  ;;  %v1045_v26 = vld.sshfl [vmem:[#allocation1 + $0x28] sm:$0xff pattern:$0x73625140] }
 0x1c6   :  { %2149 = vmatpush.msrb.mxu0 %v905_v28  ;;  %2168 = vmatpush.msrb.mxu1 %v922_v29  ;;  %v1047_v27 = vld.sshfl [vmem:[#allocation1 + $0x38] sm:$0xff pattern:$0x73625140]  ;;  %v1322_v28 = vadd.f32 %v1321_v20, %v1302_v23  ;;  %v1341_v29 = vpop.f32.mrf.mxu3 }
 0x1c7   :  { %2189 = vmatpush.msrb.mxu2 %v937_v30  ;;  %2208 = vmatpush.msrb.mxu3 %v954_v32  ;;  %v2268_v23 = vld [vmem:[%s6669_s5 + $0x158] sm:$0xff] }
 0x1c8   :  { %2150 = vmatpush.msrb.mxu0 %v904_v34  ;;  %2169 = vmatpush.msrb.mxu1 %v921_v35  ;;  %v1342_v30 = vadd.f32 %v1341_v29, %v1322_v28  ;;  %v1381_v33 = vpop.f32.mrf.mxu1  ;;  %v1401_v34 = vpop.f32.mrf.mxu2  ;;  %v2253_v28 = vld [vmem:[%s6669_s5 + $0xe0] sm:$0xff]  ;;  %v2267_v29 = vld [vmem:[%s6669_s5 + $0x150] sm:$0xff] }
 0x1c9   :  { %2190 = vmatpush.msrb.mxu2 %v936_v36  ;;  %2209 = vmatpush.msrb.mxu3 %v953_v37 }
 0x1ca   :  { %2151 = vmatpush.msrb.mxu0 %v903_v38  ;;  %2170 = vmatpush.msrb.mxu1 %v920_v39  ;;  %v1362_v32 = vadd.f32 %v1361_v31, %v1342_v30  ;;  %v2284_v30 = vld [vmem:[%s6669_s5 + $0x1d8] sm:$0xff] }
 0x1cb   :  { %2191 = vmatpush.msrb.mxu2 %v935_v41  ;;  %2210 = vmatpush.msrb.mxu3 %v952_v42 }
 0x1cc   :  { %2152 = vmatpush.msrb.mxu0 %v902_v44  ;;  %2171 = vmatpush.msrb.mxu1 %v919_v45  ;;  %v1382_v35 = vadd.f32 %v1381_v33, %v1362_v32  ;;  %v1441_v38 = vpop.f32.mrf.mxu0  ;;  %v2235_v32 = vld [vmem:[%s6669_s5 + $0x50] sm:$0xff]  ;;  %v2252_v33 = vld [vmem:[%s6669_s5 + $0xd8] sm:$0xff] }
 0x1cd   :  { %2192 = vmatpush.msrb.mxu2 %v934_v46  ;;  %2211 = vmatpush.msrb.mxu3 %v951_v47 }
 0x1ce   :  { %2153 = vmatpush.msrb.mxu0 %v901_v48  ;;  %2172 = vmatpush.msrb.mxu1 %v918_v49  ;;  %v1402_v36 = vadd.f32 %v1401_v34, %v1382_v35  ;;  %v1421_v37 = vpop.f32.mrf.mxu3  ;;  %v2266_v34 = vld [vmem:[%s6669_s5 + $0x148] sm:$0xff]  ;;  %v2283_v35 = vld [vmem:[%s6669_s5 + $0x1d0] sm:$0xff] }
 0x1cf   :  { %2193 = vmatpush.msrb.mxu2 %v933_v51  ;;  %2212 = vmatpush.msrb.mxu3 %v950_v56  ;;  %v2272_v56 = vld [vmem:[%s6669_s5 + $0x178] sm:$0xff] }
 0x1d0   :  { %2154 = vmatpush.msrb.mxu0 %v900_v53  ;;  %2173 = vmatpush.msrb.mxu1 %v917_v57  ;;  %v1422_v39 = vadd.f32 %v1421_v37, %v1402_v36  ;;  %v1461_v41 = vpop.f32.mrf.mxu1  ;;  %v1481_v42 = vpop.f32.mrf.mxu2  ;;  %v2234_v36 = vld [vmem:[%s6669_s5 + $0x48] sm:$0xff] }
 0x1d1   :  { %2194 = vmatpush.msrb.mxu2 %v932_v58  ;;  %2213 = vmatpush.msrb.mxu3 %v949_v59 }
 0x1d2   :  { %2155 = vmatpush.msrb.mxu0 %v899_v60  ;;  %2174 = vmatpush.msrb.mxu1 %v916_v61  ;;  %v1442_v40 = vadd.f32 %v1441_v38, %v1422_v39  ;;  %v2251_v38 = vld [vmem:[%s6669_s5 + $0xd0] sm:$0xff]  ;;  %v2265_v39 = vld [vmem:[%s6669_s5 + $0x140] sm:$0xff] }
 0x1d3   :  { %2195 = vmatpush.msrb.mxu2 %v931_v54  ;;  %2214 = vmatpush.msrb.mxu3 %v948_v55 }
 0x1d4   :  { %2156 = vmatpush.msrb.mxu0 %v898_v2  ;;  %2175 = vmatpush.msrb.mxu1 %v915_v5  ;;  %v1462_v43 = vadd.f32 %v1461_v41, %v1442_v40  ;;  %v1521_v46 = vpop.f32.mrf.mxu0  ;;  %v2282_v40 = vld [vmem:[%s6669_s5 + $0x1c8] sm:$0xff] }
 0x1d5   :  { %2196 = vmatpush.msrb.mxu2 %v930_v62  ;;  %2215 = vmatpush.msrb.mxu3 %v947_v63 }
 0x1d6   :  { %2157 = vmatpush.msrb.mxu0 %v897_v7  ;;  %2176 = vmatpush.msrb.mxu1 %v914_v10  ;;  %v1482_v44 = vadd.f32 %v1481_v42, %v1462_v43  ;;  %v1501_v45 = vpop.f32.mrf.mxu3  ;;  %v2240_v10 = vld [vmem:[%s6669_s5 + $0x78] sm:$0xff]  ;;  %v2233_v42 = vld [vmem:[%s6669_s5 + $0x40] sm:$0xff]  ;;  %v2250_v43 = vld [vmem:[%s6669_s5 + $0xc8] sm:$0xff] }
 0x1d7   :  { %2197 = vmatpush.msrb.mxu2 %v929_v9  ;;  %2216 = vmatpush.msrb.mxu3 %v946_v3  ;;  %v2288_v9 = vld [vmem:[%s6669_s5 + $0x1f8] sm:$0xff] }
 0x1d8   :  { %2158 = vmatpush.msrb.mxu0 %v896_v4  ;;  %2177 = vmatpush.msrb.mxu1 %v913_v11  ;;  %v1502_v47 = vadd.f32 %v1501_v45, %v1482_v44  ;;  %v1541_v49 = vpop.f32.mrf.mxu1  ;;  %v1561_v50 = vpop.f32.mrf.mxu2  ;;  %v2239_v11 = vld [vmem:[%s6669_s5 + $0x70] sm:$0xff]  ;;  %v2264_v44 = vld [vmem:[%s6669_s5 + $0x138] sm:$0xff]  ;;  %v2281_v45 = vld [vmem:[%s6669_s5 + $0x1c0] sm:$0xff] }
 0x1d9   :  { %2198 = vmatpush.msrb.mxu2 %v928_v13  ;;  %2217 = vmatpush.msrb.mxu3 %v945_v14  ;;  %v2270_v13 = vld [vmem:[%s6669_s5 + $0x168] sm:$0xff] }
 0x1da   :  { %2159 = vmatpush.msrb.mxu0 %v895_v16  ;;  %2178 = vmatpush.msrb.mxu1 %v912_v17  ;;  %v1522_v48 = vadd.f32 %v1521_v46, %v1502_v47  ;;  %v2238_v16 = vld [vmem:[%s6669_s5 + $0x68] sm:$0xff]  ;;  %v2255_v17 = vld [vmem:[%s6669_s5 + $0xf0] sm:$0xff]  ;;  %v2232_v47 = vld [vmem:[%s6669_s5 + $0x38] sm:$0xff] }
 0x1db   :  { %2199 = vmatpush.msrb.mxu2 %v927_v18  ;;  %2218 = vmatpush.msrb.mxu3 %v944_v19  ;;  %v2269_v18 = vld [vmem:[%s6669_s5 + $0x160] sm:$0xff]  ;;  %v2286_v19 = vld [vmem:[%s6669_s5 + $0x1e8] sm:$0xff] }
 0x1dc   :  { %2160 = vmatmul.f32.vlgmr.msrb.gmra.mxu0 %v1044_v21  ;;  %2200 = vmatmul.f32.vlgmr.msrb.gmra.mxu2 %v1046_v22  ;;  %v1542_v51 = vadd.f32 %v1541_v49, %v1522_v48  ;;  %v1601_v57 = vpop.f32.mrf.mxu0  ;;  %v2237_v21 = vld [vmem:[%s6669_s5 + $0x60] sm:$0xff]  ;;  %v2254_v22 = vld [vmem:[%s6669_s5 + $0xe8] sm:$0xff] }
 0x1dd   :  { %2179 = vmatpush.msrb.mxu1 %v911_v24  ;;  %2219 = vmatpush.msrb.mxu3 %v943_v25  ;;  %v2285_v25 = vld [vmem:[%s6669_s5 + $0x1e0] sm:$0xff] }
 0x1de   :  { %2180 = vmatmul.f32.vlgmr.msrb.gmra.mxu1 %v1045_v26  ;;  %2220 = vmatmul.f32.vlgmr.msrb.gmra.mxu3 %v1047_v27  ;;  %v1562_v52 = vadd.f32 %v1561_v50, %v1542_v51  ;;  %v1581_v53 = vpop.f32.mrf.mxu3  ;;  %v2236_v27 = vld [vmem:[%s6669_s5 + $0x58] sm:$0xff]  ;;  %v2249_v48 = vld [vmem:[%s6669_s5 + $0xc0] sm:$0xff]  ;;  %v2263_v50 = vld [vmem:[%s6669_s5 + $0x130] sm:$0xff] }
 0x1df   :  { %2343 = vmatpush.msra.mxu2 %v2272_v56  ;;  %2303 = vmatpush.msra.mxu0 %v2240_v10  ;;  %v2280_v51 = vld [vmem:[%s6669_s5 + $0x1b8] sm:$0xff]  ;;  %v2231_v56 = vld [vmem:[%s6669_s5 + $0x30] sm:$0xff]  ;;  %v2224_v10 = vld [vmem:[%s6670_s1] sm:$0xff]  ;;  %s3353_s1 = smov 96  }
 0x1e0   :  { %v1582_v58 = vadd.f32 %v1581_v53, %v1562_v52  ;;  %v1621_v60 = vpop.f32.mrf.mxu1  ;;  %v1641_v61 = vpop.f32.mrf.mxu2  ;;  %2363 = vmatpush.msra.mxu3 %v2288_v9  ;;  %2323 = vmatpush.msra.mxu1 %v2256_v12  ;;  %v2248_v52 = vld [vmem:[%s6669_s5 + $0xb8] sm:$0xff]  ;;  %v2259_v9 = vld [vmem:[%s6669_s5 + $0x110] sm:$0xff]  ;;  %2294 = vst [vmem:[#allocation1] ss:$4 sm:$0xff] %v2224_v10 }
 0x1e1   :  { %2344 = vmatpush.msra.mxu2 %v2271_v8  ;;  %2304 = vmatpush.msra.mxu0 %v2239_v11  ;;  %v2227_v11 = vld [vmem:[%s6669_s5 + $0x10] sm:$0xff]  ;;  %v2244_v12 = vld [vmem:[%s6669_s5 + $0x98] sm:$0xff] }
 0x1e2   :  { %v1602_v59 = vadd.f32 %v1601_v57, %v1582_v58  ;;  %2364 = vmatpush.msra.mxu3 %v2287_v15  ;;  %2324 = vmatpush.msra.mxu1 %v2255_v17  ;;  %v2262_v57 = vld [vmem:[%s6669_s5 + $0x128] sm:$0xff]  ;;  %v2279_v58 = vld [vmem:[%s6669_s5 + $0x1b0] sm:$0xff] }
 0x1e3   :  { %2345 = vmatpush.msra.mxu2 %v2270_v13  ;;  %2305 = vmatpush.msra.mxu0 %v2238_v16  ;;  %v2258_v13 = vld [vmem:[%s6669_s5 + $0x108] sm:$0xff]  ;;  %v2243_v17 = vld [vmem:[%s6669_s5 + $0x90] sm:$0xff] }
 0x1e4   :  { %v1622_v0 = vadd.f32 %v1621_v60, %v1602_v59  ;;  %v1681_v1 = vpop.f32.mrf.mxu0  ;;  %2365 = vmatpush.msra.mxu3 %v2286_v19  ;;  %2325 = vmatpush.msra.mxu1 %v2254_v22  ;;  %v2230_v60 = vld [vmem:[%s6669_s5 + $0x28] sm:$0xff]  ;;  %v2257_v19 = vld [vmem:[%s6669_s5 + $0x100] sm:$0xff]  ;;  %v6434_v22 = vld [vmem:[%s6671_s9 + $0x18] sm:$0xff] }
 0x1e5   :  { %2346 = vmatpush.msra.mxu2 %v2269_v18  ;;  %2306 = vmatpush.msra.mxu0 %v2237_v21  ;;  %v2226_v16 = vld [vmem:[%s6669_s5 + $0x8] sm:$0xff] }
 0x1e6   :  { %v1642_v54 = vadd.f32 %v1641_v61, %v1622_v0  ;;  %v1661_v55 = vpop.f32.mrf.mxu3  ;;  %2366 = vmatpush.msra.mxu3 %v2285_v25  ;;  %2326 = vmatpush.msra.mxu1 %v2253_v28  ;;  %v2247_v61 = vld [vmem:[%s6669_s5 + $0xb0] sm:$0xff]  ;;  %v2261_v0 = vld [vmem:[%s6669_s5 + $0x120] sm:$0xff] }
 0x1e7   :  { %2347 = vmatpush.msra.mxu2 %v2268_v23  ;;  %2307 = vmatpush.msra.mxu0 %v2236_v27  ;;  %v2225_v25 = vld [vmem:[%s6669_s5] sm:$0xff] }
 0x1e8   :  { %v1662_v2 = vadd.f32 %v1661_v55, %v1642_v54  ;;  %v1701_v62 = vpop.f32.mrf.mxu1  ;;  %v1721_v63 = vpop.f32.mrf.mxu2  ;;  %2367 = vmatpush.msra.mxu3 %v2284_v30  ;;  %2327 = vmatpush.msra.mxu1 %v2252_v33  ;;  %v2278_v54 = vld [vmem:[%s6669_s5 + $0x1a8] sm:$0xff]  ;;  %v2273_v27 = vld [vmem:[%s6669_s5 + $0x180] sm:$0xff] }
 0x1e9   :  { %2348 = vmatpush.msra.mxu2 %v2267_v29  ;;  %2308 = vmatpush.msra.mxu0 %v2235_v32  ;;  %v2295_v29 = vld.sshfl [vmem:[#allocation1] sm:$0xff pattern:$0x73625140]  ;;  %v6449_v32 = vld [vmem:[%s6671_s9 + $0x10] sm:$0xff] }
 0x1ea   :  { %v1682_v5 = vadd.f32 %v1681_v1, %v1662_v2  ;;  %2368 = vmatpush.msra.mxu3 %v2283_v35  ;;  %2328 = vmatpush.msra.mxu1 %v2251_v38  ;;  %v2229_v1 = vld [vmem:[%s6669_s5 + $0x20] sm:$0xff]  ;;  %v2246_v2 = vld [vmem:[%s6669_s5 + $0xa8] sm:$0xff] }
 0x1eb   :  { %2349 = vmatpush.msra.mxu2 %v2266_v34  ;;  %2309 = vmatpush.msra.mxu0 %v2234_v36  ;;  %v2241_v33 = vld [vmem:[%s6669_s5 + $0x80] sm:$0xff]  ;;  %v2296_v34 = vld.sshfl [vmem:[#allocation1 + $0x8] sm:$0xff pattern:$0x73625140] }
 0x1ec   :  { %v1702_v6 = vadd.f32 %v1701_v62, %v1682_v5  ;;  %v1761_v4 = vpop.f32.mrf.mxu0  ;;  %2369 = vmatpush.msra.mxu3 %v2282_v40  ;;  %2329 = vmatpush.msra.mxu1 %v2250_v43  ;;  %v2260_v62 = vld [vmem:[%s6669_s5 + $0x118] sm:$0xff]  ;;  %v6458_v36 = vld [vmem:[%s6672_s8] sm:$0xff]  ;;  %v6468_v38 = vld [vmem:[%s6671_s9 + $0x8] sm:$0xff] }
 0x1ed   :  { %2350 = vmatpush.msra.mxu2 %v2265_v39  ;;  %2310 = vmatpush.msra.mxu0 %v2233_v42  ;;  %v6474_v40 = vld [vmem:[%s6671_s9] sm:$0xff] }
 0x1ee   :  { %v1722_v7 = vadd.f32 %v1721_v63, %v1702_v6  ;;  %v1741_v3 = vpop.f32.mrf.mxu3  ;;  %2370 = vmatpush.msra.mxu3 %v2281_v45  ;;  %2330 = vmatpush.msra.mxu1 %v2249_v48  ;;  %v2277_v63 = vld [vmem:[%s6669_s5 + $0x1a0] sm:$0xff]  ;;  %v2228_v6 = vld [vmem:[%s6669_s5 + $0x18] sm:$0xff]  ;;  %v3349_v45 = vmov 0.0  }
 0x1ef   :  { %2351 = vmatpush.msra.mxu2 %v2264_v44  ;;  %2311 = vmatpush.msra.mxu0 %v2232_v47  ;;  %v6484_v43 = vld [vmem:[%s6673_s7] sm:$0xff]  ;;  %v6489_v44 = vld [vmem:[%s6674_s2 + $0x8] sm:$0x7f] }
 0x1f0   :  { %v1742_v14 = vadd.f32 %v1741_v3, %v1722_v7  ;;  %v1781_v24 = vpop.f32.mrf.mxu1  ;;  %v1801_v26 = vpop.f32.mrf.mxu2  ;;  %2371 = vmatpush.msra.mxu3 %v2280_v51  ;;  %2331 = vmatpush.msra.mxu1 %v2248_v52  ;;  %v2245_v7 = vld [vmem:[%s6669_s5 + $0xa0] sm:$0xff]  ;;  %v2276_v3 = vld [vmem:[%s6669_s5 + $0x198] sm:$0xff] }
 0x1f1   :  { %2352 = vmatpush.msra.mxu2 %v2263_v50  ;;  %2312 = vmatpush.msra.mxu0 %v2231_v56  ;;  %v6497_v48 = vld [vmem:[%s6674_s2] sm:$0x7f] }
 0x1f2   :  { %v1762_v20 = vadd.f32 %v1761_v4, %v1742_v14  ;;  %2372 = vmatpush.msra.mxu3 %v2279_v58  ;;  %2332 = vmatpush.msra.mxu1 %v2247_v61  ;;  %v2275_v14 = vld [vmem:[%s6669_s5 + $0x190] sm:$0xff] }
 0x1f3   :  { %2353 = vmatpush.msra.mxu2 %v2262_v57  ;;  %2313 = vmatpush.msra.mxu0 %v2230_v60 }
 0x1f4   :  { %v1782_v31 = vadd.f32 %v1781_v24, %v1762_v20  ;;  %v1841_v46 = vpop.f32.mrf.mxu0  ;;  %2373 = vmatpush.msra.mxu3 %v2278_v54  ;;  %2333 = vmatpush.msra.mxu1 %v2246_v2  ;;  %v2274_v20 = vld [vmem:[%s6669_s5 + $0x188] sm:$0xff]  ;;  %v2297_v24 = vld.sshfl [vmem:[#allocation1 + $0x10] sm:$0xff pattern:$0x73625140] }
 0x1f5   :  { %2354 = vmatpush.msra.mxu2 %v2261_v0  ;;  %2314 = vmatpush.msra.mxu0 %v2229_v1 }
 0x1f6   :  { %v1802_v37 = vadd.f32 %v1801_v26, %v1782_v31  ;;  %v1821_v41 = vpop.f32.mrf.mxu3  ;;  %2374 = vmatpush.msra.mxu3 %v2277_v63  ;;  %2334 = vmatpush.msra.mxu1 %v2245_v7  ;;  %v2242_v26 = vld [vmem:[%s6669_s5 + $0x88] sm:$0xff]  ;;  %v2298_v31 = vld.sshfl [vmem:[#allocation1 + $0x18] sm:$0xff pattern:$0x73625140] }
 0x1f7   :  { %2355 = vmatpush.msra.mxu2 %v2260_v62  ;;  %2315 = vmatpush.msra.mxu0 %v2228_v6 }
 0x1f8   :  { %v1822_v49 = vadd.f32 %v1821_v41, %v1802_v37  ;;  %v1861_v59 = vpop.f32.mrf.mxu1  ;;  %v1881_v55 = vpop.f32.mrf.mxu2  ;;  %2375 = vmatpush.msra.mxu3 %v2276_v3  ;;  %2335 = vmatpush.msra.mxu1 %v2244_v12  ;;  %v6463_v37 = vld [vmem:[%s6673_s7 + $0x8] sm:$0xff] }
 0x1f9   :  { %2356 = vmatpush.msra.mxu2 %v2259_v9  ;;  %2316 = vmatpush.msra.mxu0 %v2227_v11  ;;  %v3290_v9 = vld [vmem:[%s6668_s6] ss:$0 sm:$0xff]  ;;  %s3350_s6 = smov 64  }
 0x1fa   :  { %v1842_v53 = vadd.f32 %v1841_v46, %v1822_v49  ;;  %2376 = vmatpush.msra.mxu3 %v2275_v14  ;;  %2336 = vmatpush.msra.mxu1 %v2243_v17  ;;  %v2395_v46 = vrot.slane %v6489_v44, 7 }
 0x1fb   :  { %2357 = vmatpush.msra.mxu2 %v2258_v13  ;;  %2317 = vmatpush.msra.mxu0 %v2226_v16 }
 0x1fc   :  { %v1862_v5 = vadd.f32 %v1861_v59, %v1842_v53  ;;  %v1921_v15 = vpop.f32.mrf.mxu0  ;;  %2377 = vmatpush.msra.mxu3 %v2274_v20  ;;  %2337 = vmatpush.msra.mxu1 %v2242_v26  ;;  %v2397_v50 = vsel %vm2396_vm0, %v2395_v46, %v6497_v48 }
 0x1fd   :  { %2358 = vmatpush.msra.mxu2 %v2257_v19  ;;  %2318 = vmatpush.msra.mxu0 %v2225_v25  ;;  %v6528_v19 = vld [vmem:[%s6675_s10] ss:$0 sm:$0xff]  ;;  %s3351_s10 = smov 32  }
 0x1fe   :  { %v1882_v8 = vadd.f32 %v1881_v55, %v1862_v5  ;;  %v1901_v4 = vpop.f32.mrf.mxu3  ;;  %2359 = vmatmul.f32.vlgmr.msra.gmra.mxu2 %v2297_v24  ;;  %2378 = vmatpush.msra.mxu3 %v2273_v27 }
 0x1ff   :  { %2461 = vmatpush.msrb.mxu2 %v6434_v22  ;;  %2319 = vmatmul.f32.vlgmr.msra.gmra.mxu0 %v2295_v29 }
 0x200   :  { %v1902_v18 = vadd.f32 %v1901_v4, %v1882_v8  ;;  %v1941_v23 = vpop.f32.mrf.mxu1  ;;  %v1961_v28 = vpop.f32.mrf.mxu2  ;;  %2379 = vmatmul.f32.vlgmr.msra.gmra.mxu3 %v2298_v31  ;;  %2338 = vmatpush.msra.mxu1 %v2241_v33 }
 0x201   :  { %2462 = vmatpush.msrb.mxu2 %v6449_v32  ;;  %2339 = vmatmul.f32.vlgmr.msra.gmra.mxu1 %v2296_v34 }
 0x202   :  { %v1922_v21 = vadd.f32 %v1921_v15, %v1902_v18  ;;  %2416 = vmatpush.msrb.mxu0 %v6458_v36  ;;  %2439 = vmatpush.msrb.mxu1 %v6463_v37 }
 0x203   :  { %2463 = vmatpush.msrb.mxu2 %v6468_v38  ;;  %2530 = vmatpush.msrb.mxu3 %v6458_v36 }
 0x204   :  { %v1942_v30 = vadd.f32 %v1941_v23, %v1922_v21  ;;  %2553 = vmatpush.msra.mxu0 %v6463_v37  ;;  %2440 = vmatpush.msrb.mxu1 %v6484_v43 }
 0x205   :  { %2464 = vmatpush.msrb.mxu2 %v6474_v40  ;;  %2666 = vmatpush.msra.mxu3 %v6463_v37 }
 0x206   :  { %v1962_v35 = vadd.f32 %v1961_v28, %v1942_v30  ;;  %v1981_v39 = vpop.f32.mrf.mxu3  ;;  %2465 = vmatmul.f32.vlgmr.msrb.gmra.mxu2 %v3349_v45  ;;  %2554 = vmatpush.msra.mxu0 %v6484_v43 }
 0x207   :  { %2576 = vmatpush.msra.mxu1 %v6434_v22  ;;  %2643 = vmatpush.msra.mxu2 %v6458_v36 }
 0x208   :  { %v1982_v42 = vadd.f32 %v1981_v39, %v1962_v35  ;;  %2667 = vmatpush.msra.mxu3 %v6484_v43  ;;  %3253 = vmatmul.msk.f32.vlgmr.msrb.gmra.mxu0 %vm2398_vm1, %v2397_v50 }
 0x209   :  { %2577 = vmatpush.msra.mxu1 %v6449_v32  ;;  %2689 = vmatpush.msrb.mxu0 %v6434_v22 }
 0x20a   :  { %2779 = vmatpush.msrb.mxu2 %v6463_v37 }
 0x20b   :  { %2578 = vmatpush.msra.mxu1 %v6468_v38  ;;  %2690 = vmatpush.msrb.mxu0 %v6449_v32 }
 0x20c   :  { %2780 = vmatpush.msrb.mxu2 %v6484_v43 }
 0x20d   :  { %2579 = vmatpush.msra.mxu1 %v6474_v40  ;;  %2691 = vmatpush.msrb.mxu0 %v6468_v38 }
 0x20f   :  { %2692 = vmatpush.msrb.mxu0 %v6474_v40 }
 0x215   :  { %v2001_v41 = vpop.f32.mrf.mxu0 }
 0x216   :  { %v2002_v47 = vadd.f32 %v2001_v41, %v1982_v42 }
 0x218   :  { %v2021_v49 = vpop.f32.mrf.mxu1 }
 0x219   :  { %v2022_v56 = vadd.f32 %v2021_v49, %v2002_v47 }
 0x21b   :  { %v2041_v51 = vpop.f32.mrf.mxu2 }
 0x21c   :  { %v2042_v52 = vadd.f32 %v2041_v51, %v2022_v56  ;;  %v2511_v51 = vrot.slane %v6497_v48, 1 }
 0x21e   :  { %v2061_v53 = vpop.f32.mrf.mxu3  ;;  %v2512_v56 = vsel %vm2396_vm0, %v6489_v44, %v2511_v51 }
 0x21f   :  { %v2062_v58 = vadd.f32 %v2061_v53, %v2042_v52  ;;  %3256 = vmatmul.msk.f32.vlgmr.msrb.gmra.mxu3 %vm2398_vm1, %v2512_v56 }
 0x220   :  { %2802 = vmatpush.msrb.mxu3 %v6434_v22 }
 0x222   :  { %2803 = vmatpush.msrb.mxu3 %v6449_v32 }
 0x224   :  { %2804 = vmatpush.msrb.mxu3 %v6468_v38 }
 0x226   :  { %2805 = vmatpush.msrb.mxu3 %v6474_v40 }
 0x237   :  { %v2081_v57 = vpop.f32.mrf.mxu0 }
 0x238   :  { %v2082_v59 = vadd.f32 %v2081_v57, %v2062_v58 }
 0x23a   :  { %v2101_v60 = vpop.f32.mrf.mxu1 }
 0x23b   :  { %v2102_v0 = vadd.f32 %v2101_v60, %v2082_v59 }
 0x23d   :  { %v2121_v61 = vpop.f32.mrf.mxu2 }
 0x23e   :  { %v2122_v54 = vadd.f32 %v2121_v61, %v2102_v0 }
 0x240   :  { %v2141_v55 = vpop.f32.mrf.mxu3 }
 0x241   :  { %v2142_v1 = vadd.f32 %v2141_v55, %v2122_v54 }
 0x259   :  { %v2161_v2 = vpop.f32.mrf.mxu0 }
 0x25a   :  { %v2162_v5 = vadd.f32 %v2161_v2, %v2142_v1 }
 0x25b   :  { %v2181_v62 = vpop.f32.mrf.mxu1 }
 0x25c   :  { %v2182_v63 = vadd.f32 %v2181_v62, %v2162_v5 }
 0x25f   :  { %v2201_v6 = vpop.f32.mrf.mxu2 }
 0x260   :  { %v2202_v7 = vadd.f32 %v2201_v6, %v2182_v63  ;;  %v2623_v6 = vrot.slane %v6497_v48, 2 }
 0x261   :  { %v2221_v10 = vpop.f32.mrf.mxu3 }
 0x262   :  { %v6515_v8 = vadd.f32 %v2221_v10, %v2202_v7  ;;  %v2624_v7 = vrot.slane %v6489_v44, 1 }
 0x264   :  { %3254 = vmatmul.msk.f32.vlgmr.msrb.gmra.mxu1 %vm2421_vm2, %v6515_v8  ;;  %v2625_v10 = vsel %vm2396_vm0, %v2624_v7, %v2623_v6 }
 0x265   :  { %2756 = vmatpush.msrb.mxu1 %v6458_v36  ;;  %3260 = vmatmul.msk.f32.vlgmr.msra.gmra.mxu2 %vm2398_vm1, %v2625_v10 }
 0x266   :  { %2915 = vmatpush.msra.mxu2 %v6434_v22 }
 0x268   :  { %2916 = vmatpush.msra.mxu2 %v6449_v32 }
 0x26a   :  { %2917 = vmatpush.msra.mxu2 %v6468_v38 }
 0x26c   :  { %2918 = vmatpush.msra.mxu2 %v6474_v40 }
 0x27c   :  { %v2320_v3 = vpop.f32.mrf.mxu0 }
 0x27d   :  { %v2321_v4 = vadd.f32 %v3290_v9, %v2320_v3 }
 0x27e   :  { %v2340_v11 = vpop.f32.mrf.mxu1 }
 0x27f   :  { %v2341_v12 = vadd.f32 %v2340_v11, %v2321_v4 }
 0x281   :  { %v2360_v13 = vpop.f32.mrf.mxu2 }
 0x282   :  { %v6523_v14 = vadd.f32 %v2360_v13, %v2341_v12 }
 0x283   :  { %v6552_v59 = vpop.f32.mrf.mxu3 }
 0x285   :  { %v2418_v15 = vpop.f32.mrf.mxu0 }
 0x289   :  { %v2466_v17 = vpop.f32.mrf.mxu2 }
 0x2a2   :  { %v2532_v60 = vpop.f32.mrf.mxu3 }
 0x2e1   :  { %v2442_v16 = vpop.f32.mrf.mxu1 }
 0x2e2   :  { %v2443_v18 = vadd.f32 %v2442_v16, %v2418_v15 }
 0x2e4   :  { %v2469_v20 = vadd.f32 %v2466_v17, %v2443_v18 }
 0x2e6   :  { %v2473_v21 = vadd.f32 %v6528_v19, %v2469_v20 }
 0x2e8   :  { %3293 = vtanh.f32 %v2473_v21  ;;  %v3255_v24 = vmul.f32 -1.442695, %v2473_v21 }
 0x2ea   :  { %3295 = vpow2.f32 %v3255_v24 }
 0x2ee   :  { %v3294_v23 = vpop.eup %3293 }
 0x2ef   :  { %2496 = vrot.lane.b32.xlu0 %v3294_v23, %s3350_s6 }
 0x2f0   :  { %v3296_v25 = vpop.eup %3295 }
 0x2f1   :  { %v2477_v26 = vadd.f32 1.0, %v3296_v25 }
 0x2f3   :  { %3297 = vrcp.f32 %v2477_v26  ;;  %v2489_v33 = vand.u32 2147483648, %v2477_v26  ;;  %vm2483_vm4 = vweird.f32 %v2477_v26  ;;  %v2487_v34 = vand.u32 2147483647, %v2477_v26 }
 0x2f5   :  { %v2490_v39 = vor.u32 1.1754944e-38, %v2489_v33  ;;  %vm2488_vm6 = vcmp.eq.f32.partialorder %v2487_v34, 8.507059e+37 }
 0x2f9   :  { %v3298_v27 = vpop.eup %3297 }
 0x2fa   :  { %v2479_v28 = vmul.f32 %v3298_v27, %v2477_v26  ;;  %vm2484_vm3 = vweird.f32 %v3298_v27 }
 0x2fb   :  { %vm2485_vm5 = vmor %vm2483_vm4, %vm2484_vm3 }
 0x2fc   :  { %v2480_v29 = vsub.f32 1.0, %v2479_v28 }
 0x2fe   :  { %v2481_v31 = vmul.f32 %v3298_v27, %v2480_v29 }
 0x300   :  { %v2482_v30 = vadd.f32 %v3298_v27, %v2481_v31 }
 0x302   :  { %v2486_v35 = vsel %vm2485_vm5, %v3298_v27, %v2482_v30  ;;  %v2645_v30 = vpop.f32.mrf.mxu2 }
 0x303   :  { %v2491_v42 = vsel %vm2488_vm6, %v2490_v39, %v2486_v35 }
 0x304   :  { %v2494_v46 = vmul.f32 0.0, %v2491_v42 }
 0x361   :  { %v2497_v41 = vpop.permute.xlu0 %2496 }
 0x362   :  { %v2499_v45 = vmul.f32 %v2497_v41, %v2491_v42 }
 0x364   :  { %2501 = vrot.lane.b32.xlu0 %v2499_v45, %s3351_s10 }
 0x3d6   :  { %v2502_v47 = vpop.permute.xlu0 %2501 }
 0x3d7   :  { %v6533_v49 = vadd.f32 %v2502_v47, %v2494_v46 }
 0x3d9   :  { %3299 = vtanh.f32 %v6533_v49 }
 0x3df   :  { %v3300_v50 = vpop.eup %3299 }
 0x3e0   :  { %2507 = vrot.lane.b32.xlu1 %v3300_v50, %s3350_s6  ;;  %v2737_v50 = vrot.slane %v6489_v44, 2 }
 0x3e8   :  { %2535 = vrot.lane.b32.xlu1 %v6515_v8, %s3352_s22 }
 0x452   :  { %v2508_v52 = vpop.permute.xlu1 %2507 }
 0x453   :  { %v2510_v53 = vmul.f32 %v2508_v52, %v2491_v42 }
 0x455   :  { %2560 = vrot.lane.b32.xlu2 %v2510_v53, %s3351_s10 }
 0x45a   :  { %v2536_v57 = vpop.permute.xlu1 %2535 }
 0x45b   :  { %3257 = vmatmul.msk.f32.vlgmr.msra.gmra.mxu0 %vm2421_vm2, %v2536_v57 }
 0x45c   :  { %2869 = vmatpush.msra.mxu0 %v6458_v36 }
 0x4af   :  { %v2561_v58 = vpop.permute.xlu2 %2560 }
 0x4b0   :  { %3258 = vmatmul.msk.f32.vlgmr.msra.gmra.mxu1 %vm2445_vm7, %v2561_v58 }
 0x4b1   :  { %2892 = vmatpush.msra.mxu1 %v6463_v37 }
 0x4b3   :  { %2893 = vmatpush.msra.mxu1 %v6484_v43 }
 0x4d8   :  { %v2556_v61 = vpop.f32.mrf.mxu0 }
 0x4d9   :  { %v2557_v0 = vadd.f32 %v2556_v61, %v2532_v60 }
 0x52d   :  { %v2581_v54 = vpop.f32.mrf.mxu1 }
 0x52e   :  { %v2584_v55 = vadd.f32 %v2581_v54, %v2557_v0 }
 0x530   :  { %v2585_v1 = vadd.f32 %v6528_v19, %v2584_v55 }
 0x532   :  { %3301 = vtanh.f32 %v2585_v1  ;;  %v3259_v5 = vmul.f32 -1.442695, %v2585_v1 }
 0x534   :  { %3303 = vpow2.f32 %v3259_v5 }
 0x538   :  { %v3302_v2 = vpop.eup %3301 }
 0x539   :  { %2608 = vrot.lane.b32.xlu2 %v3302_v2, %s3350_s6 }
 0x53a   :  { %v3304_v62 = vpop.eup %3303 }
 0x53b   :  { %v2589_v63 = vadd.f32 1.0, %v3304_v62 }
 0x53d   :  { %3305 = vrcp.f32 %v2589_v63  ;;  %v2601_v13 = vand.u32 2147483648, %v2589_v63  ;;  %vm2595_vm9 = vweird.f32 %v2589_v63  ;;  %v2599_v15 = vand.u32 2147483647, %v2589_v63 }
 0x53f   :  { %v2602_v17 = vor.u32 1.1754944e-38, %v2601_v13  ;;  %vm2600_vm11 = vcmp.eq.f32.partialorder %v2599_v15, 8.507059e+37 }
 0x541   :  { %2648 = vrot.lane.b32.xlu2 %v6515_v8, %s3353_s1 }
 0x543   :  { %v3306_v9 = vpop.eup %3305 }
 0x544   :  { %v2591_v3 = vmul.f32 %v3306_v9, %v2589_v63  ;;  %vm2596_vm8 = vweird.f32 %v3306_v9 }
 0x545   :  { %vm2597_vm10 = vmor %vm2595_vm9, %vm2596_vm8 }
 0x546   :  { %v2592_v4 = vsub.f32 1.0, %v2591_v3 }
 0x548   :  { %v2593_v11 = vmul.f32 %v3306_v9, %v2592_v4 }
 0x54a   :  { %v2594_v12 = vadd.f32 %v3306_v9, %v2593_v11 }
 0x54c   :  { %v2598_v16 = vsel %vm2597_vm10, %v3306_v9, %v2594_v12 }
 0x54d   :  { %v2603_v20 = vsel %vm2600_vm11, %v2602_v17, %v2598_v16 }
 0x54e   :  { %v2606_v24 = vmul.f32 %v2603_v20, %v6533_v49  ;;  %v2736_v49 = vrot.slane %v6497_v48, 3 }
 0x550   :  { %v2738_v56 = vsel %vm2396_vm0, %v2737_v50, %v2736_v49 }
 0x551   :  { %3264 = vmatmul.msk.f32.vlgmr.msrb.gmra.mxu1 %vm2398_vm1, %v2738_v56 }
 0x552   :  { %3028 = vmatpush.msrb.mxu1 %v6434_v22 }
 0x554   :  { %3029 = vmatpush.msrb.mxu1 %v6449_v32 }
 0x556   :  { %3030 = vmatpush.msrb.mxu1 %v6468_v38 }
 0x558   :  { %3031 = vmatpush.msrb.mxu1 %v6474_v40 }
 0x593   :  { %v2609_v18 = vpop.permute.xlu2 %2608 }
 0x594   :  { %v2611_v21 = vmul.f32 %v2609_v18, %v2603_v20 }
 0x596   :  { %2613 = vrot.lane.b32.xlu0 %v2611_v21, %s3351_s10 }
 0x59b   :  { %v2649_v23 = vpop.permute.xlu2 %2648 }
 0x59c   :  { %3261 = vmatmul.msk.f32.vlgmr.msra.gmra.mxu3 %vm2421_vm2, %v2649_v23 }
 0x59d   :  { %2982 = vmatpush.msra.mxu3 %v6458_v36 }
 0x5ce   :  { %v2758_v4 = vpop.f32.mrf.mxu1 }
 0x608   :  { %v2614_v25 = vpop.permute.xlu0 %2613 }
 0x609   :  { %v2616_v26 = vadd.f32 %v2614_v25, %v2606_v24 }
 0x60b   :  { %3307 = vtanh.f32 %v2616_v26 }
 0x611   :  { %v3308_v27 = vpop.eup %3307 }
 0x612   :  { %2619 = vrot.lane.b32.xlu1 %v3308_v27, %s3350_s6 }
 0x61f   :  { %v2669_v33 = vpop.f32.mrf.mxu3 }
 0x620   :  { %v2670_v34 = vadd.f32 %v2669_v33, %v2645_v30  ;;  %v2849_v33 = vrot.slane %v6497_v48, 4 }
 0x684   :  { %v2620_v28 = vpop.permute.xlu1 %2619 }
 0x685   :  { %v2622_v29 = vmul.f32 %v2620_v28, %v2603_v20 }
 0x687   :  { %2673 = vrot.lane.b32.xlu0 %v2622_v29, %s3351_s10 }
 0x6f9   :  { %v2674_v31 = vpop.permute.xlu0 %2673 }
 0x6fa   :  { %3262 = vmatmul.msk.f32.vlgmr.msrb.gmra.mxu0 %vm2445_vm7, %v2674_v31 }
 0x6fb   :  { %3005 = vmatpush.msrb.mxu0 %v6463_v37 }
 0x6fd   :  { %3006 = vmatpush.msrb.mxu0 %v6484_v43 }
 0x777   :  { %v2694_v35 = vpop.f32.mrf.mxu0 }
 0x778   :  { %v2697_v39 = vadd.f32 %v2694_v35, %v2670_v34  ;;  %v2850_v34 = vrot.slane %v6489_v44, 3 }
 0x77a   :  { %v2698_v41 = vadd.f32 %v6528_v19, %v2697_v39  ;;  %v2851_v35 = vsel %vm2396_vm0, %v2850_v34, %v2849_v33 }
 0x77b   :  { %3268 = vmatmul.msk.f32.vlgmr.msra.gmra.mxu0 %vm2398_vm1, %v2851_v35 }
 0x77c   :  { %3309 = vtanh.f32 %v2698_v41  ;;  %v3263_v45 = vmul.f32 -1.442695, %v2698_v41  ;;  %3141 = vmatpush.msra.mxu0 %v6434_v22 }
 0x77e   :  { %3311 = vpow2.f32 %v3263_v45  ;;  %3142 = vmatpush.msra.mxu0 %v6449_v32 }
 0x780   :  { %3143 = vmatpush.msra.mxu0 %v6468_v38 }
 0x782   :  { %v3310_v42 = vpop.eup %3309  ;;  %3144 = vmatpush.msra.mxu0 %v6474_v40 }
 0x783   :  { %2721 = vrot.lane.b32.xlu1 %v3310_v42, %s3350_s6 }
 0x784   :  { %v3312_v46 = vpop.eup %3311 }
 0x785   :  { %v2702_v47 = vadd.f32 1.0, %v3312_v46 }
 0x787   :  { %3313 = vrcp.f32 %v2702_v47  ;;  %v2714_v60 = vand.u32 2147483648, %v2702_v47  ;;  %vm2708_vm13 = vweird.f32 %v2702_v47  ;;  %v2712_v61 = vand.u32 2147483647, %v2702_v47 }
 0x789   :  { %v2715_v54 = vor.u32 1.1754944e-38, %v2714_v60  ;;  %vm2713_vm15 = vcmp.eq.f32.partialorder %v2712_v61, 8.507059e+37  ;;  %v2962_v60 = vrot.slane %v6497_v48, 5  ;;  %v2963_v61 = vrot.slane %v6489_v44, 4 }
 0x78b   :  { %2761 = vrot.lane.b32.xlu1 %v6515_v8, %s3354_s23 }
 0x78d   :  { %v3314_v51 = vpop.eup %3313 }
 0x78e   :  { %v2704_v52 = vmul.f32 %v3314_v51, %v2702_v47  ;;  %vm2709_vm12 = vweird.f32 %v3314_v51 }
 0x78f   :  { %vm2710_vm14 = vmor %vm2708_vm13, %vm2709_vm12 }
 0x790   :  { %v2705_v53 = vsub.f32 1.0, %v2704_v52 }
 0x792   :  { %v2706_v57 = vmul.f32 %v3314_v51, %v2705_v53 }
 0x794   :  { %v2707_v58 = vadd.f32 %v3314_v51, %v2706_v57 }
 0x796   :  { %v2711_v0 = vsel %vm2710_vm14, %v3314_v51, %v2707_v58 }
 0x797   :  { %v2716_v1 = vsel %vm2713_vm15, %v2715_v54, %v2711_v0  ;;  %v2964_v0 = vsel %vm2396_vm0, %v2963_v61, %v2962_v60 }
 0x798   :  { %v2719_v62 = vmul.f32 %v2716_v1, %v2616_v26 }
 0x7f5   :  { %v2722_v55 = vpop.permute.xlu1 %2721 }
 0x7f6   :  { %v2724_v2 = vmul.f32 %v2722_v55, %v2716_v1 }
 0x7f8   :  { %2726 = vrot.lane.b32.xlu2 %v2724_v2, %s3351_s10  ;;  %v2871_v32 = vpop.f32.mrf.mxu0 }
 0x7fd   :  { %v2762_v5 = vpop.permute.xlu1 %2761 }
 0x7fe   :  { %3265 = vmatmul.msk.f32.vlgmr.msrb.gmra.mxu2 %vm2421_vm2, %v2762_v5 }
 0x7ff   :  { %3095 = vmatpush.msrb.mxu2 %v6458_v36 }
 0x852   :  { %v2727_v63 = vpop.permute.xlu2 %2726 }
 0x853   :  { %v2729_v6 = vadd.f32 %v2727_v63, %v2719_v62 }
 0x855   :  { %3315 = vtanh.f32 %v2729_v6 }
 0x85b   :  { %v3316_v7 = vpop.eup %3315 }
 0x85c   :  { %2732 = vrot.lane.b32.xlu0 %v3316_v7, %s3350_s6 }
 0x881   :  { %v2782_v36 = vpop.f32.mrf.mxu2 }
 0x882   :  { %v2783_v11 = vadd.f32 %v2782_v36, %v2758_v4 }
 0x8ce   :  { %v2733_v10 = vpop.permute.xlu0 %2732 }
 0x8cf   :  { %v2735_v9 = vmul.f32 %v2733_v10, %v2716_v1 }
 0x8d1   :  { %2786 = vrot.lane.b32.xlu2 %v2735_v9, %s3351_s10 }
 0x92b   :  { %v2787_v3 = vpop.permute.xlu2 %2786 }
 0x92c   :  { %3266 = vmatmul.msk.f32.vlgmr.msrb.gmra.mxu3 %vm2445_vm7, %v2787_v3 }
 0x92d   :  { %3118 = vmatpush.msrb.mxu3 %v6463_v37 }
 0x92f   :  { %3119 = vmatpush.msrb.mxu3 %v6484_v43 }
 0x934   :  { %3272 = vmatmul.msk.f32.vlgmr.msra.gmra.mxu3 %vm2398_vm1, %v2964_v0 }
 0x9af   :  { %v2807_v12 = vpop.f32.mrf.mxu3 }
 0x9b0   :  { %v2810_v13 = vadd.f32 %v2807_v12, %v2783_v11 }
 0x9b2   :  { %v2811_v15 = vadd.f32 %v6528_v19, %v2810_v13 }
 0x9b4   :  { %3317 = vtanh.f32 %v2811_v15  ;;  %v3267_v17 = vmul.f32 -1.442695, %v2811_v15 }
 0x9b6   :  { %3319 = vpow2.f32 %v3267_v17  ;;  %v3192_v17 = vld [vmem:[%s6676_s12] sm:$0xff] }
 0x9ba   :  { %v3318_v16 = vpop.eup %3317 }
 0x9bb   :  { %2834 = vrot.lane.b32.xlu0 %v3318_v16, %s3350_s6 }
 0x9bc   :  { %v3320_v18 = vpop.eup %3319 }
 0x9bd   :  { %v2815_v20 = vadd.f32 1.0, %v3320_v18 }
 0x9bf   :  { %3321 = vrcp.f32 %v2815_v20  ;;  %v2827_v25 = vand.u32 2147483648, %v2815_v20  ;;  %vm2821_vm4 = vweird.f32 %v2815_v20  ;;  %v2825_v26 = vand.u32 2147483647, %v2815_v20 }
 0x9c1   :  { %v2828_v28 = vor.u32 1.1754944e-38, %v2827_v25  ;;  %vm2826_vm6 = vcmp.eq.f32.partialorder %v2825_v26, 8.507059e+37 }
 0x9c5   :  { %v3322_v21 = vpop.eup %3321 }
 0x9c6   :  { %v2817_v37 = vmul.f32 %v3322_v21, %v2815_v20  ;;  %vm2822_vm3 = vweird.f32 %v3322_v21  ;;  %v2381_v20 = vadd.f32 %v6552_v59, %v6523_v14  ;;  %v3075_v59 = vrot.slane %v6497_v48, 6 }
 0x9c7   :  { %vm2823_vm5 = vmor %vm2821_vm4, %vm2822_vm3  ;;  %vm3247_vm4 = vcmask 1024  }
 0x9c8   :  { %v2818_v23 = vsub.f32 1.0, %v2817_v37 }
 0x9ca   :  { %v2819_v43 = vmul.f32 %v3322_v21, %v2818_v23 }
 0x9cc   :  { %v2820_v24 = vadd.f32 %v3322_v21, %v2819_v43 }
 0x9ce   :  { %v2824_v27 = vsel %vm2823_vm5, %v3322_v21, %v2820_v24  ;;  %v2984_v21 = vpop.f32.mrf.mxu3 }
 0x9cf   :  { %v2829_v31 = vsel %vm2826_vm6, %v2828_v28, %v2824_v27 }
 0x9d0   :  { %v2832_v39 = vmul.f32 %v2829_v31, %v2729_v6 }
 0xa2d   :  { %v2835_v29 = vpop.permute.xlu0 %2834 }
 0xa2e   :  { %v2837_v30 = vmul.f32 %v2835_v29, %v2829_v31  ;;  %v3076_v29 = vrot.slane %v6489_v44, 5 }
 0xa30   :  { %2839 = vrot.lane.b32.xlu1 %v2837_v30, %s3351_s10 }
 0xa38   :  { %2874 = vrot.lane.b32.xlu1 %v6515_v8, %s3350_s6 }
 0xaa2   :  { %v2840_v41 = vpop.permute.xlu1 %2839 }
 0xaa3   :  { %v2842_v42 = vadd.f32 %v2840_v41, %v2832_v39 }
 0xaa5   :  { %3323 = vtanh.f32 %v2842_v42 }
 0xaaa   :  { %v2875_v45 = vpop.permute.xlu1 %2874 }
 0xaab   :  { %v3324_v46 = vpop.eup %3323  ;;  %3269 = vmatmul.msk.f32.vlgmr.msra.gmra.mxu1 %vm2421_vm2, %v2875_v45 }
 0xaac   :  { %2845 = vrot.lane.b32.xlu2 %v3324_v46, %s3350_s6  ;;  %3211 = vmatpush.msra.mxu1 %v3192_v17  ;;  %v3189_v17 = vld [vmem:[%s6677_s11 + $0x8] sm:$0xff] }
 0xb06   :  { %v2846_v47 = vpop.permute.xlu2 %2845 }
 0xb07   :  { %v2848_v49 = vmul.f32 %v2846_v47, %v2829_v31  ;;  %v3077_v31 = vsel %vm2396_vm0, %v3076_v29, %v3075_v59 }
 0xb09   :  { %2899 = vrot.lane.b32.xlu0 %v2848_v49, %s3351_s10 }
 0xb28   :  { %v2895_v38 = vpop.f32.mrf.mxu1 }
 0xb29   :  { %v2896_v40 = vadd.f32 %v2895_v38, %v2871_v32 }
 0xb7b   :  { %v2900_v22 = vpop.permute.xlu0 %2899 }
 0xb7c   :  { %3270 = vmatmul.msk.f32.vlgmr.msra.gmra.mxu2 %vm2445_vm7, %v2900_v22 }
 0xb84   :  { %3276 = vmatmul.msk.f32.vlgmr.msrb.gmra.mxu2 %vm2398_vm1, %v3077_v31 }
 0xbff   :  { %v2920_v50 = vpop.f32.mrf.mxu2 }
 0xc00   :  { %v2923_v51 = vadd.f32 %v2920_v50, %v2896_v40 }
 0xc02   :  { %v2924_v56 = vadd.f32 %v6528_v19, %v2923_v51 }
 0xc04   :  { %3325 = vtanh.f32 %v2924_v56  ;;  %v3271_v53 = vmul.f32 -1.442695, %v2924_v56 }
 0xc06   :  { %3327 = vpow2.f32 %v3271_v53 }
 0xc07   :  { %v3097_v56 = vpop.f32.mrf.mxu2 }
 0xc0a   :  { %v3326_v52 = vpop.eup %3325 }
 0xc0b   :  { %2947 = vrot.lane.b32.xlu2 %v3326_v52, %s3350_s6 }
 0xc0c   :  { %v3328_v57 = vpop.eup %3327 }
 0xc0d   :  { %v2928_v58 = vadd.f32 1.0, %v3328_v57 }
 0xc0f   :  { %3329 = vrcp.f32 %v2928_v58  ;;  %v2940_v62 = vand.u32 2147483648, %v2928_v58  ;;  %vm2934_vm9 = vweird.f32 %v2928_v58  ;;  %v2938_v63 = vand.u32 2147483647, %v2928_v58 }
 0xc11   :  { %v2941_v7 = vor.u32 1.1754944e-38, %v2940_v62  ;;  %vm2939_vm11 = vcmp.eq.f32.partialorder %v2938_v63, 8.507059e+37 }
 0xc13   :  { %2987 = vrot.lane.b32.xlu2 %v6515_v8, %s3355_s24 }
 0xc15   :  { %v3330_v54 = vpop.eup %3329 }
 0xc16   :  { %v2930_v55 = vmul.f32 %v3330_v54, %v2928_v58  ;;  %vm2935_vm8 = vweird.f32 %v3330_v54 }
 0xc17   :  { %vm2936_vm10 = vmor %vm2934_vm9, %vm2935_vm8 }
 0xc18   :  { %v2931_v1 = vsub.f32 1.0, %v2930_v55 }
 0xc1a   :  { %v2932_v2 = vmul.f32 %v3330_v54, %v2931_v1 }
 0xc1c   :  { %v2933_v5 = vadd.f32 %v3330_v54, %v2932_v2 }
 0xc1e   :  { %v2937_v6 = vsel %vm2936_vm10, %v3330_v54, %v2933_v5 }
 0xc1f   :  { %v2942_v9 = vsel %vm2939_vm11, %v2941_v7, %v2937_v6 }
 0xc20   :  { %v2945_v36 = vmul.f32 %v2942_v9, %v2842_v42 }
 0xc65   :  { %v2948_v10 = vpop.permute.xlu2 %2947 }
 0xc66   :  { %v2950_v3 = vmul.f32 %v2948_v10, %v2942_v9 }
 0xc68   :  { %2952 = vrot.lane.b32.xlu0 %v2950_v3, %s3351_s10 }
 0xc6d   :  { %v2988_v4 = vpop.permute.xlu2 %2987 }
 0xc6e   :  { %3273 = vmatmul.msk.f32.vlgmr.msrb.gmra.mxu0 %vm2421_vm2, %v2988_v4 }
 0xcda   :  { %v2953_v11 = vpop.permute.xlu0 %2952 }
 0xcdb   :  { %v2955_v12 = vadd.f32 %v2953_v11, %v2945_v36 }
 0xcdd   :  { %3331 = vtanh.f32 %v2955_v12 }
 0xce3   :  { %v3332_v13 = vpop.eup %3331 }
 0xce4   :  { %2958 = vrot.lane.b32.xlu1 %v3332_v13, %s3350_s6 }
 0xceb   :  { %v3008_v37 = vpop.f32.mrf.mxu0 }
 0xcec   :  { %v3009_v23 = vadd.f32 %v3008_v37, %v2984_v21  ;;  %v19_v37 = vstv %s6678_s13 }
 0xced   :  { %20 = vst [vmem:[#allocation2] sm:$0x1] %v19_v37 }
 0xd56   :  { %v2959_v15 = vpop.permute.xlu1 %2958 }
 0xd57   :  { %v2961_v16 = vmul.f32 %v2959_v15, %v2942_v9  ;;  %v3191_v15 = vld [vmem:[%s6677_s11 + $0x18] sm:$0xff] }
 0xd58   :  { %3233 = vmatpush.msra.mxu2 %v3191_v15 }
 0xd59   :  { %3012 = vrot.lane.b32.xlu0 %v2961_v16, %s3351_s10  ;;  %v3190_v16 = vld [vmem:[%s6677_s11 + $0x10] sm:$0xff] }
 0xd5a   :  { %3234 = vmatpush.msra.mxu2 %v3190_v16 }
 0xd5c   :  { %3235 = vmatpush.msra.mxu2 %v3189_v17 }
 0xdcb   :  { %v3013_v18 = vpop.permute.xlu0 %3012 }
 0xdcc   :  { %3274 = vmatmul.msk.f32.vlgmr.msrb.gmra.mxu1 %vm2445_vm7, %v3013_v18  ;;  %v3188_v18 = vld [vmem:[%s6677_s11] sm:$0xff] }
 0xdcd   :  { %3236 = vmatpush.msra.mxu2 %v3188_v18 }
 0xdd4   :  { %3280 = vmatmul.msk.f32.vlgmr.msra.gmra.mxu1 %vm2398_vm1, %v2381_v20 }
 0xe49   :  { %v3033_v43 = vpop.f32.mrf.mxu1 }
 0xe4a   :  { %v3036_v24 = vadd.f32 %v3033_v43, %v3009_v23  ;;  %v3292_v43 = vld [vmem:[#allocation2] ss:$0 sm:$0xff] }
 0xe4c   :  { %v3037_v25 = vadd.f32 %v6528_v19, %v3036_v24 }
 0xe4e   :  { %3333 = vtanh.f32 %v3037_v25  ;;  %v3275_v27 = vmul.f32 -1.442695, %v3037_v25 }
 0xe50   :  { %3335 = vpow2.f32 %v3275_v27 }
 0xe51   :  { %v3213_v24 = vpop.f32.mrf.mxu1 }
 0xe54   :  { %v3334_v26 = vpop.eup %3333 }
 0xe55   :  { %3060 = vrot.lane.b32.xlu1 %v3334_v26, %s3350_s6 }
 0xe56   :  { %v3336_v28 = vpop.eup %3335 }
 0xe57   :  { %v3041_v14 = vadd.f32 1.0, %v3336_v28 }
 0xe59   :  { %3337 = vrcp.f32 %v3041_v14  ;;  %vm3047_vm13 = vweird.f32 %v3041_v14  ;;  %v3051_v41 = vand.u32 2147483647, %v3041_v14 }
 0xe5b   :  { %vm3052_vm15 = vcmp.eq.f32.partialorder %v3051_v41, 8.507059e+37 }
 0xe5d   :  { %3100 = vrot.lane.b32.xlu1 %v6515_v8, %s3351_s10  ;;  %v3053_v8 = vand.u32 2147483648, %v3041_v14 }
 0xe5f   :  { %v3338_v30 = vpop.eup %3337  ;;  %v3054_v45 = vor.u32 1.1754944e-38, %v3053_v8 }
 0xe60   :  { %v3043_v33 = vmul.f32 %v3338_v30, %v3041_v14  ;;  %vm3048_vm12 = vweird.f32 %v3338_v30 }
 0xe61   :  { %vm3049_vm14 = vmor %vm3047_vm13, %vm3048_vm12 }
 0xe62   :  { %v3044_v34 = vsub.f32 1.0, %v3043_v33 }
 0xe64   :  { %v3045_v35 = vmul.f32 %v3338_v30, %v3044_v34 }
 0xe66   :  { %v3046_v39 = vadd.f32 %v3338_v30, %v3045_v35 }
 0xe68   :  { %v3050_v42 = vsel %vm3049_vm14, %v3338_v30, %v3046_v39 }
 0xe69   :  { %v3055_v46 = vsel %vm3052_vm15, %v3054_v45, %v3050_v42 }
 0xe6a   :  { %v3058_v49 = vmul.f32 %v3055_v46, %v2955_v12 }
 0xec7   :  { %v3061_v48 = vpop.permute.xlu1 %3060 }
 0xec8   :  { %v3063_v44 = vmul.f32 %v3061_v48, %v3055_v46 }
 0xeca   :  { %3065 = vrot.lane.b32.xlu2 %v3063_v44, %s3351_s10 }
 0xecf   :  { %v3101_v47 = vpop.permute.xlu1 %3100 }
 0xed0   :  { %3277 = vmatmul.msk.f32.vlgmr.msrb.gmra.mxu3 %vm2421_vm2, %v3101_v47 }
 0xf24   :  { %v3066_v22 = vpop.permute.xlu2 %3065 }
 0xf25   :  { %v3068_v32 = vadd.f32 %v3066_v22, %v3058_v49 }
 0xf27   :  { %3339 = vtanh.f32 %v3068_v32 }
 0xf2d   :  { %v3340_v38 = vpop.eup %3339 }
 0xf2e   :  { %3071 = vrot.lane.b32.xlu0 %v3340_v38, %s3350_s6 }
 0xf53   :  { %v3121_v52 = vpop.f32.mrf.mxu3 }
 0xf54   :  { %v3122_v53 = vadd.f32 %v3121_v52, %v3097_v56 }
 0xfa0   :  { %v3072_v40 = vpop.permute.xlu0 %3071 }
 0xfa1   :  { %v3074_v50 = vmul.f32 %v3072_v40, %v3055_v46 }
 0xfa3   :  { %3125 = vrot.lane.b32.xlu2 %v3074_v50, %s3351_s10 }
 0xffd   :  { %v3126_v51 = vpop.permute.xlu2 %3125 }
 0xffe   :  { %3278 = vmatmul.msk.f32.vlgmr.msra.gmra.mxu0 %vm2445_vm7, %v3126_v51 }
0x107b   :  { %v3146_v57 = vpop.f32.mrf.mxu0 }
0x107c   :  { %v3149_v58 = vadd.f32 %v3146_v57, %v3122_v53 }
0x107e   :  { %v3150_v60 = vadd.f32 %v6528_v19, %v3149_v58 }
0x1080   :  { %3341 = vtanh.f32 %v3150_v60  ;;  %v3279_v0 = vmul.f32 -1.442695, %v3150_v60 }
0x1082   :  { %3343 = vpow2.f32 %v3279_v0 }
0x1086   :  { %v3342_v61 = vpop.eup %3341 }
0x1087   :  { %3173 = vrot.lane.b32.xlu0 %v3342_v61, %s3350_s6 }
0x1088   :  { %v3344_v54 = vpop.eup %3343 }
0x1089   :  { %v3154_v55 = vadd.f32 1.0, %v3344_v54 }
0x108b   :  { %3345 = vrcp.f32 %v3154_v55  ;;  %v3166_v6 = vand.u32 2147483648, %v3154_v55  ;;  %vm3160_vm1 = vweird.f32 %v3154_v55  ;;  %v3164_v7 = vand.u32 2147483647, %v3154_v55 }
0x108d   :  { %v3167_v10 = vor.u32 1.1754944e-38, %v3166_v6  ;;  %vm3165_vm3 = vcmp.eq.f32.partialorder %v3164_v7, 8.507059e+37 }
0x1091   :  { %v3346_v1 = vpop.eup %3345 }
0x1092   :  { %v3156_v2 = vmul.f32 %v3346_v1, %v3154_v55  ;;  %vm3161_vm0 = vweird.f32 %v3346_v1 }
0x1093   :  { %vm3162_vm2 = vmor %vm3160_vm1, %vm3161_vm0 }
0x1094   :  { %v3157_v5 = vsub.f32 1.0, %v3156_v2 }
0x1096   :  { %v3158_v62 = vmul.f32 %v3346_v1, %v3157_v5 }
0x1098   :  { %v3159_v63 = vadd.f32 %v3346_v1, %v3158_v62 }
0x109a   :  { %v3163_v19 = vsel %vm3162_vm2, %v3346_v1, %v3159_v63 }
0x109b   :  { %v3168_v3 = vsel %vm3165_vm3, %v3167_v10, %v3163_v19 }
0x109c   :  { %v3171_v36 = vmul.f32 %v3168_v3, %v3068_v32 }
0x10f9   :  { %v3174_v9 = vpop.permute.xlu0 %3173 }
0x10fa   :  { %v3176_v4 = vmul.f32 %v3174_v9, %v3168_v3 }
0x10fc   :  { %3178 = vrot.lane.b32.xlu1 %v3176_v4, %s3351_s10 }
0x116e   :  { %v3179_v11 = vpop.permute.xlu1 %3178 }
0x116f   :  { %v3181_v12 = vadd.f32 %v3179_v11, %v3171_v36 }
0x1171   :  { %3347 = vtanh.f32 %v3181_v12 }
0x1177   :  { %v3348_v13 = vpop.eup %3347 }
0x1178   :  { %3184 = vrot.lane.b32.xlu2 %v3348_v13, %s3350_s6 }
0x11d2   :  { %v3185_v20 = vpop.permute.xlu2 %3184 }
0x11d3   :  { %v3187_v21 = vmul.f32 %v3185_v20, %v3168_v3 }
0x11d5   :  { %3217 = vrot.lane.b32.xlu0 %v3187_v21, %s3351_s10 }
0x1247   :  { %v3218_v23 = vpop.permute.xlu0 %3217 }
0x1248   :  { %3281 = vmatmul.msk.f32.vlgmr.msra.gmra.mxu2 %vm2445_vm7, %v3218_v23 }
0x12cb   :  { %v3238_v25 = vpop.f32.mrf.mxu2 }
0x12cc   :  { %v3239_v26 = vadd.f32 %v3238_v25, %v3213_v24 }
0x12ce   :  { %v3245_v27 = vadd.f32 %v3292_v43, %v3239_v26 }
0x12d0   :  { %v3246_v28 = vmax.f32 %v3245_v27, 0.0 }
0x12d2   :  { %3248 = vst.msk [vmem:[%s6679_s14] sm:$0x3] %vm3247_vm4, %v3246_v28 }

</bundles_post_ra>
